<compile_context>
chip_gen: v7x
topology: tpu7x:2x2x1
jax: 0.10.0
libtpu: 0.0.40
codegen_flags: <defaults>
</compile_context>

<pallas_src>
import functools

import jax
import jax.numpy as jnp
from jax.experimental import pallas as pl
from jax.experimental.pallas import tpu as pltpu


def _relu(x):
    return jnp.maximum(x, 0.0)


def _mm(a, b):
    return jnp.dot(a, b, preferred_element_type=jnp.float32)


def _round_up(v, m):
    return -(-v // m) * m


def _padded_vmem_bytes(shape, dtype=jnp.float32):
    """(8,128)-tile padded VMEM footprint of one buffer of `shape`/`dtype`."""
    itemsize = jnp.dtype(dtype).itemsize
    sublane = 8 * max(1, 4 // itemsize)          # 8 (f32/i32), 16 (bf16), 32 (i8)
    shape = tuple(int(d) for d in shape)
    if len(shape) == 1:
        shape = (1, shape[0])
    lead = 1
    for d in shape[:-2]:
        lead *= d
    rows = _round_up(shape[-2], sublane)
    cols = _round_up(shape[-1], 128)
    return lead * rows * cols * itemsize


def _vmem_budget_bytes():
    """Per-generation VMEM budget with headroom for compiler scratch/double-buffers."""
    try:
        cap = int(pltpu.get_tpu_info().vmem_capacity_bytes)
    except Exception:
        cap = 64 << 20
    return int(cap * 0.8)


def _se3_layers_kernel(h0_ref, eattr_ref, goh_ref, soh_ref, w_ref, b_ref, h_out_ref,
                       *, hidden, edge_pad, edges_pad, layers_per_step):
    """Runs `layers_per_step` SE3 layers per grid step; node state carried in h_out_ref."""
    step = pl.program_id(0)

    @pl.when(step == 0)
    def _init():
        h_out_ref[...] = h0_ref[...]          # node_embedding output (from wrapper)

    H, EP = hidden, edge_pad
    goh = goh_ref[...]                        # [2E, N] layer-invariant gather one-hot
    soh = soh_ref[...]                        # [N, E]  layer-invariant scatter one-hot
    eattr = eattr_ref[...]                    # [E, EP]
    oh_dtype = goh.dtype

    def layer_body(i, h):
        wl = w_ref[i]                         # [7H+EP, H] packed weights of one layer
        bl = b_ref[i]                         # [8, H]     packed biases of one layer
        nm_w1 = wl[0 * H:1 * H]
        nm_w2 = wl[1 * H:2 * H]
        em_w1s = wl[2 * H:3 * H]
        em_w1d = wl[3 * H:4 * H]
        em_w1e = wl[4 * H:4 * H + EP]
        em_w2 = wl[4 * H + EP:5 * H + EP]
        up_wn = wl[5 * H + EP:6 * H + EP]
        up_wa = wl[6 * H + EP:7 * H + EP]
        nm_b1, nm_b2 = bl[0:1], bl[1:2]
        em_b1, em_b2 = bl[2:3], bl[3:4]
        up_b = bl[4:5]

        # ---- node_mlp: Linear -> ReLU -> Linear ----
        h_nodes = _mm(_relu(_mm(h, nm_w1) + nm_b1), nm_w2) + nm_b2            # [N, H]

        # ---- fused endpoint gather: one [2E, N] one-hot matmul ----
        h_ends = _mm(goh, h.astype(oh_dtype)).astype(jnp.float32)             # [2E, H]
        h_src = h_ends[:edges_pad]
        h_dst = h_ends[edges_pad:]

        # ---- edge_mlp with split first-layer weights (no lane concat) ----
        z = _mm(h_src, em_w1s) + _mm(h_dst, em_w1d) + _mm(eattr, em_w1e) + em_b1
        h_edges = _mm(_relu(z), em_w2) + em_b2                                 # [E, H]

        # ---- scatter-add into destination nodes: row-major [N, E] one-hot ----
        h_agg = _mm(soh, h_edges.astype(oh_dtype)).astype(jnp.float32)        # [N, H]

        # ---- update Linear with split weights ----
        return _mm(h_nodes, up_wn) + _mm(h_agg, up_wa) + up_b

    h = jax.lax.fori_loop(0, layers_per_step, layer_body, h_out_ref[...],
                          unroll=layers_per_step <= 8)
    h_out_ref[...] = h


def multiscale_se3_forward(x, edge_index, edge_attr, pos, params, num_layers=None,
                           onehot_dtype=jnp.float32):
    """Pure-JAX wrapper around the SE3-layer Pallas kernel."""
    del pos  # accepted for API fidelity; never used by the reference forward math
    if num_layers is None:
        num_layers = int(params["nm_w1"].shape[0])

    x = x.astype(jnp.float32)
    edge_attr = edge_attr.astype(jnp.float32)

    # Feature-dim fixup, as in the PyTorch module.
    input_dim = params["emb_w"].shape[0]
    if x.shape[1] > input_dim:
        x = x[:, :input_dim]
    elif x.shape[1] < input_dim:
        x = jnp.concatenate(
            [x, jnp.zeros((x.shape[0], input_dim - x.shape[1]), jnp.float32)], axis=1)

    n_nodes = x.shape[0]
    n_edges = edge_index.shape[1]
    hidden = params["emb_w"].shape[1]
    edge_dim = edge_attr.shape[1]

    # node_embedding runs once per forward -> plain XLA matmul in the wrapper.
    h0 = x @ params["emb_w"] + params["emb_b"]                                # [N, H]

    if n_edges == 0:
        # Reference semantics: with no edges each SE3Layer returns node_mlp(h) only.
        h = h0
        for l in range(num_layers):
            h = (jax.nn.relu(h @ params["nm_w1"][l] + params["nm_b1"][l])
                 @ params["nm_w2"][l] + params["nm_b2"][l])
        node_emb = h @ params["out_w"] + params["out_b"]
        return {"node_embeddings": node_emb,
                "graph_embedding": jnp.mean(node_emb, axis=0, keepdims=True)}

    # ---- (8,128)-friendly padding (exact math: zero weights / sentinel indices) ----
    Hp = _round_up(hidden, 8)
    EPd = _round_up(edge_dim, 8)
    Np = _round_up(n_nodes, 8)
    Ep = _round_up(n_edges, 8)

    def pad2(a, r, c):
        return jnp.pad(a, ((0, r - a.shape[0]), (0, c - a.shape[1])))

    h0_p = pad2(h0, Np, Hp)
    eattr_p = pad2(edge_attr, Ep, EPd)

    src = edge_index[0].astype(jnp.int32)
    dst = edge_index[1].astype(jnp.int32)
    sentinel = jnp.full((Ep - n_edges,), Np, jnp.int32)   # -> all-zero one-hot rows/cols
    src_p = jnp.concatenate([src, sentinel])
    dst_p = jnp.concatenate([dst, sentinel])

    # Layer-invariant one-hots built ONCE here (hoisted out of the layer loop); they
    # stay VMEM-resident across all layers inside the kernel.
    node_iota = jnp.arange(Np, dtype=jnp.int32)
    gather_idx = jnp.concatenate([src_p, dst_p])                                     # [2E]
    gather_oh = (gather_idx[:, None] == node_iota[None, :]).astype(onehot_dtype)     # [2E, N]
    scatter_oh = (node_iota[:, None] == dst_p[None, :]).astype(onehot_dtype)         # [N, E]

    # ---- coalesce per-layer weights into one weight slab + one bias slab ----
    em_w1, up_w = params["em_w1"], params["up_w"]

    def padw(w, rows):
        return jnp.pad(w, ((0, 0), (0, rows - w.shape[1]), (0, Hp - w.shape[2])))

    w_slab = jnp.concatenate([
        padw(params["nm_w1"], Hp), padw(params["nm_w2"], Hp),
        padw(em_w1[:, :hidden, :], Hp), padw(em_w1[:, hidden:2 * hidden, :], Hp),
        padw(em_w1[:, 2 * hidden:, :], EPd), padw(params["em_w2"], Hp),
        padw(up_w[:, :hidden, :], Hp), padw(up_w[:, hidden:, :], Hp),
    ], axis=1)                                                   # [L, 7*Hp + EPd, Hp]

    def padb(b):
        return jnp.pad(b, ((0, 0), (0, 0), (0, Hp - b.shape[2])))

    b_slab = jnp.concatenate([padb(params["nm_b1"]), padb(params["nm_b2"]),
                              padb(params["em_b1"]), padb(params["em_b2"]),
                              padb(params["up_b"])], axis=1)     # [L, 5, Hp]
    b_slab = jnp.pad(b_slab, ((0, 0), (0, 3), (0, 0)))           # [L, 8, Hp]

    in_tot = 7 * Hp + EPd

    # ---- VMEM accounting with (8,128)-padded sizes & per-generation budget ----
    budget = _vmem_budget_bytes()
    const_bytes = (2 * _padded_vmem_bytes((Np, Hp))                       # h0 + h_out
                   + _padded_vmem_bytes((Ep, EPd))
                   + _padded_vmem_bytes((2 * Ep, Np), onehot_dtype)
                   + _padded_vmem_bytes((Np, Ep), onehot_dtype))
    temp_bytes = (_padded_vmem_bytes((2 * Ep, Hp))
                  + 4 * _padded_vmem_bytes((Ep, Hp))
                  + 4 * _padded_vmem_bytes((Np, Hp)))

    def weight_step_bytes(lps):                                  # x2: double-buffered
        return 2 * (_padded_vmem_bytes((lps, in_tot, Hp))
                    + _padded_vmem_bytes((lps, 8, Hp)))

    # Small models: keep the whole [L,...] weight stack resident and run a single
    # grid step with an in-kernel fori_loop over layers (no per-step pipeline cost).
    if const_bytes + temp_bytes + weight_step_bytes(num_layers) <= int(0.75 * budget):
        layers_per_step = num_layers
    else:
        layers_per_step = 1                                      # stream 1 layer / step
    num_steps = num_layers // layers_per_step
    resident = const_bytes + temp_bytes + weight_step_bytes(layers_per_step)
    vmem_limit = int(min(budget, max(2 * resident, 24 << 20)))

    kernel = functools.partial(_se3_layers_kernel, hidden=Hp, edge_pad=EPd,
                               edges_pad=Ep, layers_per_step=layers_per_step)

    h_final = pl.pallas_call(
        kernel,
        out_shape=jax.ShapeDtypeStruct((Np, Hp), jnp.float32),
        grid=(num_steps,),
        in_specs=[
            pl.BlockSpec((Np, Hp), lambda s: (0, 0)),                       # h0
            pl.BlockSpec((Ep, EPd), lambda s: (0, 0)),                      # edge_attr
            pl.BlockSpec((2 * Ep, Np), lambda s: (0, 0)),                   # gather one-hot
            pl.BlockSpec((Np, Ep), lambda s: (0, 0)),                       # scatter one-hot
            pl.BlockSpec((layers_per_step, in_tot, Hp), lambda s: (s, 0, 0)),  # weight slab
            pl.BlockSpec((layers_per_step, 8, Hp), lambda s: (s, 0, 0)),       # bias slab
        ],
        out_specs=pl.BlockSpec((Np, Hp), lambda s: (0, 0)),
        compiler_params=pltpu.CompilerParams(
            dimension_semantics=("arbitrary",),     # layer axis is a serial carry
            vmem_limit_bytes=vmem_limit),
    )(h0_p, eattr_p, gather_oh, scatter_oh, w_slab, b_slab)

    # Output head + global_mean_pool run once -> plain XLA in the wrapper
    # (keeps the kernel output lane-dense in H instead of out_dim-wide).
    h_final = h_final[:n_nodes, :hidden]
    node_emb = h_final @ params["out_w"] + params["out_b"]
    graph_emb = jnp.mean(node_emb, axis=0, keepdims=True)
    return {"node_embeddings": node_emb, "graph_embedding": graph_emb}


def init_params(key, input_dim, hidden_dim, output_dim, edge_dim, num_layers):
    """Deterministic synthetic parameter init (matches the module's shapes)."""
    def lin(k, fan_in, fan_out):
        kw, kb = jax.random.split(k)
        w = jax.random.normal(kw, (fan_in, fan_out), jnp.float32) / jnp.sqrt(float(fan_in))
        b = 0.01 * jax.random.normal(kb, (1, fan_out), jnp.float32)
        return w, b

    keys = jax.random.split(key, 2 + 5 * num_layers)
    emb_w, emb_b = lin(keys[0], input_dim, hidden_dim)
    out_w, out_b = lin(keys[1], hidden_dim, output_dim)

    nm_w1, nm_b1, nm_w2, nm_b2 = [], [], [], []
    em_w1, em_b1, em_w2, em_b2 = [], [], [], []
    up_w, up_b = [], []
    edge_in = 2 * hidden_dim + edge_dim
    for l in range(num_layers):
        k0, k1, k2, k3, k4 = keys[2 + 5 * l: 2 + 5 * (l + 1)]
        w, b = lin(k0, hidden_dim, hidden_dim); nm_w1.append(w); nm_b1.append(b)
        w, b = lin(k1, hidden_dim, hidden_dim); nm_w2.append(w); nm_b2.append(b)
        w, b = lin(k2, edge_in, hidden_dim);    em_w1.append(w); em_b1.append(b)
        w, b = lin(k3, hidden_dim, hidden_dim); em_w2.append(w); em_b2.append(b)
        w, b = lin(k4, 2 * hidden_dim, hidden_dim); up_w.append(w); up_b.append(b)

    stack = lambda xs: jnp.stack(xs, axis=0)
    return {
        "emb_w": emb_w, "emb_b": emb_b,
        "nm_w1": stack(nm_w1), "nm_b1": stack(nm_b1),
        "nm_w2": stack(nm_w2), "nm_b2": stack(nm_b2),
        "em_w1": stack(em_w1), "em_b1": stack(em_b1),
        "em_w2": stack(em_w2), "em_b2": stack(em_b2),
        "up_w": stack(up_w), "up_b": stack(up_b),
        "out_w": out_w, "out_b": out_b,
    }


def reference_forward(x, edge_index, edge_attr, params, num_layers):
    """Pure-JAX (XLA) reference mirroring the PyTorch forward, for a sanity check."""
    src, dst = edge_index[0], edge_index[1]
    h = x @ params["emb_w"] + params["emb_b"]
    for l in range(num_layers):
        h_nodes = (jax.nn.relu(h @ params["nm_w1"][l] + params["nm_b1"][l])
                   @ params["nm_w2"][l] + params["nm_b2"][l])
        ef = jnp.concatenate([h[src], h[dst], edge_attr], axis=1)
        h_edges = (jax.nn.relu(ef @ params["em_w1"][l] + params["em_b1"][l])
                   @ params["em_w2"][l] + params["em_b2"][l])
        h_agg = jax.ops.segment_sum(h_edges, dst, num_segments=h.shape[0])
        h = jnp.concatenate([h_nodes, h_agg], axis=1) @ params["up_w"][l] + params["up_b"][l]
    node = h @ params["out_w"] + params["out_b"]
    return node, jnp.mean(node, axis=0, keepdims=True)


if __name__ == "__main__":
    jax.config.update("jax_default_matmul_precision", "highest")

    input_dim, hidden_dim, output_dim, edge_dim, num_layers = 16, 32, 8, 5, 3
    N, E = 8, 16

    key = jax.random.PRNGKey(0)
    k_x, k_e, k_a, k_p, k_w = jax.random.split(key, 5)
    x = jax.random.normal(k_x, (N, input_dim), jnp.float32)
    edge_index = jax.random.randint(k_e, (2, E), 0, N, dtype=jnp.int32)
    edge_attr = jax.random.normal(k_a, (E, edge_dim), jnp.float32)
    pos = jax.random.normal(k_p, (N, 3), jnp.float32)

    params = init_params(k_w, input_dim, hidden_dim, output_dim, edge_dim, num_layers)

    out = multiscale_se3_forward(x, edge_index, edge_attr, pos, params, num_layers)
    jax.block_until_ready(out)
    assert out["node_embeddings"].shape == (N, output_dim)
    assert out["graph_embedding"].shape == (1, output_dim)

    ref_node, ref_graph = reference_forward(x, edge_index, edge_attr, params, num_layers)
    assert jnp.allclose(out["node_embeddings"], ref_node, atol=1e-2, rtol=1e-2)
    assert jnp.allclose(out["graph_embedding"], ref_graph, atol=1e-2, rtol=1e-2)
    print("KERNEL_OK")
</pallas_src>

<mosaic_0001>
module attributes {stable_mosaic.version = 11 : i64} {
  func.func @_se3_layers_kernel(%arg0: i32, %arg1: memref<8x32xf32, #tpu.memory_space<vmem>>, %arg2: memref<16x8xf32, #tpu.memory_space<vmem>>, %arg3: memref<32x8xf32, #tpu.memory_space<vmem>>, %arg4: memref<8x16xf32, #tpu.memory_space<vmem>>, %arg5: memref<3x232x32xf32, #tpu.memory_space<vmem>>, %arg6: memref<3x8x32xf32, #tpu.memory_space<vmem>>, %arg7: memref<8x32xf32, #tpu.memory_space<vmem>>) attributes {dimension_semantics = [#tpu.dimension_semantics<arbitrary>], iteration_bounds = array<i64: 1>, scalar_prefetch = 0 : i64, scratch_operands = 0 : i64, tpu.core_type = #tpu.core_type<tc>, window_params = [{pipeline_mode = #tpu.pipeline_mode<synchronous>, transform_indices = @transform_0, window_bounds = array<i64: 8, 32>}, {pipeline_mode = #tpu.pipeline_mode<synchronous>, transform_indices = @transform_1, window_bounds = array<i64: 16, 8>}, {pipeline_mode = #tpu.pipeline_mode<synchronous>, transform_indices = @transform_2, window_bounds = array<i64: 32, 8>}, {pipeline_mode = #tpu.pipeline_mode<synchronous>, transform_indices = @transform_3, window_bounds = array<i64: 8, 16>}, {transform_indices = @transform_4, window_bounds = array<i64: 3, 232, 32>}, {transform_indices = @transform_5, window_bounds = array<i64: 3, 8, 32>}, {pipeline_mode = #tpu.pipeline_mode<synchronous>, transform_indices = @transform_6, window_bounds = array<i64: 8, 32>}]} {
    %c0_i32 = arith.constant 0 : i32
    %0 = arith.cmpi eq, %arg0, %c0_i32 : i32
    %1 = arith.extui %0 : i1 to i32
    %c0_i32_0 = arith.constant 0 : i32
    %2 = arith.cmpi ne, %1, %c0_i32_0 : i32
    scf.if %2 {
      %c0_58 = arith.constant 0 : index
      %c0_59 = arith.constant 0 : index
      %152 = vector.load %arg1[%c0_58, %c0_59] : memref<8x32xf32, #tpu.memory_space<vmem>>, vector<8x32xf32>
      %c0_60 = arith.constant 0 : index
      %c0_61 = arith.constant 0 : index
      %153 = vector.load %arg7[%c0_60, %c0_61] : memref<8x32xf32, #tpu.memory_space<vmem>>, vector<8x32xf32>
      tpu.vector_store %arg7[%c0_60, %c0_61], %152 {strides = array<i32>} : memref<8x32xf32, #tpu.memory_space<vmem>>, vector<8x32xf32>,
    } else {
    }
    %c0 = arith.constant 0 : index
    %c0_1 = arith.constant 0 : index
    %3 = vector.load %arg3[%c0, %c0_1] : memref<32x8xf32, #tpu.memory_space<vmem>>, vector<32x8xf32>
    %c0_2 = arith.constant 0 : index
    %c0_3 = arith.constant 0 : index
    %4 = vector.load %arg4[%c0_2, %c0_3] : memref<8x16xf32, #tpu.memory_space<vmem>>, vector<8x16xf32>
    %c0_4 = arith.constant 0 : index
    %c0_5 = arith.constant 0 : index
    %5 = vector.load %arg2[%c0_4, %c0_5] : memref<16x8xf32, #tpu.memory_space<vmem>>, vector<16x8xf32>
    %c0_6 = arith.constant 0 : index
    %c0_7 = arith.constant 0 : index
    %6 = vector.load %arg7[%c0_6, %c0_7] : memref<8x32xf32, #tpu.memory_space<vmem>>, vector<8x32xf32>
    %c0_i32_8 = arith.constant 0 : i32
    %7 = arith.index_cast %c0_i32_8 : i32 to index
    %c0_9 = arith.constant 0 : index
    %c0_10 = arith.constant 0 : index
    %8 = vector.load %arg5[%7, %c0_9, %c0_10] : memref<3x232x32xf32, #tpu.memory_space<vmem>>, vector<1x232x32xf32>
    %9 = vector.shape_cast %8 : vector<1x232x32xf32> to vector<232x32xf32>
    %10 = arith.index_cast %c0_i32_8 : i32 to index
    %c0_11 = arith.constant 0 : index
    %c0_12 = arith.constant 0 : index
    %11 = vector.load %arg6[%10, %c0_11, %c0_12] : memref<3x8x32xf32, #tpu.memory_space<vmem>>, vector<1x8x32xf32>
    %12 = vector.shape_cast %11 : vector<1x8x32xf32> to vector<8x32xf32>
    %13 = vector.extract_strided_slice %9 {offsets = [0, 0], sizes = [32, 32], strides = [1, 1]} : vector<232x32xf32> to vector<32x32xf32>
    %14 = vector.extract_strided_slice %9 {offsets = [32, 0], sizes = [32, 32], strides = [1, 1]} : vector<232x32xf32> to vector<32x32xf32>
    %15 = vector.extract_strided_slice %9 {offsets = [64, 0], sizes = [32, 32], strides = [1, 1]} : vector<232x32xf32> to vector<32x32xf32>
    %16 = vector.extract_strided_slice %9 {offsets = [96, 0], sizes = [32, 32], strides = [1, 1]} : vector<232x32xf32> to vector<32x32xf32>
    %17 = vector.extract_strided_slice %9 {offsets = [128, 0], sizes = [8, 32], strides = [1, 1]} : vector<232x32xf32> to vector<8x32xf32>
    %18 = vector.extract_strided_slice %9 {offsets = [136, 0], sizes = [32, 32], strides = [1, 1]} : vector<232x32xf32> to vector<32x32xf32>
    %19 = vector.extract_strided_slice %9 {offsets = [168, 0], sizes = [32, 32], strides = [1, 1]} : vector<232x32xf32> to vector<32x32xf32>
    %20 = vector.extract_strided_slice %9 {offsets = [200, 0], sizes = [32, 32], strides = [1, 1]} : vector<232x32xf32> to vector<32x32xf32>
    %21 = vector.extract_strided_slice %12 {offsets = [0, 0], sizes = [1, 32], strides = [1, 1]} : vector<8x32xf32> to vector<1x32xf32>
    %22 = vector.extract_strided_slice %12 {offsets = [1, 0], sizes = [1, 32], strides = [1, 1]} : vector<8x32xf32> to vector<1x32xf32>
    %23 = vector.extract_strided_slice %12 {offsets = [2, 0], sizes = [1, 32], strides = [1, 1]} : vector<8x32xf32> to vector<1x32xf32>
    %24 = vector.extract_strided_slice %12 {offsets = [3, 0], sizes = [1, 32], strides = [1, 1]} : vector<8x32xf32> to vector<1x32xf32>
    %25 = vector.extract_strided_slice %12 {offsets = [4, 0], sizes = [1, 32], strides = [1, 1]} : vector<8x32xf32> to vector<1x32xf32>
    %cst = arith.constant dense<0.000000e+00> : vector<8x32xf32>
    %26 = tpu.matmul %6, %13, %cst {dimension_numbers = #tpu.dot_dimension_numbers<[1], [0], [0], [1], [0, 0, 1, 1], [], []>, precision = #tpu.contract_precision<fp32>} : vector<8x32xf32>, vector<32x32xf32>, vector<8x32xf32> -> vector<8x32xf32>
    %27 = vector.broadcast %21 : vector<1x32xf32> to vector<8x32xf32>
    %28 = arith.addf %26, %27 : vector<8x32xf32>
    %cst_13 = arith.constant 0.000000e+00 : f32
    %29 = vector.broadcast %cst_13 : f32 to vector<8x32xf32>
    %30 = arith.maximumf %28, %29 : vector<8x32xf32>
    %cst_14 = arith.constant dense<0.000000e+00> : vector<8x32xf32>
    %31 = tpu.matmul %30, %14, %cst_14 {dimension_numbers = #tpu.dot_dimension_numbers<[1], [0], [0], [1], [0, 0, 1, 1], [], []>, precision = #tpu.contract_precision<fp32>} : vector<8x32xf32>, vector<32x32xf32>, vector<8x32xf32> -> vector<8x32xf32>
    %32 = vector.broadcast %22 : vector<1x32xf32> to vector<8x32xf32>
    %33 = arith.addf %31, %32 : vector<8x32xf32>
    %cst_15 = arith.constant dense<0.000000e+00> : vector<32x32xf32>
    %34 = tpu.matmul %3, %6, %cst_15 {dimension_numbers = #tpu.dot_dimension_numbers<[1], [0], [0], [1], [0, 0, 1, 1], [], []>, precision = #tpu.contract_precision<fp32>} : vector<32x8xf32>, vector<8x32xf32>, vector<32x32xf32> -> vector<32x32xf32>
    %35 = vector.extract_strided_slice %34 {offsets = [0, 0], sizes = [16, 32], strides = [1, 1]} : vector<32x32xf32> to vector<16x32xf32>
    %36 = vector.extract_strided_slice %34 {offsets = [16, 0], sizes = [16, 32], strides = [1, 1]} : vector<32x32xf32> to vector<16x32xf32>
    %cst_16 = arith.constant dense<0.000000e+00> : vector<16x32xf32>
    %37 = tpu.matmul %35, %15, %cst_16 {dimension_numbers = #tpu.dot_dimension_numbers<[1], [0], [0], [1], [0, 0, 1, 1], [], []>, precision = #tpu.contract_precision<fp32>} : vector<16x32xf32>, vector<32x32xf32>, vector<16x32xf32> -> vector<16x32xf32>
    %cst_17 = arith.constant dense<0.000000e+00> : vector<16x32xf32>
    %38 = tpu.matmul %36, %16, %cst_17 {dimension_numbers = #tpu.dot_dimension_numbers<[1], [0], [0], [1], [0, 0, 1, 1], [], []>, precision = #tpu.contract_precision<fp32>} : vector<16x32xf32>, vector<32x32xf32>, vector<16x32xf32> -> vector<16x32xf32>
    %39 = arith.addf %37, %38 : vector<16x32xf32>
    %cst_18 = arith.constant dense<0.000000e+00> : vector<16x32xf32>
    %40 = tpu.matmul %5, %17, %cst_18 {dimension_numbers = #tpu.dot_dimension_numbers<[1], [0], [0], [1], [0, 0, 1, 1], [], []>, precision = #tpu.contract_precision<fp32>} : vector<16x8xf32>, vector<8x32xf32>, vector<16x32xf32> -> vector<16x32xf32>
    %41 = arith.addf %39, %40 : vector<16x32xf32>
    %42 = vector.broadcast %23 : vector<1x32xf32> to vector<16x32xf32>
    %43 = arith.addf %41, %42 : vector<16x32xf32>
    %cst_19 = arith.constant 0.000000e+00 : f32
    %44 = vector.broadcast %cst_19 : f32 to vector<16x32xf32>
    %45 = arith.maximumf %43, %44 : vector<16x32xf32>
    %cst_20 = arith.constant dense<0.000000e+00> : vector<16x32xf32>
    %46 = tpu.matmul %45, %18, %cst_20 {dimension_numbers = #tpu.dot_dimension_numbers<[1], [0], [0], [1], [0, 0, 1, 1], [], []>, precision = #tpu.contract_precision<fp32>} : vector<16x32xf32>, vector<32x32xf32>, vector<16x32xf32> -> vector<16x32xf32>
    %47 = vector.broadcast %24 : vector<1x32xf32> to vector<16x32xf32>
    %48 = arith.addf %46, %47 : vector<16x32xf32>
    %cst_21 = arith.constant dense<0.000000e+00> : vector<8x32xf32>
    %49 = tpu.matmul %4, %48, %cst_21 {dimension_numbers = #tpu.dot_dimension_numbers<[1], [0], [0], [1], [0, 0, 1, 1], [], []>, precision = #tpu.contract_precision<fp32>} : vector<8x16xf32>, vector<16x32xf32>, vector<8x32xf32> -> vector<8x32xf32>
    %cst_22 = arith.constant dense<0.000000e+00> : vector<8x32xf32>
    %50 = tpu.matmul %33, %19, %cst_22 {dimension_numbers = #tpu.dot_dimension_numbers<[1], [0], [0], [1], [0, 0, 1, 1], [], []>, precision = #tpu.contract_precision<fp32>} : vector<8x32xf32>, vector<32x32xf32>, vector<8x32xf32> -> vector<8x32xf32>
    %cst_23 = arith.constant dense<0.000000e+00> : vector<8x32xf32>
    %51 = tpu.matmul %49, %20, %cst_23 {dimension_numbers = #tpu.dot_dimension_numbers<[1], [0], [0], [1], [0, 0, 1, 1], [], []>, precision = #tpu.contract_precision<fp32>} : vector<8x32xf32>, vector<32x32xf32>, vector<8x32xf32> -> vector<8x32xf32>
    %52 = arith.addf %50, %51 : vector<8x32xf32>
    %53 = vector.broadcast %25 : vector<1x32xf32> to vector<8x32xf32>
    %54 = arith.addf %52, %53 : vector<8x32xf32>
    %c1_i32 = arith.constant 1 : i32
    %55 = arith.index_cast %c1_i32 : i32 to index
    %c0_24 = arith.constant 0 : index
    %c0_25 = arith.constant 0 : index
    %56 = vector.load %arg5[%55, %c0_24, %c0_25] : memref<3x232x32xf32, #tpu.memory_space<vmem>>, vector<1x232x32xf32>
    %57 = vector.shape_cast %56 : vector<1x232x32xf32> to vector<232x32xf32>
    %58 = arith.index_cast %c1_i32 : i32 to index
    %c0_26 = arith.constant 0 : index
    %c0_27 = arith.constant 0 : index
    %59 = vector.load %arg6[%58, %c0_26, %c0_27] : memref<3x8x32xf32, #tpu.memory_space<vmem>>, vector<1x8x32xf32>
    %60 = vector.shape_cast %59 : vector<1x8x32xf32> to vector<8x32xf32>
    %61 = vector.extract_strided_slice %57 {offsets = [0, 0], sizes = [32, 32], strides = [1, 1]} : vector<232x32xf32> to vector<32x32xf32>
    %62 = vector.extract_strided_slice %57 {offsets = [32, 0], sizes = [32, 32], strides = [1, 1]} : vector<232x32xf32> to vector<32x32xf32>
    %63 = vector.extract_strided_slice %57 {offsets = [64, 0], sizes = [32, 32], strides = [1, 1]} : vector<232x32xf32> to vector<32x32xf32>
    %64 = vector.extract_strided_slice %57 {offsets = [96, 0], sizes = [32, 32], strides = [1, 1]} : vector<232x32xf32> to vector<32x32xf32>
    %65 = vector.extract_strided_slice %57 {offsets = [128, 0], sizes = [8, 32], strides = [1, 1]} : vector<232x32xf32> to vector<8x32xf32>
    %66 = vector.extract_strided_slice %57 {offsets = [136, 0], sizes = [32, 32], strides = [1, 1]} : vector<232x32xf32> to vector<32x32xf32>
    %67 = vector.extract_strided_slice %57 {offsets = [168, 0], sizes = [32, 32], strides = [1, 1]} : vector<232x32xf32> to vector<32x32xf32>
    %68 = vector.extract_strided_slice %57 {offsets = [200, 0], sizes = [32, 32], strides = [1, 1]} : vector<232x32xf32> to vector<32x32xf32>
    %69 = vector.extract_strided_slice %60 {offsets = [0, 0], sizes = [1, 32], strides = [1, 1]} : vector<8x32xf32> to vector<1x32xf32>
    %70 = vector.extract_strided_slice %60 {offsets = [1, 0], sizes = [1, 32], strides = [1, 1]} : vector<8x32xf32> to vector<1x32xf32>
    %71 = vector.extract_strided_slice %60 {offsets = [2, 0], sizes = [1, 32], strides = [1, 1]} : vector<8x32xf32> to vector<1x32xf32>
    %72 = vector.extract_strided_slice %60 {offsets = [3, 0], sizes = [1, 32], strides = [1, 1]} : vector<8x32xf32> to vector<1x32xf32>
    %73 = vector.extract_strided_slice %60 {offsets = [4, 0], sizes = [1, 32], strides = [1, 1]} : vector<8x32xf32> to vector<1x32xf32>
    %cst_28 = arith.constant dense<0.000000e+00> : vector<8x32xf32>
    %74 = tpu.matmul %54, %61, %cst_28 {dimension_numbers = #tpu.dot_dimension_numbers<[1], [0], [0], [1], [0, 0, 1, 1], [], []>, precision = #tpu.contract_precision<fp32>} : vector<8x32xf32>, vector<32x32xf32>, vector<8x32xf32> -> vector<8x32xf32>
    %75 = vector.broadcast %69 : vector<1x32xf32> to vector<8x32xf32>
    %76 = arith.addf %74, %75 : vector<8x32xf32>
    %cst_29 = arith.constant 0.000000e+00 : f32
    %77 = vector.broadcast %cst_29 : f32 to vector<8x32xf32>
    %78 = arith.maximumf %76, %77 : vector<8x32xf32>
    %cst_30 = arith.constant dense<0.000000e+00> : vector<8x32xf32>
    %79 = tpu.matmul %78, %62, %cst_30 {dimension_numbers = #tpu.dot_dimension_numbers<[1], [0], [0], [1], [0, 0, 1, 1], [], []>, precision = #tpu.contract_precision<fp32>} : vector<8x32xf32>, vector<32x32xf32>, vector<8x32xf32> -> vector<8x32xf32>
    %80 = vector.broadcast %70 : vector<1x32xf32> to vector<8x32xf32>
    %81 = arith.addf %79, %80 : vector<8x32xf32>
    %cst_31 = arith.constant dense<0.000000e+00> : vector<32x32xf32>
    %82 = tpu.matmul %3, %54, %cst_31 {dimension_numbers = #tpu.dot_dimension_numbers<[1], [0], [0], [1], [0, 0, 1, 1], [], []>, precision = #tpu.contract_precision<fp32>} : vector<32x8xf32>, vector<8x32xf32>, vector<32x32xf32> -> vector<32x32xf32>
    %83 = vector.extract_strided_slice %82 {offsets = [0, 0], sizes = [16, 32], strides = [1, 1]} : vector<32x32xf32> to vector<16x32xf32>
    %84 = vector.extract_strided_slice %82 {offsets = [16, 0], sizes = [16, 32], strides = [1, 1]} : vector<32x32xf32> to vector<16x32xf32>
    %cst_32 = arith.constant dense<0.000000e+00> : vector<16x32xf32>
    %85 = tpu.matmul %83, %63, %cst_32 {dimension_numbers = #tpu.dot_dimension_numbers<[1], [0], [0], [1], [0, 0, 1, 1], [], []>, precision = #tpu.contract_precision<fp32>} : vector<16x32xf32>, vector<32x32xf32>, vector<16x32xf32> -> vector<16x32xf32>
    %cst_33 = arith.constant dense<0.000000e+00> : vector<16x32xf32>
    %86 = tpu.matmul %84, %64, %cst_33 {dimension_numbers = #tpu.dot_dimension_numbers<[1], [0], [0], [1], [0, 0, 1, 1], [], []>, precision = #tpu.contract_precision<fp32>} : vector<16x32xf32>, vector<32x32xf32>, vector<16x32xf32> -> vector<16x32xf32>
    %87 = arith.addf %85, %86 : vector<16x32xf32>
    %cst_34 = arith.constant dense<0.000000e+00> : vector<16x32xf32>
    %88 = tpu.matmul %5, %65, %cst_34 {dimension_numbers = #tpu.dot_dimension_numbers<[1], [0], [0], [1], [0, 0, 1, 1], [], []>, precision = #tpu.contract_precision<fp32>} : vector<16x8xf32>, vector<8x32xf32>, vector<16x32xf32> -> vector<16x32xf32>
    %89 = arith.addf %87, %88 : vector<16x32xf32>
    %90 = vector.broadcast %71 : vector<1x32xf32> to vector<16x32xf32>
    %91 = arith.addf %89, %90 : vector<16x32xf32>
    %cst_35 = arith.constant 0.000000e+00 : f32
    %92 = vector.broadcast %cst_35 : f32 to vector<16x32xf32>
    %93 = arith.maximumf %91, %92 : vector<16x32xf32>
    %cst_36 = arith.constant dense<0.000000e+00> : vector<16x32xf32>
    %94 = tpu.matmul %93, %66, %cst_36 {dimension_numbers = #tpu.dot_dimension_numbers<[1], [0], [0], [1], [0, 0, 1, 1], [], []>, precision = #tpu.contract_precision<fp32>} : vector<16x32xf32>, vector<32x32xf32>, vector<16x32xf32> -> vector<16x32xf32>
    %95 = vector.broadcast %72 : vector<1x32xf32> to vector<16x32xf32>
    %96 = arith.addf %94, %95 : vector<16x32xf32>
    %cst_37 = arith.constant dense<0.000000e+00> : vector<8x32xf32>
    %97 = tpu.matmul %4, %96, %cst_37 {dimension_numbers = #tpu.dot_dimension_numbers<[1], [0], [0], [1], [0, 0, 1, 1], [], []>, precision = #tpu.contract_precision<fp32>} : vector<8x16xf32>, vector<16x32xf32>, vector<8x32xf32> -> vector<8x32xf32>
    %cst_38 = arith.constant dense<0.000000e+00> : vector<8x32xf32>
    %98 = tpu.matmul %81, %67, %cst_38 {dimension_numbers = #tpu.dot_dimension_numbers<[1], [0], [0], [1], [0, 0, 1, 1], [], []>, precision = #tpu.contract_precision<fp32>} : vector<8x32xf32>, vector<32x32xf32>, vector<8x32xf32> -> vector<8x32xf32>
    %cst_39 = arith.constant dense<0.000000e+00> : vector<8x32xf32>
    %99 = tpu.matmul %97, %68, %cst_39 {dimension_numbers = #tpu.dot_dimension_numbers<[1], [0], [0], [1], [0, 0, 1, 1], [], []>, precision = #tpu.contract_precision<fp32>} : vector<8x32xf32>, vector<32x32xf32>, vector<8x32xf32> -> vector<8x32xf32>
    %100 = arith.addf %98, %99 : vector<8x32xf32>
    %101 = vector.broadcast %73 : vector<1x32xf32> to vector<8x32xf32>
    %102 = arith.addf %100, %101 : vector<8x32xf32>
    %c2_i32 = arith.constant 2 : i32
    %103 = arith.index_cast %c2_i32 : i32 to index
    %c0_40 = arith.constant 0 : index
    %c0_41 = arith.constant 0 : index
    %104 = vector.load %arg5[%103, %c0_40, %c0_41] : memref<3x232x32xf32, #tpu.memory_space<vmem>>, vector<1x232x32xf32>
    %105 = vector.shape_cast %104 : vector<1x232x32xf32> to vector<232x32xf32>
    %106 = arith.index_cast %c2_i32 : i32 to index
    %c0_42 = arith.constant 0 : index
    %c0_43 = arith.constant 0 : index
    %107 = vector.load %arg6[%106, %c0_42, %c0_43] : memref<3x8x32xf32, #tpu.memory_space<vmem>>, vector<1x8x32xf32>
    %108 = vector.shape_cast %107 : vector<1x8x32xf32> to vector<8x32xf32>
    %109 = vector.extract_strided_slice %105 {offsets = [0, 0], sizes = [32, 32], strides = [1, 1]} : vector<232x32xf32> to vector<32x32xf32>
    %110 = vector.extract_strided_slice %105 {offsets = [32, 0], sizes = [32, 32], strides = [1, 1]} : vector<232x32xf32> to vector<32x32xf32>
    %111 = vector.extract_strided_slice %105 {offsets = [64, 0], sizes = [32, 32], strides = [1, 1]} : vector<232x32xf32> to vector<32x32xf32>
    %112 = vector.extract_strided_slice %105 {offsets = [96, 0], sizes = [32, 32], strides = [1, 1]} : vector<232x32xf32> to vector<32x32xf32>
    %113 = vector.extract_strided_slice %105 {offsets = [128, 0], sizes = [8, 32], strides = [1, 1]} : vector<232x32xf32> to vector<8x32xf32>
    %114 = vector.extract_strided_slice %105 {offsets = [136, 0], sizes = [32, 32], strides = [1, 1]} : vector<232x32xf32> to vector<32x32xf32>
    %115 = vector.extract_strided_slice %105 {offsets = [168, 0], sizes = [32, 32], strides = [1, 1]} : vector<232x32xf32> to vector<32x32xf32>
    %116 = vector.extract_strided_slice %105 {offsets = [200, 0], sizes = [32, 32], strides = [1, 1]} : vector<232x32xf32> to vector<32x32xf32>
    %117 = vector.extract_strided_slice %108 {offsets = [0, 0], sizes = [1, 32], strides = [1, 1]} : vector<8x32xf32> to vector<1x32xf32>
    %118 = vector.extract_strided_slice %108 {offsets = [1, 0], sizes = [1, 32], strides = [1, 1]} : vector<8x32xf32> to vector<1x32xf32>
    %119 = vector.extract_strided_slice %108 {offsets = [2, 0], sizes = [1, 32], strides = [1, 1]} : vector<8x32xf32> to vector<1x32xf32>
    %120 = vector.extract_strided_slice %108 {offsets = [3, 0], sizes = [1, 32], strides = [1, 1]} : vector<8x32xf32> to vector<1x32xf32>
    %121 = vector.extract_strided_slice %108 {offsets = [4, 0], sizes = [1, 32], strides = [1, 1]} : vector<8x32xf32> to vector<1x32xf32>
    %cst_44 = arith.constant dense<0.000000e+00> : vector<8x32xf32>
    %122 = tpu.matmul %102, %109, %cst_44 {dimension_numbers = #tpu.dot_dimension_numbers<[1], [0], [0], [1], [0, 0, 1, 1], [], []>, precision = #tpu.contract_precision<fp32>} : vector<8x32xf32>, vector<32x32xf32>, vector<8x32xf32> -> vector<8x32xf32>
    %123 = vector.broadcast %117 : vector<1x32xf32> to vector<8x32xf32>
    %124 = arith.addf %122, %123 : vector<8x32xf32>
    %cst_45 = arith.constant 0.000000e+00 : f32
    %125 = vector.broadcast %cst_45 : f32 to vector<8x32xf32>
    %126 = arith.maximumf %124, %125 : vector<8x32xf32>
    %cst_46 = arith.constant dense<0.000000e+00> : vector<8x32xf32>
    %127 = tpu.matmul %126, %110, %cst_46 {dimension_numbers = #tpu.dot_dimension_numbers<[1], [0], [0], [1], [0, 0, 1, 1], [], []>, precision = #tpu.contract_precision<fp32>} : vector<8x32xf32>, vector<32x32xf32>, vector<8x32xf32> -> vector<8x32xf32>
    %128 = vector.broadcast %118 : vector<1x32xf32> to vector<8x32xf32>
    %129 = arith.addf %127, %128 : vector<8x32xf32>
    %cst_47 = arith.constant dense<0.000000e+00> : vector<32x32xf32>
    %130 = tpu.matmul %3, %102, %cst_47 {dimension_numbers = #tpu.dot_dimension_numbers<[1], [0], [0], [1], [0, 0, 1, 1], [], []>, precision = #tpu.contract_precision<fp32>} : vector<32x8xf32>, vector<8x32xf32>, vector<32x32xf32> -> vector<32x32xf32>
    %131 = vector.extract_strided_slice %130 {offsets = [0, 0], sizes = [16, 32], strides = [1, 1]} : vector<32x32xf32> to vector<16x32xf32>
    %132 = vector.extract_strided_slice %130 {offsets = [16, 0], sizes = [16, 32], strides = [1, 1]} : vector<32x32xf32> to vector<16x32xf32>
    %cst_48 = arith.constant dense<0.000000e+00> : vector<16x32xf32>
    %133 = tpu.matmul %131, %111, %cst_48 {dimension_numbers = #tpu.dot_dimension_numbers<[1], [0], [0], [1], [0, 0, 1, 1], [], []>, precision = #tpu.contract_precision<fp32>} : vector<16x32xf32>, vector<32x32xf32>, vector<16x32xf32> -> vector<16x32xf32>
    %cst_49 = arith.constant dense<0.000000e+00> : vector<16x32xf32>
    %134 = tpu.matmul %132, %112, %cst_49 {dimension_numbers = #tpu.dot_dimension_numbers<[1], [0], [0], [1], [0, 0, 1, 1], [], []>, precision = #tpu.contract_precision<fp32>} : vector<16x32xf32>, vector<32x32xf32>, vector<16x32xf32> -> vector<16x32xf32>
    %135 = arith.addf %133, %134 : vector<16x32xf32>
    %cst_50 = arith.constant dense<0.000000e+00> : vector<16x32xf32>
    %136 = tpu.matmul %5, %113, %cst_50 {dimension_numbers = #tpu.dot_dimension_numbers<[1], [0], [0], [1], [0, 0, 1, 1], [], []>, precision = #tpu.contract_precision<fp32>} : vector<16x8xf32>, vector<8x32xf32>, vector<16x32xf32> -> vector<16x32xf32>
    %137 = arith.addf %135, %136 : vector<16x32xf32>
    %138 = vector.broadcast %119 : vector<1x32xf32> to vector<16x32xf32>
    %139 = arith.addf %137, %138 : vector<16x32xf32>
    %cst_51 = arith.constant 0.000000e+00 : f32
    %140 = vector.broadcast %cst_51 : f32 to vector<16x32xf32>
    %141 = arith.maximumf %139, %140 : vector<16x32xf32>
    %cst_52 = arith.constant dense<0.000000e+00> : vector<16x32xf32>
    %142 = tpu.matmul %141, %114, %cst_52 {dimension_numbers = #tpu.dot_dimension_numbers<[1], [0], [0], [1], [0, 0, 1, 1], [], []>, precision = #tpu.contract_precision<fp32>} : vector<16x32xf32>, vector<32x32xf32>, vector<16x32xf32> -> vector<16x32xf32>
    %143 = vector.broadcast %120 : vector<1x32xf32> to vector<16x32xf32>
    %144 = arith.addf %142, %143 : vector<16x32xf32>
    %cst_53 = arith.constant dense<0.000000e+00> : vector<8x32xf32>
    %145 = tpu.matmul %4, %144, %cst_53 {dimension_numbers = #tpu.dot_dimension_numbers<[1], [0], [0], [1], [0, 0, 1, 1], [], []>, precision = #tpu.contract_precision<fp32>} : vector<8x16xf32>, vector<16x32xf32>, vector<8x32xf32> -> vector<8x32xf32>
    %cst_54 = arith.constant dense<0.000000e+00> : vector<8x32xf32>
    %146 = tpu.matmul %129, %115, %cst_54 {dimension_numbers = #tpu.dot_dimension_numbers<[1], [0], [0], [1], [0, 0, 1, 1], [], []>, precision = #tpu.contract_precision<fp32>} : vector<8x32xf32>, vector<32x32xf32>, vector<8x32xf32> -> vector<8x32xf32>
    %cst_55 = arith.constant dense<0.000000e+00> : vector<8x32xf32>
    %147 = tpu.matmul %145, %116, %cst_55 {dimension_numbers = #tpu.dot_dimension_numbers<[1], [0], [0], [1], [0, 0, 1, 1], [], []>, precision = #tpu.contract_precision<fp32>} : vector<8x32xf32>, vector<32x32xf32>, vector<8x32xf32> -> vector<8x32xf32>
    %148 = arith.addf %146, %147 : vector<8x32xf32>
    %149 = vector.broadcast %121 : vector<1x32xf32> to vector<8x32xf32>
    %150 = arith.addf %148, %149 : vector<8x32xf32>
    %c3_i32 = arith.constant 3 : i32
    %c0_56 = arith.constant 0 : index
    %c0_57 = arith.constant 0 : index
    %151 = vector.load %arg7[%c0_56, %c0_57] : memref<8x32xf32, #tpu.memory_space<vmem>>, vector<8x32xf32>
    tpu.vector_store %arg7[%c0_56, %c0_57], %150 {strides = array<i32>} : memref<8x32xf32, #tpu.memory_space<vmem>>, vector<8x32xf32>,
    return
  }
  func.func @transform_0(%arg0: i32) -> (i32, i32) {
    %c0_i32 = arith.constant 0 : i32
    %c0_i32_0 = arith.constant 0 : i32
    %c0_i32_1 = arith.constant 0 : i32
    return %c0_i32, %c0_i32_0 : i32, i32
  }
  func.func @transform_1(%arg0: i32) -> (i32, i32) {
    %c0_i32 = arith.constant 0 : i32
    %c0_i32_0 = arith.constant 0 : i32
    %c0_i32_1 = arith.constant 0 : i32
    return %c0_i32, %c0_i32_0 : i32, i32
  }
  func.func @transform_2(%arg0: i32) -> (i32, i32) {
    %c0_i32 = arith.constant 0 : i32
    %c0_i32_0 = arith.constant 0 : i32
    %c0_i32_1 = arith.constant 0 : i32
    return %c0_i32, %c0_i32_0 : i32, i32
  }
  func.func @transform_3(%arg0: i32) -> (i32, i32) {
    %c0_i32 = arith.constant 0 : i32
    %c0_i32_0 = arith.constant 0 : i32
    %c0_i32_1 = arith.constant 0 : i32
    return %c0_i32, %c0_i32_0 : i32, i32
  }
  func.func @transform_4(%arg0: i32) -> (i32, i32, i32) {
    %c0_i32 = arith.constant 0 : i32
    %c0_i32_0 = arith.constant 0 : i32
    %c0_i32_1 = arith.constant 0 : i32
    return %arg0, %c0_i32, %c0_i32_0 : i32, i32, i32
  }
  func.func @transform_5(%arg0: i32) -> (i32, i32, i32) {
    %c0_i32 = arith.constant 0 : i32
    %c0_i32_0 = arith.constant 0 : i32
    %c0_i32_1 = arith.constant 0 : i32
    return %arg0, %c0_i32, %c0_i32_0 : i32, i32, i32
  }
  func.func @transform_6(%arg0: i32) -> (i32, i32) {
    %c0_i32 = arith.constant 0 : i32
    %c0_i32_0 = arith.constant 0 : i32
    %c0_i32_1 = arith.constant 0 : i32
    return %c0_i32, %c0_i32_0 : i32, i32
  }
}

</mosaic_0001>

<bundles_post_ra>
// kernel: tpu_custom_call.1
= control target key start
LH: loop header
LB: loop body
LE: loop exit
PB: predicated region body
PF: predicated region fallthrough
CT: control target
= control target key end

     0   :  { %v21106_v3 = vmov 0.0|0.0   ;;  %vm19419_vm0 = vmmov 0   ;;  %v21100_v8 = vmov 0.0   ;;  %vm29_vm1 = vcmask 261120   ;;  %s21087_s0 = inlined_call_operand.vmem [shape: f32[8,32], index: 0, kind: input, shape index: {}]   ;;  %s21088_s1 = inlined_call_operand.vmem [shape: f32[16,8], index: 1, kind: input, shape index: {}]   ;;  %s21089_s2 = inlined_call_operand.vmem [shape: f32[32,8], index: 2, kind: input, shape index: {}]   ;;  %s21090_s3 = inlined_call_operand.vmem [shape: f32[8,16], index: 3, kind: input, shape index: {}]   ;;  %s21091_s4 = inlined_call_operand.vmem [shape: f32[3,232,32], index: 4, kind: input, shape index: {}]   ;;  %s21092_s5 = inlined_call_operand.vmem [shape: f32[3,8,32], index: 5, kind: input, shape index: {}]   ;;  %s21093_s6 = inlined_call_operand.hbm [shape: f32[8,32], index: 6, kind: output, shape index: {}]  }
   0x1   :  { %v39_v0 = vld [vmem:[%s21091_s4] sm:$0xff]  ;;  %v40_v1 = vld [vmem:[%s21091_s4 + $0x8] sm:$0xff]  ;;  %v41_v2 = vld [vmem:[%s21091_s4 + $0x10] sm:$0xff]  ;;  %18175 = vmatprep.subr.bf16.mxu0 %v21106_v3  ;;  %16437 = vmatprep.mubr.msk.f32.mxu0 %vm19419_vm0, %v21100_v8 }
   0x2   :  { %v78_v4 = vand.u32 4294901760, %v39_v0  ;;  %v81_v5 = vand.u32 4294901760, %v40_v1  ;;  %v42_v6 = vld [vmem:[%s21091_s4 + $0x18] sm:$0xff]  ;;  %v84_v7 = vand.u32 4294901760, %v41_v2  ;;  %v28_v9 = vld [vmem:[%s21087_s0] sm:$0xff]  ;;  %18211 = vmatprep.subr.bf16.mxu1 %v21106_v3  ;;  %16503 = vmatprep.mubr.msk.f32.mxu1 %vm19419_vm0, %v21100_v8 }
   0x3   :  { %v87_v10 = vand.u32 4294901760, %v42_v6  ;;  %30 = vst.msk [vmem:[#allocation2] sm:$0xff] %vm29_vm1, %v28_v9 }
   0x4   :  { %v19479_v11 = vpack.c.bf16 %v81_v5, %v78_v4  ;;  %v158_v12 = vsub.f32 %v39_v0, %v78_v4  ;;  %v165_v13 = vsub.f32 %v40_v1, %v81_v5 }
   0x5   :  { %11 = vsyncpa [#allocation3], 0  ;;  %v19482_v14 = vpack.c.bf16 %v87_v10, %v84_v7  ;;  %v172_v15 = vsub.f32 %v41_v2, %v84_v7  ;;  %v179_v16 = vsub.f32 %v42_v6, %v87_v10  ;;  %v31_v40 = vld [vmem:[%s21089_s2] sm:$0xff]  ;;  %vm1055_vm2 = vcmask 64512   ;;  %v32_v42 = vld [vmem:[%s21089_s2 + $0x8] sm:$0xff]  ;;  %s19421_s29 = smov [#allocation2]  }
   0x6   :  { %18177 = vmatpush3.bf16.msra.mxu0 %v19479_v11  ;;  %v159_v17 = vand.u32 4294901760, %v158_v12  ;;  %v166_v18 = vand.u32 4294901760, %v165_v13  ;;  %v18188_v38 = vpack.c.bf16 %v165_v13, %v158_v12  ;;  %v1057_v41 = vsel %vm1055_vm2, %v31_v40, 0  ;;  %v33_v43 = vld [vmem:[%s21089_s2 + $0x10] sm:$0xff]  ;;  %v34_v49 = vld [vmem:[%s21089_s2 + $0x18] sm:$0xff]  ;;  %s15479_s30 = sshll.u32 %s19421_s29, 4  ;;  %s15480_s30 = int_to_ptr.vmem [resolvable:$true] %s15479_s30 }
   0x7   :  { %18178 = vmatprep.subr.bf16.mxu0 %v21106_v3  ;;  %v173_v20 = vand.u32 4294901760, %v172_v15  ;;  %v180_v24 = vand.u32 4294901760, %v179_v16  ;;  %v18191_v39 = vpack.c.bf16 %v179_v16, %v172_v15  ;;  %v19515_v45 = vand.u32 4294901760, %v1057_v41  ;;  %s19394_s0 = scalar_lea.vmem %s15480_s30, 128  ;;  %p19399_p1 = scmp.lt.s32.totalorder %s15480_s30, %s15480_s30 }
   0x8   :  { %v160_v22 = vsub.f32 %v158_v12, %v159_v17  ;;  %v167_v23 = vsub.f32 %v165_v13, %v166_v18  ;;  %v18200_v44 = vpack.c.bf16 %v166_v18, %v159_v17  ;;  %v1060_v46 = vsel %vm1055_vm2, %v32_v42, 0  ;;  %v43_v13 = vld [vmem:[%s21091_s4 + $0x20] sm:$0xff]  ;;  %p19395_p0 = scmp.ne.s32.totalorder %s15480_s30, %s19394_s0  ;;  %p19400_p2 = scmp.lt.s32.totalorder %s19394_s0, %s19394_s0 }
   0x9   :  { %v174_v29 = vsub.f32 %v172_v15, %v173_v20  ;;  %v181_v30 = vsub.f32 %v179_v16, %v180_v24  ;;  %v1063_v48 = vsel %vm1055_vm2, %v33_v43, 0  ;;  %v19525_v50 = vand.u32 4294901760, %v1060_v46 }
   0xa   :  { %18180 = vmatpush3.bf16.msra.mxu0 %v19482_v14  ;;  %v38_v19 = vld [vmem:[#allocation2] sm:$0xff]  ;;  %v161_v27 = vand.u32 4294901760, %v160_v22  ;;  %v168_v28 = vand.u32 4294901760, %v167_v23  ;;  %v18203_v51 = vpack.c.bf16 %v180_v24, %v173_v20  ;;  %v19530_v52 = vsub.f32 %v1057_v41, %v19515_v45  ;;  %v45_v20 = vld [vmem:[%s21091_s4 + $0x30] sm:$0xff]  ;;  %p19401_p3 = por %p19400_p2, %p19399_p1 }
   0xb   :  { %v75_v21 = vsel %vm29_vm1, %v38_v19, 0  ;;  %18181 = vmatprep.subr.bf16.mxu0 %v21106_v3  ;;  %v175_v34 = vand.u32 4294901760, %v174_v29  ;;  %v182_v35 = vand.u32 4294901760, %v181_v30  ;;  %v19518_v47 = vand.u32 4294901760, %v38_v19 }
   0xc   :  { %v19488_v25 = vand.u32 4294901760, %v75_v21  ;;  %v18182_v33 = vpack.c.bf16 %v168_v28, %v161_v27  ;;  %v19532_v53 = vand.u32 4294901760, %v1063_v48  ;;  %v1066_v54 = vsel %vm1055_vm2, %v34_v49, 0  ;;  %v19642_v49 = vld [vmem:[%s21092_s5] sm:$0xff]  ;;  %p19402_p4 = pnand %p19401_p3, %p19395_p0 }
   0xd   :  { %v18185_v37 = vpack.c.bf16 %v182_v35, %v175_v34  ;;  %v1176_v55 = vsub.f32 %v38_v19, %v19518_v47  ;;  %v19538_v56 = vsub.f32 %v1060_v46, %v19525_v50  ;;  %v19540_v57 = vand.u32 4294901760, %v1066_v54 }
   0xe   :  { %v147_v26 = vsub.f32 %v75_v21, %v19488_v25  ;;  %v19543_v58 = vand.u32 4294901760, %v19530_v52  ;;  %v19546_v59 = vsub.f32 %v1063_v48, %v19532_v53  ;;  %v571_v15 = vand.u32 4294901760, %v43_v13  ;;  %v46_v21 = vld [vmem:[%s21091_s4 + $0x38] sm:$0xff] }
   0xf   :  { %v1177_v60 = vand.u32 4294901760, %v1176_v55  ;;  %v19551_v61 = vand.u32 4294901760, %v19538_v56  ;;  %v19554_v62 = vsub.f32 %v1066_v54, %v19540_v57  ;;  %v577_v22 = vand.u32 4294901760, %v45_v20 }
  0x10   :  { %v148_v31 = vand.u32 4294901760, %v147_v26  ;;  %v1137_v63 = vsub.f32 %v19530_v52, %v19543_v58  ;;  %v19562_v0 = vand.u32 4294901760, %v19546_v59  ;;  %v651_v18 = vsub.f32 %v43_v13, %v571_v15 }
  0x11   :  { %v1178_v1 = vsub.f32 %v1176_v55, %v1177_v60  ;;  %v1147_v2 = vsub.f32 %v19538_v56, %v19551_v61  ;;  %v19568_v4 = vand.u32 4294901760, %v19554_v62  ;;  %v580_v23 = vand.u32 4294901760, %v46_v21 }
  0x12   :  { %v149_v32 = vsub.f32 %v147_v26, %v148_v31  ;;  %21114 = vst [vmem:[#allocation5_spill] sm:$0xff] %v19562_v0  ;;  %v19571_v5 = vand.u32 4294901760, %v1137_v63  ;;  %v1157_v6 = vsub.f32 %v19546_v59, %v19562_v0  ;;  %v652_v24 = vand.u32 4294901760, %v651_v18 }
  0x13   :  { %21115 = vst [vmem:[#allocation6_spill] sm:$0xff] %v19568_v4  ;;  %v1179_v7 = vand.u32 4294901760, %v1178_v1  ;;  %v19577_v9 = vand.u32 4294901760, %v1147_v2  ;;  %v1167_v10 = vsub.f32 %v19554_v62, %v19568_v4  ;;  %v665_v27 = vsub.f32 %v45_v20, %v577_v22  ;;  %v54_v20 = vld [vmem:[%s21091_s4 + $0x78] sm:$0xff] }
  0x14   :  { %v150_v36 = vand.u32 4294901760, %v149_v32  ;;  %v672_v28 = vsub.f32 %v46_v21, %v580_v23  ;;  %v653_v29 = vsub.f32 %v651_v18, %v652_v24  ;;  %v69_v46 = vlaneseq }
  0x15   :  { %v19586_v12 = vand.u32 4294901760, %v1167_v10  ;;  %vm3754_vm3 = vcmask 130048  }
  0x16   :  { %16438 = vmatmul.mubr.f32.vlgmr.msra.gmra.mrb[0].mxu0 %v150_v36  ;;  %v673_v34 = vand.u32 4294901760, %v672_v28  ;;  %v18227_v42 = vpack.c.bf16 %v672_v28, %v665_v27 }
  0x17   :  { %18183 = vmatpush3.bf16.msra.mxu0 %v18182_v33  ;;  %16448 = vmatprep.mubr.msk.f32.mxu0 %vm19419_vm0, %v21100_v8  ;;  %v666_v33 = vand.u32 4294901760, %v665_v27 }
  0x18   :  { %18184 = vmatprep.subr.bf16.mxu0 %v21106_v3 }
  0x19   :  { %v667_v36 = vsub.f32 %v665_v27, %v666_v33 }
  0x1b   :  { %18186 = vmatpush3.bf16.msra.mxu0 %v18185_v37  ;;  %v674_v37 = vsub.f32 %v672_v28, %v673_v34 }
  0x1c   :  { %18187 = vmatprep.subr.bf16.mxu0 %v21106_v3 }
  0x1e   :  { %16449 = vmatmul.mubr.f32.vlgmr.msra.gmra.mrb[0].mxu0 %v19488_v25 }
  0x1f   :  { %18189 = vmatpush3.bf16.msra.mxu0 %v18188_v38  ;;  %16459 = vmatprep.mubr.msk.f32.mxu0 %vm19419_vm0, %v21100_v8  ;;  %v668_v38 = vand.u32 4294901760, %v667_v36 }
  0x20   :  { %18190 = vmatprep.subr.bf16.mxu0 %v21106_v3 }
  0x23   :  { %18192 = vmatpush3.bf16.msra.mxu0 %v18191_v39  ;;  %v675_v39 = vand.u32 4294901760, %v674_v37 }
  0x24   :  { %18193 = vmatprep.subr.bf16.mxu0 %v21106_v3 }
  0x25   :  { %v18221_v40 = vpack.c.bf16 %v675_v39, %v668_v38 }
  0x26   :  { %16460 = vmatmul.mubr.f32.vlgmr.msra.gmra.mrb[0].mxu0 %v147_v26  ;;  %v19630_v26 = vpack.c.bf16 %v580_v23, %v577_v22 }
  0x27   :  { %18195 = vmatpush3.bf16.msra.mxu0 %v19479_v11  ;;  %16470 = vmatprep.mubr.msk.f32.mxu0 %vm19419_vm0, %v21100_v8 }
  0x28   :  { %18196 = vmatprep.subr.bf16.mxu0 %v21106_v3 }
  0x2b   :  { %18198 = vmatpush3.bf16.msra.mxu0 %v19482_v14 }
  0x2c   :  { %18199 = vmatprep.subr.bf16.mxu0 %v21106_v3 }
  0x2e   :  { %16471 = vmatmul.mubr.f32.vlgmr.msra.gmra.mrb[0].mxu0 %v148_v31  ;;  %v654_v31 = vand.u32 4294901760, %v653_v29 }
  0x2f   :  { %18201 = vmatpush3.bf16.msra.mxu0 %v18200_v44  ;;  %16481 = vmatprep.mubr.msk.f32.mxu0 %vm19419_vm0, %v21100_v8  ;;  %v18239_v44 = vpack.c.bf16 %v673_v34, %v666_v33 }
  0x30   :  { %18202 = vmatprep.subr.bf16.mxu0 %v21106_v3 }
  0x33   :  { %18204 = vmatpush3.bf16.msra.mxu0 %v18203_v51 }
  0x34   :  { %18205 = vmatprep.subr.bf16.mxu0 %v21106_v3 }
  0x36   :  { %16482 = vmatmul.mubr.f32.vlgmr.msra.gmra.mrb[0].mxu0 %v19488_v25 }
  0x37   :  { %18207 = vmatpush3.bf16.msra.mxu0 %v19479_v11  ;;  %16492 = vmatprep.mubr.msk.f32.mxu0 %vm19419_vm0, %v21100_v8  ;;  %v19583_v11 = vand.u32 4294901760, %v1157_v6 }
  0x38   :  { %18208 = vmatprep.subr.bf16.mxu0 %v21106_v3 }
  0x3b   :  { %18210 = vmatpush3.bf16.msra.mxu0 %v19482_v14  ;;  %v44_v14 = vld [vmem:[%s21091_s4 + $0x28] sm:$0xff] }
  0x3c   :  { %16561 = vmatprep.subr.mxu0 %v19518_v47  ;;  %v574_v16 = vand.u32 4294901760, %v44_v14 }
  0x3e   :  { %16493 = vmatmul.mubr.f32.vlgmr.msra.gmra.mrb[0].mxu0 %v19488_v25  ;;  %v19620_v17 = vpack.c.bf16 %v574_v16, %v571_v15  ;;  %v658_v19 = vsub.f32 %v44_v14, %v574_v16  ;;  %v51_v14 = vld [vmem:[%s21091_s4 + $0x60] sm:$0xff]  ;;  %v52_v15 = vld [vmem:[%s21091_s4 + $0x68] sm:$0xff] }
  0x3f   :  { %16562 = vmatpush3.msra.mxu0 %v19518_v47  ;;  %16563 = vmatprep.mubr.f32.mxu0 %v19571_v5  ;;  %v1650_v16 = vand.u32 4294901760, %v51_v14 }
  0x40   :  { %16569 = vmatprep.subr.mxu0 %v1179_v7  ;;  %18213 = vmatpush3.bf16.msra.mxu1 %v19620_v17  ;;  %v659_v25 = vand.u32 4294901760, %v658_v19  ;;  %v18224_v41 = vpack.c.bf16 %v658_v19, %v651_v18  ;;  %v1653_v18 = vand.u32 4294901760, %v52_v15 }
  0x41   :  { %18214 = vmatprep.subr.bf16.mxu1 %v21106_v3  ;;  %v19679_v21 = vsub.f32 %v51_v14, %v1650_v16 }
  0x42   :  { %16564 = vmatmul.mubr.f32.vlgmr.msra.gmra.mrb[2].mxu0 %v19577_v9  ;;  %v660_v30 = vsub.f32 %v658_v19, %v659_v25  ;;  %v18236_v43 = vpack.c.bf16 %v659_v25, %v652_v24  ;;  %v53_v19 = vld [vmem:[%s21091_s4 + $0x70] sm:$0xff]  ;;  %v19681_v22 = vsub.f32 %v52_v15, %v1653_v18  ;;  %v1659_v24 = vand.u32 4294901760, %v54_v20 }
  0x43   :  { %16566 = vmatprep.mubr.f32.mxu0 %v19583_v11  ;;  %16570 = vmatpush3.msra.mxu0 %v1179_v7  ;;  %v1656_v23 = vand.u32 4294901760, %v53_v19  ;;  %v1741_v28 = vand.u32 4294901760, %v19679_v21 }
  0x44   :  { %16577 = vmatprep.subr.mxu0 %v1176_v55  ;;  %18216 = vmatpush3.bf16.msra.mxu1 %v19630_v26  ;;  %v661_v32 = vand.u32 4294901760, %v660_v30  ;;  %v1748_v29 = vand.u32 4294901760, %v19681_v22 }
  0x45   :  { %18217 = vmatprep.subr.bf16.mxu1 %v21106_v3  ;;  %v19691_v30 = vsub.f32 %v53_v19, %v1656_v23  ;;  %v1742_v36 = vsub.f32 %v19679_v21, %v1741_v28  ;;  %v47_v19 = vld [vmem:[%s21091_s4 + $0x40] sm:$0xff] }
  0x46   :  { %16567 = vmatmul.mubr.f32.gmra.mrb[4].mxu0 %v19586_v12  ;;  %v18218_v35 = vpack.c.bf16 %v661_v32, %v654_v31  ;;  %v19693_v31 = vsub.f32 %v54_v20, %v1659_v24  ;;  %v1749_v37 = vsub.f32 %v19681_v22, %v1748_v29  ;;  %v48_v20 = vld [vmem:[%s21091_s4 + $0x48] sm:$0xff] }
  0x47   :  { %16571 = vmatprep.mubr.f32.mxu0 %v19515_v45 }
  0x4a   :  { %16572 = vmatmul.mubr.f32.vlgmr.msra.gmra.mrb[2].mxu0 %v19525_v50 }
  0x4b   :  { %16574 = vmatprep.mubr.f32.mxu0 %v19532_v53  ;;  %16578 = vmatpush3.msra.mxu0 %v1176_v55 }
  0x4c   :  { %16585 = vmatprep.subr.mxu0 %v19518_v47 }
  0x4e   :  { %16575 = vmatmul.mubr.f32.gmra.mrb[4].mxu0 %v19540_v57 }
  0x4f   :  { %16579 = vmatprep.mubr.f32.mxu0 %v19530_v52 }
  0x52   :  { %16580 = vmatmul.mubr.f32.vlgmr.msra.gmra.mrb[2].mxu0 %v19538_v56 }
  0x53   :  { %16582 = vmatprep.mubr.f32.mxu0 %v19546_v59  ;;  %16586 = vmatpush3.msra.mxu0 %v19518_v47 }
  0x54   :  { %16593 = vmatprep.subr.mxu0 %v1177_v60 }
  0x56   :  { %16583 = vmatmul.mubr.f32.gmra.mrb[4].mxu0 %v19554_v62 }
  0x57   :  { %16587 = vmatprep.mubr.f32.mxu0 %v19543_v58 }
  0x5a   :  { %16588 = vmatmul.mubr.f32.vlgmr.msra.gmra.mrb[2].mxu0 %v19551_v61 }
  0x5b   :  { %16590 = vmatprep.mubr.f32.mxu0 %v19562_v0  ;;  %16594 = vmatpush3.msra.mxu0 %v1177_v60 }
  0x5c   :  { %16601 = vmatprep.subr.mxu0 %v19518_v47 }
  0x5e   :  { %16591 = vmatmul.mubr.f32.gmra.mrb[4].mxu0 %v19568_v4 }
  0x5f   :  { %16595 = vmatprep.mubr.f32.mxu0 %v19515_v45 }
  0x62   :  { %16596 = vmatmul.mubr.f32.vlgmr.msra.gmra.mrb[2].mxu0 %v19525_v50 }
  0x63   :  { %16598 = vmatprep.mubr.f32.mxu0 %v19532_v53  ;;  %16602 = vmatpush3.msra.mxu0 %v19518_v47  ;;  %v19634_v47 = vshrl.u32 %v69_v46, 7  ;;  %v1743_v46 = vand.u32 4294901760, %v1742_v36 }
  0x65   :  { %v19637_v48 = vsub.s32 0, %v19634_v47 }
  0x66   :  { %16599 = vmatmul.mubr.f32.gmra.mrb[4].mxu0 %v19540_v57 }
  0x67   :  { %16603 = vmatprep.mubr.f32.mxu0 %v19515_v45  ;;  %21116 = vst [vmem:[#allocation7_spill] sm:$0xff] %v19637_v48  ;;  %v72_v51 = vrot.slane %v19642_v49, %v19637_v48 }
  0x6a   :  { %16604 = vmatmul.mubr.f32.vlgmr.msra.gmra.mrb[2].mxu0 %v19525_v50 }
  0x6b   :  { %16606 = vmatprep.mubr.f32.mxu0 %v19532_v53 }
  0x6e   :  { %16607 = vmatmul.mubr.f32.gmra.mrb[4].mxu0 %v19540_v57 }
 0x111   :  { %v558_v54 = vpop.f32.mrb[0].mxu0 }
 0x112   :  { %v19093_v55 = vadd.f32 %v558_v54, %v72_v51  ;;  %v16494_v60 = vpop.f32.mrb[1].mxu0  ;;  %v1750_v54 = vand.u32 4294901760, %v1749_v37 }
 0x114   :  { %v562_v63 = vmax.f32 %v19093_v55, 0.0 }
 0x116   :  { %v568_v1 = vsel %vm29_vm1, %v562_v63, 0 }
 0x117   :  { %v19647_v2 = vand.u32 4294901760, %v568_v1 }
 0x119   :  { %v640_v6 = vsub.f32 %v568_v1, %v19647_v2 }
 0x11b   :  { %v641_v7 = vand.u32 4294901760, %v640_v6 }
 0x11d   :  { %v642_v10 = vsub.f32 %v640_v6, %v641_v7 }
 0x11f   :  { %v643_v13 = vand.u32 4294901760, %v642_v10 }
 0x121   :  { %16504 = vmatmul.mubr.f32.vlgmr.msra.gmra.mrb[0].mxu1 %v643_v13 }
 0x122   :  { %18219 = vmatpush3.bf16.msra.mxu1 %v18218_v35  ;;  %16514 = vmatprep.mubr.msk.f32.mxu1 %vm19419_vm0, %v21100_v8  ;;  %v19700_v35 = vpack.c.bf16 %v1653_v18, %v1650_v16  ;;  %v18267_v16 = vpack.c.bf16 %v19693_v31, %v19691_v30  ;;  %v18279_v18 = vpack.c.bf16 %v1748_v29, %v1741_v28  ;;  %v50_v28 = vld [vmem:[%s21091_s4 + $0x58] sm:$0xff] }
 0x123   :  { %18220 = vmatprep.subr.bf16.mxu1 %v21106_v3 }
 0x126   :  { %18222 = vmatpush3.bf16.msra.mxu1 %v18221_v40  ;;  %v1762_v40 = vand.u32 4294901760, %v19693_v31 }
 0x127   :  { %18223 = vmatprep.subr.bf16.mxu1 %v21106_v3 }
 0x128   :  { %v1763_v60 = vsub.f32 %v19693_v31, %v1762_v40 }
 0x129   :  { %16515 = vmatmul.mubr.f32.vlgmr.msra.gmra.mrb[0].mxu1 %v19647_v2 }
 0x12a   :  { %18225 = vmatpush3.bf16.msra.mxu1 %v18224_v41  ;;  %16525 = vmatprep.mubr.msk.f32.mxu1 %vm19419_vm0, %v21100_v8  ;;  %v1764_v10 = vand.u32 4294901760, %v1763_v60 }
 0x12b   :  { %18226 = vmatprep.subr.bf16.mxu1 %v21106_v3 }
 0x12e   :  { %18228 = vmatpush3.bf16.msra.mxu1 %v18227_v42 }
 0x12f   :  { %18229 = vmatprep.subr.bf16.mxu1 %v21106_v3 }
 0x131   :  { %16526 = vmatmul.mubr.f32.vlgmr.msra.gmra.mrb[0].mxu1 %v640_v6 }
 0x132   :  { %18231 = vmatpush3.bf16.msra.mxu1 %v19620_v17  ;;  %16536 = vmatprep.mubr.msk.f32.mxu1 %vm19419_vm0, %v21100_v8 }
 0x133   :  { %18232 = vmatprep.subr.bf16.mxu1 %v21106_v3 }
 0x136   :  { %18234 = vmatpush3.bf16.msra.mxu1 %v19630_v26 }
 0x137   :  { %18235 = vmatprep.subr.bf16.mxu1 %v21106_v3 }
 0x139   :  { %16537 = vmatmul.mubr.f32.vlgmr.msra.gmra.mrb[0].mxu1 %v641_v7 }
 0x13a   :  { %18237 = vmatpush3.bf16.msra.mxu1 %v18236_v43  ;;  %16547 = vmatprep.mubr.msk.f32.mxu1 %vm19419_vm0, %v21100_v8 }
 0x13b   :  { %18238 = vmatprep.subr.bf16.mxu1 %v21106_v3 }
 0x13d   :  { %v19684_v25 = vpop.f32.mrb[2].mxu0 }
 0x13e   :  { %18240 = vmatpush3.bf16.msra.mxu1 %v18239_v44  ;;  %v19686_v27 = vpop.f32.mrb[3].mxu0  ;;  %v19717_v44 = vpack.c.bf16 %v1659_v24, %v1656_v23  ;;  %v2184_v23 = vand.u32 4294901760, %v47_v19 }
 0x13f   :  { %18241 = vmatprep.subr.bf16.mxu1 %v21106_v3 }
 0x141   :  { %16548 = vmatmul.mubr.f32.vlgmr.msra.gmra.mrb[0].mxu1 %v19647_v2  ;;  %v16608_v32 = vpop.f32.mrb[4].mxu0 }
 0x142   :  { %18243 = vmatpush3.bf16.msra.mxu1 %v19620_v17  ;;  %v1647_v33 = vsel %vm29_vm1, %v16608_v32, 0  ;;  %v1633_v34 = vpop.f32.mrb[5].mxu0  ;;  %16558 = vmatprep.mubr.msk.f32.mxu1 %vm19419_vm0, %v21100_v8  ;;  %v1755_v17 = vand.u32 4294901760, %v19691_v30  ;;  %v2193_v32 = vand.u32 4294901760, %v50_v28 }
 0x143   :  { %v19706_v38 = vand.u32 4294901760, %v1647_v33  ;;  %v1644_v39 = vsel %vm29_vm1, %v1633_v34, 0  ;;  %18244 = vmatprep.subr.bf16.mxu1 %v21106_v3  ;;  %v2181_v34 = vsel %vm29_vm1, %v19684_v25, 0 }
 0x144   :  { %v19712_v41 = vand.u32 4294901760, %v1644_v39  ;;  %v1756_v55 = vsub.f32 %v19691_v30, %v1755_v17  ;;  %v18283_v24 = vpack.c.bf16 %v1762_v40, %v1755_v17  ;;  %v2187_v30 = vand.u32 4294901760, %v48_v20 }
 0x145   :  { %v1729_v42 = vsub.f32 %v1647_v33, %v19706_v38 }
 0x146   :  { %v1719_v43 = vsub.f32 %v1644_v39, %v19712_v41  ;;  %18246 = vmatpush3.bf16.msra.mxu1 %v19630_v26  ;;  %v18255_v26 = vpack.c.bf16 %v1750_v54, %v1743_v46  ;;  %v1757_v7 = vand.u32 4294901760, %v1756_v55  ;;  %v19757_v33 = vsub.f32 %v48_v20, %v2187_v30 }
 0x147   :  { %v1730_v51 = vand.u32 4294901760, %v1729_v42  ;;  %18248 = vmatprep.subr.bf16.mxu1 %v19700_v35  ;;  %v19763_v39 = vand.u32 4294901760, %v2181_v34  ;;  %v19770_v25 = vpack.c.bf16 %v2187_v30, %v2184_v23 }
 0x148   :  { %v1720_v63 = vand.u32 4294901760, %v1719_v43  ;;  %v18259_v15 = vpack.c.bf16 %v1764_v10, %v1757_v7  ;;  %v2282_v17 = vand.u32 4294901760, %v19757_v33 }
 0x149   :  { %16559 = vmatmul.mubr.f32.vlgmr.msra.gmra.mrb[0].mxu1 %v19647_v2  ;;  %v1731_v6 = vsub.f32 %v1729_v42, %v1730_v51  ;;  %v18263_v2 = vpack.c.bf16 %v19681_v22, %v19679_v21  ;;  %v2178_v22 = vsel %vm29_vm1, %v19686_v27, 0  ;;  %v49_v21 = vld [vmem:[%s21091_s4 + $0x50] sm:$0xff]  ;;  %v19755_v27 = vsub.f32 %v47_v19, %v2184_v23  ;;  %v36_v19 = vld [vmem:[%s21088_s1] sm:$0xff] }
 0x14a   :  { %18250 = vmatpush3.bf16.msra.mxu1 %v19700_v35  ;;  %v1721_v1 = vsub.f32 %v1719_v43, %v1720_v63  ;;  %v19746_v31 = vand.u32 4294901760, %v2178_v22  ;;  %v2190_v29 = vand.u32 4294901760, %v49_v21  ;;  %v2283_v54 = vsub.f32 %v19757_v33, %v2282_v17  ;;  %v55_v23 = vld [vmem:[%s21091_s4 + $0x80] sm:$0xff] }
 0x14b   :  { %18252 = vmatprep.subr.bf16.mxu1 %v19717_v44  ;;  %v1732_v14 = vand.u32 4294901760, %v1731_v6  ;;  %v2275_v37 = vand.u32 4294901760, %v19755_v27 }
 0x14c   :  { %v1722_v13 = vand.u32 4294901760, %v1721_v1  ;;  %v2253_v36 = vsub.f32 %v2178_v22, %v19746_v31  ;;  %v2288_v40 = vsub.f32 %v49_v21, %v2190_v29  ;;  %v19777_v1 = vpack.c.bf16 %v2193_v32, %v2190_v29 }
 0x14d   :  { %v2276_v46 = vsub.f32 %v19755_v27, %v2275_v37  ;;  %v18327_v20 = vpack.c.bf16 %v2282_v17, %v2275_v37  ;;  %v2712_v22 = vsel %vm1055_vm2, %v36_v19, 0  ;;  %v2718_v21 = vand.u32 4294901760, %v55_v23 }
 0x14e   :  { %18254 = vmatpush3.bf16.msra.mxu1 %v19717_v44  ;;  %16617 = vmatprep.mubr.f32.mxu1 %v1722_v13  ;;  %v2289_v55 = vand.u32 4294901760, %v2288_v40 }
 0x14f   :  { %18256 = vmatprep.subr.bf16.mxu1 %v18255_v26 }
 0x151   :  { %16618 = vmatmul.mubr.f32.vlgmr.msra.gmra.mrb[2].mxu1 %v1732_v14 }
 0x152   :  { %18258 = vmatpush3.bf16.msra.mxu1 %v18255_v26  ;;  %16628 = vmatprep.mubr.f32.mxu1 %v19712_v41  ;;  %v2290_v26 = vsub.f32 %v2288_v40, %v2289_v55 }
 0x153   :  { %18260 = vmatprep.subr.bf16.mxu1 %v18259_v15 }
 0x156   :  { %18262 = vmatpush3.bf16.msra.mxu1 %v18259_v15 }
 0x157   :  { %18264 = vmatprep.subr.bf16.mxu1 %v18263_v2 }
 0x159   :  { %16629 = vmatmul.mubr.f32.vlgmr.msra.gmra.mrb[2].mxu1 %v19706_v38 }
 0x15a   :  { %18266 = vmatpush3.bf16.msra.mxu1 %v18263_v2  ;;  %16639 = vmatprep.mubr.f32.mxu1 %v1719_v43  ;;  %v2254_v43 = vand.u32 4294901760, %v2253_v36 }
 0x15b   :  { %18268 = vmatprep.subr.bf16.mxu1 %v18267_v16 }
 0x15e   :  { %18270 = vmatpush3.bf16.msra.mxu1 %v18267_v16 }
 0x15f   :  { %18272 = vmatprep.subr.bf16.mxu1 %v19700_v35 }
 0x161   :  { %16640 = vmatmul.mubr.f32.vlgmr.msra.gmra.mrb[2].mxu1 %v1729_v42  ;;  %v2295_v42 = vsub.f32 %v50_v28, %v2193_v32  ;;  %v37_v28 = vld [vmem:[%s21088_s1 + $0x8] sm:$0xff]  ;;  %v2805_v32 = vsub.f32 %v55_v23, %v2718_v21 }
 0x162   :  { %18274 = vmatpush3.bf16.msra.mxu1 %v19700_v35  ;;  %16650 = vmatprep.mubr.f32.mxu1 %v1720_v63  ;;  %v2255_v63 = vsub.f32 %v2253_v36, %v2254_v43  ;;  %v2715_v29 = vsel %vm1055_vm2, %v37_v28, 0 }
 0x163   :  { %18276 = vmatprep.subr.bf16.mxu1 %v19717_v44  ;;  %v2296_v60 = vand.u32 4294901760, %v2295_v42 }
 0x164   :  { %v2256_v10 = vand.u32 4294901760, %v2255_v63 }
 0x165   :  { %v2297_v7 = vsub.f32 %v2295_v42, %v2296_v60  ;;  %v18331_v30 = vpack.c.bf16 %v2296_v60, %v2289_v55  ;;  %v57_v55 = vld [vmem:[%s21091_s4 + $0x90] sm:$0xff] }
 0x166   :  { %18278 = vmatpush3.bf16.msra.mxu1 %v19717_v44  ;;  %v3230_v63 = vand.u32 4294901760, %v57_v55 }
 0x167   :  { %18280 = vmatprep.subr.bf16.mxu1 %v18279_v18  ;;  %v2298_v15 = vand.u32 4294901760, %v2297_v7 }
 0x169   :  { %16651 = vmatmul.mubr.f32.vlgmr.msra.gmra.mrb[2].mxu1 %v1730_v51  ;;  %v2263_v51 = vsub.f32 %v2181_v34, %v19763_v39 }
 0x16a   :  { %18282 = vmatpush3.bf16.msra.mxu1 %v18279_v18  ;;  %16661 = vmatprep.mubr.f32.mxu1 %v19712_v41  ;;  %v18315_v18 = vpack.c.bf16 %v2295_v42, %v2288_v40 }
 0x16b   :  { %18284 = vmatprep.subr.bf16.mxu1 %v18283_v24  ;;  %v2264_v6 = vand.u32 4294901760, %v2263_v51 }
 0x16d   :  { %v2265_v13 = vsub.f32 %v2263_v51, %v2264_v6 }
 0x16e   :  { %18286 = vmatpush3.bf16.msra.mxu1 %v18283_v24  ;;  %v19799_v24 = vand.u32 4294901760, %v2712_v22 }
 0x16f   :  { %18288 = vmatprep.subr.bf16.mxu1 %v19700_v35  ;;  %v2266_v2 = vand.u32 4294901760, %v2265_v13 }
 0x171   :  { %16662 = vmatmul.mubr.f32.vlgmr.msra.gmra.mrb[2].mxu1 %v19706_v38 }
 0x172   :  { %18290 = vmatpush3.bf16.msra.mxu1 %v19700_v35  ;;  %16672 = vmatprep.mubr.f32.mxu1 %v19712_v41  ;;  %v2277_v35 = vand.u32 4294901760, %v2276_v46  ;;  %v2284_v41 = vand.u32 4294901760, %v2283_v54  ;;  %v56_v54 = vld [vmem:[%s21091_s4 + $0x88] sm:$0xff] }
 0x173   :  { %18292 = vmatprep.subr.bf16.mxu1 %v19717_v44  ;;  %v3227_v60 = vand.u32 4294901760, %v56_v54 }
 0x174   :  { %v18303_v14 = vpack.c.bf16 %v2284_v41, %v2277_v35  ;;  %v58_v41 = vld [vmem:[%s21091_s4 + $0x98] sm:$0xff] }
 0x175   :  { %v3317_v35 = vsub.f32 %v56_v54, %v3227_v60  ;;  %v3233_v7 = vand.u32 4294901760, %v58_v41 }
 0x176   :  { %18294 = vmatpush3.bf16.msra.mxu1 %v19717_v44  ;;  %v2291_v44 = vand.u32 4294901760, %v2290_v26  ;;  %v59_v26 = vld [vmem:[%s21091_s4 + $0xa0] sm:$0xff] }
 0x177   :  { %18296 = vmatprep.subr.bf16.mxu1 %v19770_v25  ;;  %v3318_v13 = vand.u32 4294901760, %v3317_v35 }
 0x178   :  { %v18307_v16 = vpack.c.bf16 %v2298_v15, %v2291_v44 }
 0x179   :  { %16673 = vmatmul.mubr.f32.vlgmr.msra.gmra.mrb[2].mxu1 %v19706_v38  ;;  %v18311_v38 = vpack.c.bf16 %v19757_v33, %v19755_v27  ;;  %v19806_v27 = vsub.f32 %v2712_v22, %v19799_v24  ;;  %v19809_v33 = vand.u32 4294901760, %v2715_v29  ;;  %v3319_v15 = vsub.f32 %v3317_v35, %v3318_v13 }
 0x17a   :  { %18298 = vmatpush3.bf16.msra.mxu1 %v19770_v25  ;;  %16683 = vmatprep.mubr.f32.mxu1 %v2256_v10  ;;  %v3236_v10 = vand.u32 4294901760, %v59_v26 }
 0x17b   :  { %18300 = vmatprep.subr.bf16.mxu1 %v19777_v1  ;;  %v19812_v34 = vand.u32 4294901760, %v19806_v27  ;;  %v19817_v37 = vsub.f32 %v2715_v29, %v19809_v33 }
 0x17c   :  { %v19868_v44 = vpack.c.bf16 %v3236_v10, %v3233_v7 }
 0x17d   :  { %v2786_v17 = vsub.f32 %v19806_v27, %v19812_v34  ;;  %v19825_v42 = vand.u32 4294901760, %v19817_v37 }
 0x17e   :  { %18302 = vmatpush3.bf16.msra.mxu1 %v19777_v1 }
 0x17f   :  { %18304 = vmatprep.subr.bf16.mxu1 %v18303_v14 }
 0x181   :  { %16684 = vmatmul.mubr.f32.vlgmr.msra.gmra.mrb[2].mxu1 %v2266_v2 }
 0x182   :  { %18306 = vmatpush3.bf16.msra.mxu1 %v18303_v14  ;;  %16694 = vmatprep.mubr.f32.mxu1 %v19746_v31 }
 0x183   :  { %18308 = vmatprep.subr.bf16.mxu1 %v18307_v16 }
 0x186   :  { %18310 = vmatpush3.bf16.msra.mxu1 %v18307_v16  ;;  %v3331_v16 = vsub.f32 %v58_v41, %v3233_v7 }
 0x187   :  { %18312 = vmatprep.subr.bf16.mxu1 %v18311_v38 }
 0x189   :  { %16695 = vmatmul.mubr.f32.vlgmr.msra.gmra.mrb[2].mxu1 %v19763_v39 }
 0x18a   :  { %18314 = vmatpush3.bf16.msra.mxu1 %v18311_v38  ;;  %16705 = vmatprep.mubr.f32.mxu1 %v2253_v36  ;;  %v2806_v36 = vand.u32 4294901760, %v2805_v32  ;;  %v3338_v38 = vsub.f32 %v59_v26, %v3236_v10 }
 0x18b   :  { %18316 = vmatprep.subr.bf16.mxu1 %v18315_v18 }
 0x18c   :  { %v2807_v40 = vsub.f32 %v2805_v32, %v2806_v36  ;;  %v3339_v22 = vand.u32 4294901760, %v3338_v38 }
 0x18e   :  { %18318 = vmatpush3.bf16.msra.mxu1 %v18315_v18  ;;  %v2808_v46 = vand.u32 4294901760, %v2807_v40  ;;  %v3320_v18 = vand.u32 4294901760, %v3319_v15 }
 0x18f   :  { %18320 = vmatprep.subr.bf16.mxu1 %v19770_v25 }
 0x191   :  { %16706 = vmatmul.mubr.f32.vlgmr.msra.gmra.mrb[2].mxu1 %v2263_v51 }
 0x192   :  { %18322 = vmatpush3.bf16.msra.mxu1 %v19770_v25  ;;  %16716 = vmatprep.mubr.f32.mxu1 %v2254_v43  ;;  %v19828_v43 = vand.u32 4294901760, %v2786_v17  ;;  %v18363_v17 = vpack.c.bf16 %v3338_v38, %v3331_v16 }
 0x193   :  { %18324 = vmatprep.subr.bf16.mxu1 %v19777_v1 }
 0x196   :  { %18326 = vmatpush3.bf16.msra.mxu1 %v19777_v1 }
 0x197   :  { %18328 = vmatprep.subr.bf16.mxu1 %v18327_v20 }
 0x199   :  { %16717 = vmatmul.mubr.f32.vlgmr.msra.gmra.mrb[2].mxu1 %v2264_v6  ;;  %v3324_v6 = vsub.f32 %v57_v55, %v3230_v63 }
 0x19a   :  { %18330 = vmatpush3.bf16.msra.mxu1 %v18327_v20  ;;  %16727 = vmatprep.mubr.f32.mxu1 %v19746_v31  ;;  %v3332_v20 = vand.u32 4294901760, %v3331_v16 }
 0x19b   :  { %18332 = vmatprep.subr.bf16.mxu1 %v18331_v30  ;;  %v3325_v14 = vand.u32 4294901760, %v3324_v6 }
 0x19d   :  { %v3326_v2 = vsub.f32 %v3324_v6, %v3325_v14  ;;  %v18375_v40 = vpack.c.bf16 %v3325_v14, %v3318_v13 }
 0x19e   :  { %18334 = vmatpush3.bf16.msra.mxu1 %v18331_v30  ;;  %v3333_v30 = vsub.f32 %v3331_v16, %v3332_v20 }
 0x19f   :  { %18336 = vmatprep.subr.bf16.mxu1 %v19770_v25  ;;  %v3327_v19 = vand.u32 4294901760, %v3326_v2 }
 0x1a0   :  { %v3334_v28 = vand.u32 4294901760, %v3333_v30 }
 0x1a1   :  { %16728 = vmatmul.mubr.f32.vlgmr.msra.gmra.mrb[2].mxu1 %v19763_v39  ;;  %v18351_v23 = vpack.c.bf16 %v3327_v19, %v3320_v18 }
 0x1a2   :  { %18338 = vmatpush3.bf16.msra.mxu1 %v19770_v25  ;;  %16738 = vmatprep.mubr.f32.mxu1 %v19746_v31  ;;  %v2796_v31 = vsub.f32 %v19817_v37, %v19825_v42 }
 0x1a3   :  { %18340 = vmatprep.subr.bf16.mxu1 %v19777_v1 }
 0x1a4   :  { %v19834_v25 = vand.u32 4294901760, %v2796_v31  ;;  %v19873_v31 = vsub.s32 2, %v19634_v47 }
 0x1a6   :  { %18342 = vmatpush3.bf16.msra.mxu1 %v19777_v1  ;;  %v19858_v1 = vpack.c.bf16 %v3230_v63, %v3227_v60 }
 0x1a7   :  { %16741 = vmatprep.subr.mxu1 %v2718_v21 }
 0x1a8   :  { %18344 = vmatprep.subr.bf16.mxu0 %v19858_v1 }
 0x1a9   :  { %16739 = vmatmul.mubr.f32.vlgmr.msra.gmra.mrb[2].mxu1 %v19763_v39  ;;  %18346 = vmatpush3.bf16.msra.mxu0 %v19858_v1 }
 0x1aa   :  { %16742 = vmatpush3.msra.mxu1 %v2718_v21  ;;  %16743 = vmatprep.mubr.f32.mxu1 %v19828_v43 }
 0x1ab   :  { %16746 = vmatprep.subr.mxu1 %v2808_v46  ;;  %18348 = vmatprep.subr.bf16.mxu0 %v19868_v44 }
 0x1ad   :  { %18350 = vmatpush3.bf16.msra.mxu0 %v19868_v44 }
 0x1ae   :  { %18352 = vmatprep.subr.bf16.mxu0 %v18351_v23 }
 0x1b1   :  { %16744 = vmatmul.mubr.f32.vlgmr.msra.gmra.mrb[2].mxu1 %v19834_v25 }
 0x1b2   :  { %16747 = vmatpush3.msra.mxu1 %v2808_v46  ;;  %16748 = vmatprep.mubr.f32.mxu1 %v19799_v24  ;;  %v18379_v46 = vpack.c.bf16 %v3339_v22, %v3332_v20  ;;  %v19893_v20 = vld [vmem:[%s21091_s4 + $0xc8] sm:$0xff] }
 0x1b3   :  { %16751 = vmatprep.subr.mxu1 %v2805_v32 }
 0x1b9   :  { %16749 = vmatmul.mubr.f32.vlgmr.msra.gmra.mrb[2].mxu1 %v19809_v33 }
 0x1ba   :  { %16752 = vmatpush3.msra.mxu1 %v2805_v32  ;;  %16753 = vmatprep.mubr.f32.mxu1 %v19806_v27 }
 0x1bb   :  { %16756 = vmatprep.subr.mxu1 %v2718_v21 }
 0x1c1   :  { %16754 = vmatmul.mubr.f32.vlgmr.msra.gmra.mrb[2].mxu1 %v19817_v37 }
 0x1c2   :  { %16757 = vmatpush3.msra.mxu1 %v2718_v21  ;;  %16758 = vmatprep.mubr.f32.mxu1 %v19812_v34 }
 0x1c3   :  { %16761 = vmatprep.subr.mxu1 %v2806_v36 }
 0x1c9   :  { %16759 = vmatmul.mubr.f32.vlgmr.msra.gmra.mrb[2].mxu1 %v19825_v42 }
 0x1ca   :  { %16762 = vmatpush3.msra.mxu1 %v2806_v36  ;;  %16763 = vmatprep.mubr.f32.mxu1 %v19799_v24  ;;  %v18359_v36 = vpack.c.bf16 %v3324_v6, %v3317_v35 }
 0x1cb   :  { %16766 = vmatprep.subr.mxu1 %v2718_v21 }
 0x1d1   :  { %16764 = vmatmul.mubr.f32.vlgmr.msra.gmra.mrb[2].mxu1 %v19809_v33 }
 0x1d2   :  { %16767 = vmatpush3.msra.mxu1 %v2718_v21  ;;  %16768 = vmatprep.mubr.f32.mxu1 %v19799_v24  ;;  %v3340_v21 = vsub.f32 %v3338_v38, %v3339_v22  ;;  %v4221_v22 = vand.u32 4294901760, %v19893_v20 }
 0x1d3   :  { %18415 = vmatprep.subr.bf16.mxu1 %v21106_v3 }
 0x1d4   :  { %v3341_v29 = vand.u32 4294901760, %v3340_v21 }
 0x1d6   :  { %v18355_v32 = vpack.c.bf16 %v3341_v29, %v3334_v28 }
 0x1d9   :  { %16769 = vmatmul.mubr.f32.vlgmr.msra.gmra.mrb[2].mxu1 %v19809_v33 }
 0x1da   :  { %16898 = vmatprep.mubr.msk.f32.mxu1 %vm19419_vm0, %v21100_v8 }
 0x21c   :  { %v19850_v39 = vpop.f32.mrb[0].mxu1 }
 0x21d   :  { %v16560_v51 = vpop.f32.mrb[1].mxu1 }
 0x21e   :  { %v3211_v51 = vrot.slane %v19642_v49, %v19873_v31 }
 0x2ac   :  { %v16770_v54 = vpop.f32.mrb[2].mxu1 }
 0x2ad   :  { %v3213_v55 = vadd.f32 %v16770_v54, %v3211_v51  ;;  %v3196_v60 = vpop.f32.mrb[3].mxu1 }
 0x2ae   :  { %v3212_v63 = vadd.f32 %v3211_v51, %v3196_v60 }
 0x2af   :  { %v3215_v41 = vmax.f32 %v3213_v55, 0.0  ;;  %v19927_v55 = vsub.s32 3, %v19634_v47 }
 0x2b0   :  { %v3214_v26 = vmax.f32 %v3212_v63, 0.0 }
 0x2b1   :  { %v3224_v7 = vsel %vm29_vm1, %v3215_v41, 0  ;;  %v3219_v63 = vrot.slane %v19642_v49, %v19927_v55 }
 0x2b2   :  { %v3305_v10 = vand.u32 4294901760, %v3224_v7  ;;  %v3221_v35 = vsel %vm29_vm1, %v3214_v26, 0 }
 0x2b3   :  { %v3295_v6 = vand.u32 4294901760, %v3221_v35 }
 0x2b4   :  { %v3306_v13 = vsub.f32 %v3224_v7, %v3305_v10 }
 0x2b5   :  { %v3296_v14 = vsub.f32 %v3221_v35, %v3295_v6 }
 0x2b6   :  { %v3307_v15 = vand.u32 4294901760, %v3306_v13 }
 0x2b7   :  { %v3297_v2 = vand.u32 4294901760, %v3296_v14 }
 0x2b8   :  { %v3308_v16 = vsub.f32 %v3306_v13, %v3307_v15 }
 0x2b9   :  { %v3298_v38 = vsub.f32 %v3296_v14, %v3297_v2 }
 0x2ba   :  { %v3309_v19 = vand.u32 4294901760, %v3308_v16 }
 0x2bb   :  { %v3299_v18 = vand.u32 4294901760, %v3298_v38 }
 0x2bd   :  { %16779 = vmatprep.mubr.f32.mxu0 %v3299_v18 }
 0x2be   :  { %16780 = vmatmul.mubr.f32.vlgmr.msra.gmra.mrb[6].mxu0 %v3309_v19 }
 0x2bf   :  { %18354 = vmatpush3.bf16.msra.mxu0 %v18351_v23  ;;  %16790 = vmatprep.mubr.f32.mxu0 %v3295_v6  ;;  %v19905_v23 = vsub.f32 %v19893_v20, %v4221_v22  ;;  %v19998_v20 = vld [vmem:[%s21091_s4 + $0xb0] sm:$0xff] }
 0x2c0   :  { %18356 = vmatprep.subr.bf16.mxu0 %v18355_v32 }
 0x2c1   :  { %v21099_v21 = vand.u32 4294901760, %v19905_v23 }
 0x2c3   :  { %18358 = vmatpush3.bf16.msra.mxu0 %v18355_v32  ;;  %v4303_v29 = vsub.f32 %v19905_v23, %v21099_v21 }
 0x2c4   :  { %18360 = vmatprep.subr.bf16.mxu0 %v18359_v36 }
 0x2c6   :  { %16791 = vmatmul.mubr.f32.vlgmr.msra.gmra.mrb[6].mxu0 %v3305_v10 }
 0x2c7   :  { %18362 = vmatpush3.bf16.msra.mxu0 %v18359_v36  ;;  %16801 = vmatprep.mubr.f32.mxu0 %v3296_v14  ;;  %v4304_v36 = vand.u32 4294901760, %v4303_v29 }
 0x2c8   :  { %18364 = vmatprep.subr.bf16.mxu0 %v18363_v17 }
 0x2cb   :  { %18366 = vmatpush3.bf16.msra.mxu0 %v18363_v17 }
 0x2cc   :  { %18368 = vmatprep.subr.bf16.mxu0 %v19858_v1 }
 0x2ce   :  { %16802 = vmatmul.mubr.f32.vlgmr.msra.gmra.mrb[6].mxu0 %v3306_v13 }
 0x2cf   :  { %18370 = vmatpush3.bf16.msra.mxu0 %v19858_v1  ;;  %16812 = vmatprep.mubr.f32.mxu0 %v3297_v2 }
 0x2d0   :  { %18372 = vmatprep.subr.bf16.mxu0 %v19868_v44 }
 0x2d3   :  { %18374 = vmatpush3.bf16.msra.mxu0 %v19868_v44 }
 0x2d4   :  { %18376 = vmatprep.subr.bf16.mxu0 %v18375_v40 }
 0x2d6   :  { %16813 = vmatmul.mubr.f32.vlgmr.msra.gmra.mrb[6].mxu0 %v3307_v15 }
 0x2d7   :  { %18378 = vmatpush3.bf16.msra.mxu0 %v18375_v40  ;;  %16823 = vmatprep.mubr.f32.mxu0 %v3295_v6 }
 0x2d8   :  { %18380 = vmatprep.subr.bf16.mxu0 %v18379_v46 }
 0x2db   :  { %18382 = vmatpush3.bf16.msra.mxu0 %v18379_v46  ;;  %v35_v46 = vld [vmem:[%s21090_s3] sm:$0xff] }
 0x2dc   :  { %18384 = vmatprep.subr.bf16.mxu0 %v19858_v1  ;;  %v3756_v51 = vsel %vm3754_vm3, %v35_v46, 0 }
 0x2dd   :  { %v19924_v54 = vand.u32 4294901760, %v3756_v51 }
 0x2de   :  { %16824 = vmatmul.mubr.f32.vlgmr.msra.gmra.mrb[6].mxu0 %v3305_v10 }
 0x2df   :  { %18386 = vmatpush3.bf16.msra.mxu0 %v19858_v1  ;;  %16834 = vmatprep.mubr.f32.mxu0 %v3295_v6  ;;  %v19898_v1 = vld [vmem:[%s21091_s4 + $0xd0] sm:$0xff]  ;;  %v19930_v60 = vsub.f32 %v3756_v51, %v19924_v54 }
 0x2e0   :  { %18388 = vmatprep.subr.bf16.mxu0 %v19868_v44 }
 0x2e1   :  { %v19935_v41 = vand.u32 4294901760, %v19930_v60 }
 0x2e3   :  { %18390 = vmatpush3.bf16.msra.mxu0 %v19868_v44  ;;  %v4224_v44 = vand.u32 4294901760, %v19898_v1  ;;  %21117 = vst [vmem:[#allocation8_spill] sm:$0xff] %v19935_v41  ;;  %v3828_v13 = vsub.f32 %v19930_v60, %v19935_v41 }
 0x2e4   :  { %18391 = vmatprep.subr.bf16.mxu0 %v21106_v3 }
 0x2e5   :  { %v19910_v30 = vsub.f32 %v19898_v1, %v4224_v44  ;;  %v19939_v18 = vand.u32 4294901760, %v3828_v13 }
 0x2e6   :  { %16835 = vmatmul.mubr.f32.vlgmr.msra.gmra.mrb[6].mxu0 %v3305_v10 }
 0x2e7   :  { %16841 = vmatprep.mubr.msk.f32.mxu0 %vm19419_vm0, %v21100_v8  ;;  %v21098_v28 = vand.u32 4294901760, %v19910_v30 }
 0x2e9   :  { %v4310_v32 = vsub.f32 %v19910_v30, %v21098_v28 }
 0x2eb   :  { %v4311_v17 = vand.u32 4294901760, %v4310_v32 }
 0x2ed   :  { %v18416_v40 = vpack.c.bf16 %v4311_v17, %v4304_v36 }
 0x2ef   :  { %18417 = vmatpush3.bf16.msra.mxu1 %v18416_v40 }
 0x2f0   :  { %18418 = vmatprep.subr.bf16.mxu1 %v21106_v3 }
 0x3b9   :  { %v16836_v26 = vpop.f32.mrb[6].mxu0 }
 0x3ba   :  { %v19095_v7 = vadd.f32 %v16836_v26, %v3219_v63  ;;  %v3744_v10 = vpop.f32.mrb[7].mxu0  ;;  %v67_v26 = vld [vmem:[%s21091_s4 + $0xe0] sm:$0xff] }
 0x3bb   :  { %v19096_v35 = vadd.f32 %v3744_v10, %v3219_v63  ;;  %v66_v63 = vld [vmem:[%s21091_s4 + $0xd8] sm:$0xff]  ;;  %v4230_v10 = vand.u32 4294901760, %v67_v26 }
 0x3bc   :  { %v3762_v6 = vand.u32 4294901760, %v19095_v7 }
 0x3bd   :  { %v3759_v14 = vand.u32 4294901760, %v19096_v35 }
 0x3be   :  { %v3844_v15 = vsub.f32 %v19095_v7, %v3762_v6  ;;  %v4227_v7 = vand.u32 4294901760, %v66_v63 }
 0x3bf   :  { %v18392_v2 = vpack.c.bf16 %v3762_v6, %v3759_v14  ;;  %v3837_v16 = vsub.f32 %v19096_v35, %v3759_v14  ;;  %v19973_v6 = vsub.f32 %v67_v26, %v4230_v10 }
 0x3c0   :  { %v3845_v38 = vand.u32 4294901760, %v3844_v15  ;;  %v19971_v35 = vsub.f32 %v66_v63, %v4227_v7 }
 0x3c1   :  { %v3838_v19 = vand.u32 4294901760, %v3837_v16  ;;  %v18398_v29 = vpack.c.bf16 %v3844_v15, %v3837_v16  ;;  %18393 = vmatpush3.bf16.msra.mxu0 %v18392_v2  ;;  %v4323_v14 = vand.u32 4294901760, %v19973_v6 }
 0x3c2   :  { %v3846_v32 = vsub.f32 %v3844_v15, %v3845_v38  ;;  %18394 = vmatprep.subr.bf16.mxu0 %v21106_v3  ;;  %v4316_v13 = vand.u32 4294901760, %v19971_v35 }
 0x3c3   :  { %v3839_v36 = vsub.f32 %v3837_v16, %v3838_v19  ;;  %v18404_v17 = vpack.c.bf16 %v3845_v38, %v3838_v19 }
 0x3c4   :  { %v3847_v40 = vand.u32 4294901760, %v3846_v32  ;;  %16842 = vmatmul.mubr.f32.vlgmr.msra.gmra.mrb[8].mxu0 %v19939_v18  ;;  %v4317_v15 = vsub.f32 %v19971_v35, %v4316_v13  ;;  %v18413_v32 = vpack.c.bf16 %v4230_v10, %v4227_v7 }
 0x3c5   :  { %v3840_v46 = vand.u32 4294901760, %v3839_v36  ;;  %16848 = vmatprep.mubr.msk.f32.mxu0 %vm19419_vm0, %v21100_v8  ;;  %v18425_v36 = vpack.c.bf16 %v19973_v6, %v19971_v35 }
 0x3c6   :  { %v4318_v16 = vand.u32 4294901760, %v4317_v15 }
 0x3c7   :  { %v18395_v51 = vpack.c.bf16 %v3847_v40, %v3840_v46  ;;  %v19993_v40 = vld [vmem:[%s21091_s4 + $0xa8] sm:$0xff]  ;;  %v20010_v46 = vld [vmem:[%s21091_s4 + $0xc0] sm:$0xff] }
 0x3c8   :  { %v21097_v1 = vand.u32 4294901760, %v19993_v40 }
 0x3c9   :  { %18396 = vmatpush3.bf16.msra.mxu0 %v18395_v51 }
 0x3ca   :  { %18397 = vmatprep.subr.bf16.mxu0 %v21106_v3  ;;  %v20015_v63 = vsub.f32 %v19993_v40, %v21097_v1 }
 0x3cc   :  { %16849 = vmatmul.mubr.f32.vlgmr.msra.gmra.mrb[8].mxu0 %v19924_v54 }
 0x3cd   :  { %18399 = vmatpush3.bf16.msra.mxu0 %v18398_v29  ;;  %16855 = vmatprep.mubr.msk.f32.mxu0 %vm19419_vm0, %v21100_v8  ;;  %v18410_v29 = vpack.c.bf16 %v4224_v44, %v4221_v22  ;;  %v21094_v22 = vand.u32 4294901760, %v19998_v20  ;;  %v20005_v44 = vld [vmem:[%s21091_s4 + $0xb8] sm:$0xff] }
 0x3ce   :  { %18400 = vmatprep.subr.bf16.mxu0 %v21106_v3  ;;  %v21095_v35 = vand.u32 4294901760, %v20005_v44 }
 0x3cf   :  { %v20021_v10 = vsub.f32 %v19998_v20, %v21094_v22  ;;  %v18422_v22 = vpack.c.bf16 %v19910_v30, %v19905_v23 }
 0x3d4   :  { %16856 = vmatmul.mubr.f32.vlgmr.msra.gmra.mrb[8].mxu0 %v19930_v60 }
 0x3d5   :  { %18402 = vmatpush3.bf16.msra.mxu0 %v18392_v2  ;;  %16862 = vmatprep.mubr.msk.f32.mxu0 %vm19419_vm0, %v21100_v8 }
 0x3d6   :  { %18403 = vmatprep.subr.bf16.mxu0 %v21106_v3 }
 0x3dc   :  { %16863 = vmatmul.mubr.f32.vlgmr.msra.gmra.mrb[8].mxu0 %v19935_v41 }
 0x3dd   :  { %18405 = vmatpush3.bf16.msra.mxu0 %v18404_v17  ;;  %16869 = vmatprep.mubr.msk.f32.mxu0 %vm19419_vm0, %v21100_v8  ;;  %v19988_v17 = vpack.c.bf16 %v4323_v14, %v4316_v13 }
 0x3de   :  { %18406 = vmatprep.subr.bf16.mxu0 %v21106_v3 }
 0x3e4   :  { %16870 = vmatmul.mubr.f32.vlgmr.msra.gmra.mrb[8].mxu0 %v19924_v54 }
 0x3e5   :  { %18408 = vmatpush3.bf16.msra.mxu0 %v18392_v2  ;;  %16876 = vmatprep.mubr.msk.f32.mxu0 %vm19419_vm0, %v21100_v8  ;;  %v4324_v2 = vsub.f32 %v19973_v6, %v4323_v14  ;;  %v21096_v6 = vand.u32 4294901760, %v20010_v46  ;;  %v20026_v14 = vsub.s32 1, %v19634_v47 }
 0x3e6   :  { %18409 = vmatprep.subr.bf16.mxu0 %v21106_v3 }
 0x3e7   :  { %v4325_v38 = vand.u32 4294901760, %v4324_v2  ;;  %21118 = vst [vmem:[#allocation9_spill] sm:$0xff] %v20026_v14  ;;  %v21104_v2 = vand.u32 4294901760, %v20015_v63 }
 0x3e9   :  { %v18419_v19 = vpack.c.bf16 %v4325_v38, %v4318_v16  ;;  %v21105_v16 = vand.u32 4294901760, %v20021_v10  ;;  %v20035_v38 = vsub.f32 %v20005_v44, %v21095_v35  ;;  %v4791_v35 = vsub.f32 %v20015_v63, %v21104_v2 }
 0x3eb   :  { %18420 = vmatpush3.bf16.msra.mxu1 %v18419_v19  ;;  %v20040_v19 = vsub.f32 %v20010_v46, %v21096_v6  ;;  %v4798_v6 = vsub.f32 %v20021_v10, %v21105_v16  ;;  %v4804_v1 = vand.u32 4294901760, %v20035_v38 }
 0x3ec   :  { %16877 = vmatmul.mubr.f32.vlgmr.msra.gmra.mrb[8].mxu0 %v19924_v54  ;;  %18427 = vmatprep.subr.bf16.mxu1 %v21106_v3 }
 0x3ed   :  { %16887 = vmatprep.mubr.msk.f32.mxu0 %vm19419_vm0, %v21100_v8  ;;  %18411 = vmatpush3.bf16.msra.mxu0 %v18410_v29  ;;  %v4811_v28 = vand.u32 4294901760, %v20040_v19  ;;  %v4805_v2 = vsub.f32 %v20035_v38, %v4804_v1 }
 0x3ee   :  { %18412 = vmatprep.subr.bf16.mxu0 %v21106_v3 }
 0x3ef   :  { %v4812_v16 = vsub.f32 %v20040_v19, %v4811_v28 }
 0x3f1   :  { %18414 = vmatpush3.bf16.msra.mxu0 %v18413_v32 }
 0x3f2   :  { %18421 = vmatprep.subr.bf16.mxu0 %v21106_v3 }
 0x4bf   :  { %v4213_v51 = vpop.f32.mrb[8].mxu0 }
 0x4c0   :  { %v4218_v26 = vsel %vm29_vm1, %v4213_v51, 0  ;;  %v16878_v7 = vpop.f32.mrb[9].mxu0 }
 0x4c1   :  { %v4289_v13 = vand.u32 4294901760, %v4218_v26 }
 0x4c3   :  { %v4290_v15 = vsub.f32 %v4218_v26, %v4289_v13  ;;  %16899 = vmatmul.mubr.f32.vlgmr.msra.gmra.mrb[4].mxu1 %v4289_v13  ;;  %v566_v26 = vrot.slane %v19642_v49, %v20026_v14  ;;  %v4799_v14 = vand.u32 4294901760, %v4798_v6  ;;  %v4806_v6 = vand.u32 4294901760, %v4805_v2 }
 0x4c4   :  { %18429 = vmatpush3.bf16.msra.mxu1 %v18410_v29  ;;  %16920 = vmatprep.mubr.msk.f32.mxu1 %vm19419_vm0, %v21100_v8  ;;  %v4792_v8 = vand.u32 4294901760, %v4791_v35  ;;  %v21127_v2 = vand.u32 4294901760, %v20021_v10 }
 0x4c5   :  { %v4291_v51 = vand.u32 4294901760, %v4290_v15  ;;  %18430 = vmatprep.subr.bf16.mxu1 %v21106_v3  ;;  %v19094_v49 = vadd.f32 %v19850_v39, %v566_v26  ;;  %v4813_v26 = vand.u32 4294901760, %v4812_v16 }
 0x4c6   :  { %v18452_v35 = vpack.c.bf16 %v4799_v14, %v4792_v8  ;;  %v21122_v8 = vand.u32 4294901760, %v19993_v40  ;;  %v21124_v14 = vand.u32 4294901760, %v20005_v44 }
 0x4c7   :  { %v4292_v7 = vsub.f32 %v4290_v15, %v4291_v51  ;;  %v4706_v39 = vsel %vm29_vm1, %v19094_v49, 0  ;;  %v18455_v49 = vpack.c.bf16 %v4813_v26, %v4806_v6 }
 0x4c8   :  { %18432 = vmatpush3.bf16.msra.mxu1 %v18413_v32 }
 0x4c9   :  { %v4293_v21 = vand.u32 4294901760, %v4292_v7  ;;  %18439 = vmatprep.subr.bf16.mxu1 %v21106_v3  ;;  %v4777_v7 = vand.u32 4294901760, %v4706_v39 }
 0x4cb   :  { %16921 = vmatmul.mubr.f32.vlgmr.msra.gmra.mrb[6].mxu1 %v4291_v51  ;;  %16888 = vmatmul.mubr.f32.vlgmr.msra.gmra.mrb[10].mxu0 %v4293_v21  ;;  %v21119_v51 = vmov 0.0   ;;  %v21120_v21 = vand.u32 4294901760, %v19905_v23  ;;  %v21123_v23 = vand.u32 4294901760, %v19998_v20  ;;  %v18458_v20 = vpack.c.bf16 %v20021_v10, %v20015_v63 }
 0x4cc   :  { %18423 = vmatpush3.bf16.msra.mxu0 %v18422_v22  ;;  %18441 = vmatpush3.bf16.msra.mxu1 %v18410_v29  ;;  %v21121_v29 = vand.u32 4294901760, %v19910_v30 }
 0x4cd   :  { %18424 = vmatprep.subr.bf16.mxu0 %v21106_v3  ;;  %18442 = vmatprep.subr.bf16.mxu1 %v21106_v3  ;;  %v18446_v30 = vpack.c.bf16 %v21123_v23, %v21122_v8 }
 0x4ce   :  { %16909 = vmatprep.mubr.msk.f32.mxu0 %vm19419_vm0, %v21119_v51  ;;  %16942 = vmatprep.mubr.msk.f32.mxu1 %vm19419_vm0, %v21119_v51  ;;  %v18434_v22 = vpack.c.bf16 %v21121_v29, %v21120_v21  ;;  %v15489_v29 = vld [vmem:[%s21091_s4 + $0xf8] sm:$0xff] }
 0x4d0   :  { %18426 = vmatpush3.bf16.msra.mxu0 %v18425_v36  ;;  %18444 = vmatpush3.bf16.msra.mxu1 %v18413_v32  ;;  %v4778_v36 = vsub.f32 %v4706_v39, %v4777_v7  ;;  %v18473_v39 = vpack.c.bf16 %v4811_v28, %v4804_v1  ;;  %v15488_v28 = vld [vmem:[%s21091_s4 + $0xf0] sm:$0xff] }
 0x4d1   :  { %18433 = vmatprep.subr.bf16.mxu0 %v21106_v3  ;;  %18451 = vmatprep.subr.bf16.mxu1 %v21106_v3  ;;  %v5241_v10 = vand.u32 4294901760, %v15488_v28 }
 0x4d2   :  { %v4779_v32 = vand.u32 4294901760, %v4778_v36 }
 0x4d3   :  { %16910 = vmatmul.mubr.f32.vlgmr.msra.gmra.mrb[12].mxu0 %v4290_v15  ;;  %16943 = vmatmul.mubr.f32.vlgmr.msra.gmra.mrb[8].mxu1 %v4289_v13  ;;  %v21125_v15 = vand.u32 4294901760, %v20010_v46  ;;  %v18461_v46 = vpack.c.bf16 %v20040_v19, %v20035_v38  ;;  %v20139_v21 = vsub.f32 %v15488_v28, %v5241_v10 }
 0x4d4   :  { %18435 = vmatpush3.bf16.msra.mxu0 %v18434_v22  ;;  %18453 = vmatpush3.bf16.msra.mxu1 %v18452_v35  ;;  %v4780_v40 = vsub.f32 %v4778_v36, %v4779_v32  ;;  %v15490_v22 = vld [vmem:[%s21091_s4 + $0x100] sm:$0xff]  ;;  %v5244_v35 = vand.u32 4294901760, %v15489_v29 }
 0x4d5   :  { %18436 = vmatprep.subr.bf16.mxu0 %v21106_v3  ;;  %18454 = vmatprep.subr.bf16.mxu1 %v21106_v3  ;;  %v5247_v6 = vand.u32 4294901760, %v15490_v22 }
 0x4d6   :  { %16931 = vmatprep.mubr.msk.f32.mxu0 %vm19419_vm0, %v21119_v51  ;;  %16964 = vmatprep.mubr.msk.f32.mxu1 %vm19419_vm0, %v21119_v51  ;;  %v4781_v44 = vand.u32 4294901760, %v4780_v40 }
 0x4d7   :  { %v20155_v8 = vsub.f32 %v15490_v22, %v5247_v6 }
 0x4d8   :  { %18438 = vmatpush3.bf16.msra.mxu0 %v19988_v17  ;;  %18456 = vmatpush3.bf16.msra.mxu1 %v18455_v49  ;;  %v18449_v17 = vpack.c.bf16 %v21125_v15, %v21124_v14  ;;  %v20151_v49 = vpack.c.bf16 %v5247_v6, %v5244_v35 }
 0x4d9   :  { %18445 = vmatprep.subr.bf16.mxu0 %v21106_v3  ;;  %18463 = vmatprep.subr.bf16.mxu1 %v21106_v3 }
 0x4db   :  { %16932 = vmatmul.mubr.f32.vlgmr.msra.gmra.mrb[14].mxu0 %v4289_v13  ;;  %16965 = vmatmul.mubr.f32.vlgmr.msra.gmra.mrb[10].mxu1 %v4777_v7  ;;  %v21126_v13 = vand.u32 4294901760, %v20015_v63  ;;  %v15487_v63 = vld [vmem:[%s21091_s4 + $0xe8] sm:$0xff] }
 0x4dc   :  { %18447 = vmatpush3.bf16.msra.mxu0 %v18446_v30  ;;  %18465 = vmatpush3.bf16.msra.mxu1 %v18446_v30  ;;  %v5238_v1 = vand.u32 4294901760, %v15487_v63 }
 0x4dd   :  { %18448 = vmatprep.subr.bf16.mxu0 %v21106_v3  ;;  %18466 = vmatprep.subr.bf16.mxu1 %v21106_v3  ;;  %v18470_v16 = vpack.c.bf16 %v21127_v2, %v21126_v13 }
 0x4de   :  { %16953 = vmatprep.mubr.msk.f32.mxu0 %vm19419_vm0, %v21119_v51  ;;  %16986 = vmatprep.mubr.msk.f32.mxu1 %vm19419_vm0, %v21119_v51  ;;  %v20135_v38 = vpack.c.bf16 %v5241_v10, %v5238_v1  ;;  %v20137_v19 = vsub.f32 %v15487_v63, %v5238_v1 }
 0x4e0   :  { %18450 = vmatpush3.bf16.msra.mxu0 %v18449_v17  ;;  %18468 = vmatpush3.bf16.msra.mxu1 %v18449_v17  ;;  %v5319_v26 = vand.u32 4294901760, %v20137_v19 }
 0x4e1   :  { %18457 = vmatprep.subr.bf16.mxu0 %v21106_v3  ;;  %18475 = vmatprep.subr.bf16.mxu1 %v21106_v3 }
 0x4e2   :  { %v5320_v23 = vsub.f32 %v20137_v19, %v5319_v26 }
 0x4e3   :  { %16954 = vmatmul.mubr.f32.vlgmr.msra.gmra.mrb[16].mxu0 %v4781_v44  ;;  %16987 = vmatmul.mubr.f32.vlgmr.msra.gmra.mrb[12].mxu1 %v4779_v32 }
 0x4e4   :  { %18459 = vmatpush3.bf16.msra.mxu0 %v18458_v20  ;;  %18477 = vmatpush3.bf16.msra.mxu1 %v18446_v30  ;;  %v5321_v32 = vand.u32 4294901760, %v5320_v23 }
 0x4e5   :  { %18460 = vmatprep.subr.bf16.mxu0 %v21106_v3  ;;  %18478 = vmatprep.subr.bf16.mxu1 %v21106_v3 }
 0x4e6   :  { %16975 = vmatprep.mubr.msk.f32.mxu0 %vm19419_vm0, %v21119_v51  ;;  %17008 = vmatprep.mubr.msk.f32.mxu1 %vm19419_vm0, %v21119_v51 }
 0x4e8   :  { %18462 = vmatpush3.bf16.msra.mxu0 %v18461_v46  ;;  %18480 = vmatpush3.bf16.msra.mxu1 %v18449_v17  ;;  %v5340_v17 = vand.u32 4294901760, %v20155_v8 }
 0x4e9   :  { %18469 = vmatprep.subr.bf16.mxu0 %v21106_v3  ;;  %18517 = vmatprep.subr.bf16.mxu1 %v21106_v3 }
 0x4ea   :  { %v5341_v44 = vsub.f32 %v20155_v8, %v5340_v17 }
 0x4eb   :  { %16976 = vmatmul.mubr.f32.vlgmr.msra.gmra.mrb[18].mxu0 %v4778_v36  ;;  %17009 = vmatmul.mubr.f32.vlgmr.msra.gmra.mrb[14].mxu1 %v4777_v7  ;;  %v20153_v36 = vsub.f32 %v15489_v29, %v5244_v35 }
 0x4ec   :  { %18471 = vmatpush3.bf16.msra.mxu0 %v18470_v16  ;;  %16997 = vmatprep.mubr.msk.f32.mxu0 %vm19419_vm0, %v21119_v51  ;;  %v5342_v13 = vand.u32 4294901760, %v5341_v44  ;;  %v18494_v16 = vpack.c.bf16 %v20139_v21, %v20137_v19 }
 0x4ed   :  { %18472 = vmatprep.subr.bf16.mxu0 %v21106_v3  ;;  %17085 = vmatprep.mubr.msk.f32.mxu1 %vm19419_vm0, %v21119_v51  ;;  %v5333_v15 = vand.u32 4294901760, %v20153_v36 }
 0x4ef   :  { %v5334_v20 = vsub.f32 %v20153_v36, %v5333_v15  ;;  %v20171_v28 = vpack.c.bf16 %v5340_v17, %v5333_v15 }
 0x4f0   :  { %18474 = vmatpush3.bf16.msra.mxu0 %v18473_v39  ;;  %v18497_v39 = vpack.c.bf16 %v20155_v8, %v20153_v36 }
 0x4f1   :  { %18481 = vmatprep.subr.bf16.mxu0 %v21106_v3  ;;  %v5335_v46 = vand.u32 4294901760, %v5334_v20 }
 0x4f3   :  { %16998 = vmatmul.mubr.f32.vlgmr.msra.gmra.mrb[20].mxu0 %v4777_v7  ;;  %v5326_v7 = vand.u32 4294901760, %v20139_v21  ;;  %v18491_v2 = vpack.c.bf16 %v5342_v13, %v5335_v46 }
 0x4f4   :  { %17019 = vmatprep.mubr.msk.f32.mxu0 %vm19419_vm0, %v21119_v51  ;;  %18483 = vmatpush3.bf16.msra.mxu0 %v20135_v38 }
 0x4f5   :  { %18484 = vmatprep.subr.bf16.mxu0 %v21106_v3  ;;  %v5327_v30 = vsub.f32 %v20139_v21, %v5326_v7  ;;  %v20169_v63 = vpack.c.bf16 %v5326_v7, %v5319_v26 }
 0x4f7   :  { %v5328_v14 = vand.u32 4294901760, %v5327_v30 }
 0x4f8   :  { %18486 = vmatpush3.bf16.msra.mxu0 %v20151_v49 }
 0x4f9   :  { %18487 = vmatprep.subr.bf16.mxu0 %v21106_v3  ;;  %v18488_v40 = vpack.c.bf16 %v5328_v14, %v5321_v32 }
 0x596   :  { %v4386_v1 = vpop.f32.mrb[4].mxu1 }
 0x597   :  { %v16900_v10 = vpop.f32.mrb[5].mxu1 }
 0x59e   :  { %v4543_v29 = vpop.f32.mrb[6].mxu1  ;;  %v4295_v22 = vpop.f32.mrb[10].mxu0 }
 0x59f   :  { %v4387_v35 = vadd.f32 %v4386_v1, %v4295_v22  ;;  %v16922_v6 = vpop.f32.mrb[7].mxu1  ;;  %v16889_v23 = vpop.f32.mrb[11].mxu0 }
 0x5a6   :  { %v4466_v30 = vpop.f32.mrb[12].mxu0  ;;  %v4701_v32 = vpop.f32.mrb[8].mxu1 }
 0x5a7   :  { %v4467_v14 = vadd.f32 %v4466_v30, %v4387_v35  ;;  %v16911_v20 = vpop.f32.mrb[13].mxu0  ;;  %v16944_v44 = vpop.f32.mrb[9].mxu1 }
 0x5a9   :  { %v4544_v19 = vadd.f32 %v4543_v29, %v4467_v14  ;;  %v20174_v29 = vsub.s32 4, %v19634_v47  ;;  %v21128_v47 = vmov 0.0|0.0  }
 0x5ae   :  { %v4626_v21 = vpop.f32.mrb[14].mxu0  ;;  %v4874_v46 = vpop.f32.mrb[10].mxu1 }
 0x5af   :  { %v4627_v36 = vadd.f32 %v4626_v21, %v4544_v19  ;;  %v16933_v26 = vpop.f32.mrb[15].mxu0  ;;  %v16966_v7 = vpop.f32.mrb[11].mxu1 }
 0x5b1   :  { %v4702_v8 = vadd.f32 %v4701_v32, %v4627_v36  ;;  %v19391_v32 = vld [vmem:[%s21092_s5] sm:$0xff] }
 0x5b2   :  { %v5196_v44 = vrot.slane %v19391_v32, %v20174_v29 }
 0x5b6   :  { %v4783_v15 = vpop.f32.mrb[16].mxu0  ;;  %v5031_v17 = vpop.f32.mrb[12].mxu1 }
 0x5b7   :  { %v4784_v13 = vadd.f32 %v4783_v15, %v4702_v8  ;;  %v16955_v10 = vpop.f32.mrb[17].mxu0  ;;  %v16988_v3 = vpop.f32.mrb[13].mxu1 }
 0x5b9   :  { %v4875_v1 = vadd.f32 %v4874_v46, %v4784_v13 }
 0x5be   :  { %v4954_v22 = vpop.f32.mrb[18].mxu0  ;;  %v5189_v6 = vpop.f32.mrb[14].mxu1 }
 0x5bf   :  { %v4955_v23 = vadd.f32 %v4954_v22, %v4875_v1  ;;  %v16977_v41 = vpop.f32.mrb[19].mxu0  ;;  %v17010_v35 = vpop.f32.mrb[15].mxu1  ;;  %v15493_v1 = vld [vmem:[%s21091_s4 + $0x118] sm:$0xff]  ;;  %v15494_v22 = vld [vmem:[%s21091_s4 + $0x120] sm:$0xff] }
 0x5c1   :  { %v5032_v30 = vadd.f32 %v5031_v17, %v4955_v23  ;;  %v5740_v23 = vand.u32 4294901760, %v15494_v22 }
 0x5c3   :  { %v5832_v32 = vsub.f32 %v15494_v22, %v5740_v23 }
 0x5c6   :  { %v5114_v14 = vpop.f32.mrb[20].mxu0 }
 0x5c7   :  { %v5115_v20 = vadd.f32 %v5114_v14, %v5032_v30  ;;  %v16999_v19 = vpop.f32.mrb[21].mxu0 }
 0x5c9   :  { %v5190_v3 = vadd.f32 %v5189_v6, %v5115_v20  ;;  %v5737_v6 = vand.u32 4294901760, %v15493_v1 }
 0x5cb   :  { %v5197_v21 = vadd.f32 %v5196_v44, %v5190_v3  ;;  %v20246_v14 = vpack.c.bf16 %v5740_v23, %v5737_v6  ;;  %v5825_v20 = vsub.f32 %v15493_v1, %v5737_v6 }
 0x5cd   :  { %v5235_v46 = vsel %vm29_vm1, %v5197_v21, 0 }
 0x5ce   :  { %v5306_v36 = vand.u32 4294901760, %v5235_v46 }
 0x5d0   :  { %v5307_v41 = vsub.f32 %v5235_v46, %v5306_v36  ;;  %v5833_v46 = vand.u32 4294901760, %v5832_v32 }
 0x5d2   :  { %v5308_v26 = vand.u32 4294901760, %v5307_v41 }
 0x5d4   :  { %v5309_v7 = vsub.f32 %v5307_v41, %v5308_v26 }
 0x5d6   :  { %v5310_v8 = vand.u32 4294901760, %v5309_v7 }
 0x5d8   :  { %17020 = vmatmul.mubr.f32.vlgmr.msra.gmra.mrb[22].mxu0 %v5310_v8 }
 0x5d9   :  { %18489 = vmatpush3.bf16.msra.mxu0 %v18488_v40  ;;  %17030 = vmatprep.mubr.msk.f32.mxu0 %vm19419_vm0, %v21119_v51  ;;  %v6216_v40 = vand.u32 4294901760, %v5197_v21 }
 0x5da   :  { %18490 = vmatprep.subr.bf16.mxu0 %v21128_v47 }
 0x5dd   :  { %18492 = vmatpush3.bf16.msra.mxu0 %v18491_v2  ;;  %v6323_v2 = vsub.f32 %v5197_v21, %v6216_v40  ;;  %v5826_v21 = vand.u32 4294901760, %v5825_v20 }
 0x5de   :  { %18493 = vmatprep.subr.bf16.mxu0 %v21128_v47 }
 0x5e0   :  { %17031 = vmatmul.mubr.f32.vlgmr.msra.gmra.mrb[22].mxu0 %v5306_v36 }
 0x5e1   :  { %18495 = vmatpush3.bf16.msra.mxu0 %v18494_v16  ;;  %17041 = vmatprep.mubr.msk.f32.mxu0 %vm19419_vm0, %v21119_v51  ;;  %v6324_v16 = vand.u32 4294901760, %v6323_v2 }
 0x5e2   :  { %18496 = vmatprep.subr.bf16.mxu0 %v21128_v47 }
 0x5e5   :  { %18498 = vmatpush3.bf16.msra.mxu0 %v18497_v39  ;;  %v6325_v39 = vsub.f32 %v6323_v2, %v6324_v16 }
 0x5e6   :  { %18499 = vmatprep.subr.bf16.mxu0 %v21128_v47 }
 0x5e8   :  { %17042 = vmatmul.mubr.f32.vlgmr.msra.gmra.mrb[22].mxu0 %v5307_v41  ;;  %v5827_v41 = vsub.f32 %v5825_v20, %v5826_v21 }
 0x5e9   :  { %18501 = vmatpush3.bf16.msra.mxu0 %v20135_v38  ;;  %17052 = vmatprep.mubr.msk.f32.mxu0 %vm19419_vm0, %v21119_v51 }
 0x5ea   :  { %18502 = vmatprep.subr.bf16.mxu0 %v21128_v47  ;;  %v5828_v8 = vand.u32 4294901760, %v5827_v41 }
 0x5ed   :  { %18504 = vmatpush3.bf16.msra.mxu0 %v20151_v49 }
 0x5ee   :  { %18505 = vmatprep.subr.bf16.mxu0 %v21128_v47 }
 0x5f0   :  { %17053 = vmatmul.mubr.f32.vlgmr.msra.gmra.mrb[22].mxu0 %v5308_v26  ;;  %v5834_v26 = vsub.f32 %v5832_v32, %v5833_v46 }
 0x5f1   :  { %18507 = vmatpush3.bf16.msra.mxu0 %v20169_v63  ;;  %17063 = vmatprep.mubr.msk.f32.mxu0 %vm19419_vm0, %v21119_v51  ;;  %v6326_v63 = vand.u32 4294901760, %v6325_v39  ;;  %v18533_v39 = vpack.c.bf16 %v5832_v32, %v5825_v20  ;;  %v15499_v20 = vld [vmem:[%s21091_s4 + $0x148] sm:$0xff]  ;;  %v15500_v32 = vld [vmem:[%s21091_s4 + $0x150] sm:$0xff] }
 0x5f2   :  { %18508 = vmatprep.subr.bf16.mxu0 %v21128_v47 }
 0x5f5   :  { %18510 = vmatpush3.bf16.msra.mxu0 %v20171_v28 }
 0x5f6   :  { %18511 = vmatprep.subr.bf16.mxu0 %v21128_v47 }
 0x5f8   :  { %17064 = vmatmul.mubr.f32.vlgmr.msra.gmra.mrb[22].mxu0 %v5306_v36 }
 0x5f9   :  { %18513 = vmatpush3.bf16.msra.mxu0 %v20135_v38  ;;  %17074 = vmatprep.mubr.msk.f32.mxu0 %vm19419_vm0, %v21119_v51  ;;  %v15491_v38 = vld [vmem:[%s21091_s4 + $0x108] sm:$0xff] }
 0x5fa   :  { %18514 = vmatprep.subr.bf16.mxu0 %v21128_v47  ;;  %v5731_v28 = vand.u32 4294901760, %v15491_v38 }
 0x5fc   :  { %v5811_v13 = vsub.f32 %v15491_v38, %v5731_v28  ;;  %v18545_v38 = vpack.c.bf16 %v5833_v46, %v5826_v21  ;;  %v15501_v21 = vld [vmem:[%s21091_s4 + $0x158] sm:$0xff]  ;;  %v15502_v46 = vld [vmem:[%s21091_s4 + $0x160] sm:$0xff] }
 0x5fd   :  { %18516 = vmatpush3.bf16.msra.mxu0 %v20151_v49  ;;  %v15492_v49 = vld [vmem:[%s21091_s4 + $0x110] sm:$0xff] }
 0x5fe   :  { %17143 = vmatprep.subr.mxu0 %v6216_v40  ;;  %v5734_v15 = vand.u32 4294901760, %v15492_v49  ;;  %v5812_v35 = vand.u32 4294901760, %v5811_v13 }
 0x600   :  { %17075 = vmatmul.mubr.f32.vlgmr.msra.gmra.mrb[22].mxu0 %v5306_v36  ;;  %v20236_v17 = vpack.c.bf16 %v5734_v15, %v5731_v28  ;;  %v5818_v10 = vsub.f32 %v15492_v49, %v5734_v15  ;;  %v5813_v44 = vsub.f32 %v5811_v13, %v5812_v35  ;;  %v20253_v49 = vld [vmem:[%s21092_s5 + $0x8] sm:$0xff] }
 0x601   :  { %17144 = vmatpush3.msra.mxu0 %v6216_v40  ;;  %17145 = vmatprep.mubr.f32.mxu0 %v19571_v5  ;;  %v5233_v28 = vrot.slane %v20253_v49, %v19637_v48 }
 0x602   :  { %17151 = vmatprep.subr.mxu0 %v6326_v63  ;;  %18519 = vmatpush3.bf16.msra.mxu1 %v20236_v17  ;;  %v5819_v30 = vand.u32 4294901760, %v5818_v10  ;;  %v5814_v3 = vand.u32 4294901760, %v5813_v44 }
 0x603   :  { %18520 = vmatprep.subr.bf16.mxu1 %v21128_v47 }
 0x604   :  { %17146 = vmatmul.mubr.f32.vlgmr.msra.gmra.mrb[24].mxu0 %v19577_v9  ;;  %v5820_v19 = vsub.f32 %v5818_v10, %v5819_v30 }
 0x605   :  { %17152 = vmatpush3.msra.mxu0 %v6326_v63  ;;  %17148 = vmatprep.mubr.f32.mxu0 %v19583_v11  ;;  %v18542_v63 = vpack.c.bf16 %v5819_v30, %v5812_v35 }
 0x606   :  { %17159 = vmatprep.subr.mxu0 %v6323_v2  ;;  %18522 = vmatpush3.bf16.msra.mxu1 %v20246_v14  ;;  %v5821_v36 = vand.u32 4294901760, %v5820_v19  ;;  %v6797_v19 = vand.u32 4294901760, %v15499_v20 }
 0x607   :  { %18523 = vmatprep.subr.bf16.mxu1 %v21128_v47 }
 0x608   :  { %17149 = vmatmul.mubr.f32.gmra.mrb[26].mxu0 %v19586_v12  ;;  %v18524_v7 = vpack.c.bf16 %v5821_v36, %v5814_v3  ;;  %v6800_v3 = vand.u32 4294901760, %v15500_v32  ;;  %v20290_v36 = vsub.f32 %v15499_v20, %v6797_v19 }
 0x609   :  { %17153 = vmatprep.mubr.f32.mxu0 %v19515_v45 }
 0x60a   :  { %v20292_v41 = vsub.f32 %v15500_v32, %v6800_v3 }
 0x60c   :  { %17154 = vmatmul.mubr.f32.vlgmr.msra.gmra.mrb[24].mxu0 %v19525_v50 }
 0x60d   :  { %17160 = vmatpush3.msra.mxu0 %v6323_v2  ;;  %17156 = vmatprep.mubr.f32.mxu0 %v19532_v53 }
 0x60e   :  { %17167 = vmatprep.subr.mxu0 %v6216_v40 }
 0x610   :  { %17157 = vmatmul.mubr.f32.gmra.mrb[26].mxu0 %v19540_v57 }
 0x611   :  { %17161 = vmatprep.mubr.f32.mxu0 %v19530_v52 }
 0x614   :  { %17162 = vmatmul.mubr.f32.vlgmr.msra.gmra.mrb[24].mxu0 %v19538_v56 }
 0x615   :  { %17168 = vmatpush3.msra.mxu0 %v6216_v40  ;;  %17164 = vmatprep.mubr.f32.mxu0 %v19546_v59 }
 0x616   :  { %17175 = vmatprep.subr.mxu0 %v6324_v16 }
 0x618   :  { %17165 = vmatmul.mubr.f32.gmra.mrb[26].mxu0 %v19554_v62 }
 0x619   :  { %17169 = vmatprep.mubr.f32.mxu0 %v19543_v58 }
 0x61c   :  { %17170 = vmatmul.mubr.f32.vlgmr.msra.gmra.mrb[24].mxu0 %v19551_v61 }
 0x61d   :  { %17176 = vmatpush3.msra.mxu0 %v6324_v16  ;;  %17172 = vmatprep.mubr.f32.mxu0 %v19562_v0  ;;  %v18530_v16 = vpack.c.bf16 %v5818_v10, %v5811_v13 }
 0x61e   :  { %17183 = vmatprep.subr.mxu0 %v6216_v40 }
 0x620   :  { %17173 = vmatmul.mubr.f32.gmra.mrb[26].mxu0 %v19568_v4 }
 0x621   :  { %17177 = vmatprep.mubr.f32.mxu0 %v19515_v45 }
 0x624   :  { %17178 = vmatmul.mubr.f32.vlgmr.msra.gmra.mrb[24].mxu0 %v19525_v50 }
 0x625   :  { %17184 = vmatpush3.msra.mxu0 %v6216_v40  ;;  %17180 = vmatprep.mubr.f32.mxu0 %v19532_v53  ;;  %v5835_v40 = vand.u32 4294901760, %v5834_v26  ;;  %v6803_v26 = vand.u32 4294901760, %v15501_v21 }
 0x627   :  { %v18527_v2 = vpack.c.bf16 %v5835_v40, %v5828_v8 }
 0x628   :  { %17181 = vmatmul.mubr.f32.gmra.mrb[26].mxu0 %v19540_v57 }
 0x629   :  { %17185 = vmatprep.mubr.f32.mxu0 %v19515_v45 }
 0x62c   :  { %17186 = vmatmul.mubr.f32.vlgmr.msra.gmra.mrb[24].mxu0 %v19525_v50 }
 0x62d   :  { %17188 = vmatprep.mubr.f32.mxu0 %v19532_v53 }
 0x630   :  { %17189 = vmatmul.mubr.f32.gmra.mrb[26].mxu0 %v19540_v57 }
 0x6d3   :  { %v5718_v15 = vpop.f32.mrb[22].mxu0 }
 0x6d4   :  { %v19097_v1 = vadd.f32 %v5718_v15, %v5233_v28  ;;  %v17076_v22 = vpop.f32.mrb[23].mxu0 }
 0x6d6   :  { %v5722_v6 = vmax.f32 %v19097_v1, 0.0  ;;  %v20311_v1 = vpack.c.bf16 %v6800_v3, %v6797_v19 }
 0x6d8   :  { %v5728_v23 = vsel %vm29_vm1, %v5722_v6, 0 }
 0x6d9   :  { %v20258_v44 = vand.u32 4294901760, %v5728_v23 }
 0x6db   :  { %v5800_v13 = vsub.f32 %v5728_v23, %v20258_v44 }
 0x6dd   :  { %v5801_v10 = vand.u32 4294901760, %v5800_v13 }
 0x6df   :  { %v5802_v35 = vsub.f32 %v5800_v13, %v5801_v10 }
 0x6e1   :  { %v5803_v30 = vand.u32 4294901760, %v5802_v35 }
 0x6e3   :  { %17086 = vmatmul.mubr.f32.vlgmr.msra.gmra.mrb[16].mxu1 %v5803_v30 }
 0x6e4   :  { %18525 = vmatpush3.bf16.msra.mxu1 %v18524_v7  ;;  %17096 = vmatprep.mubr.msk.f32.mxu1 %vm19419_vm0, %v21119_v51  ;;  %v6806_v7 = vand.u32 4294901760, %v15502_v46 }
 0x6e5   :  { %18526 = vmatprep.subr.bf16.mxu1 %v21128_v47 }
 0x6e6   :  { %v20328_v32 = vpack.c.bf16 %v6806_v7, %v6803_v26 }
 0x6e8   :  { %18528 = vmatpush3.bf16.msra.mxu1 %v18527_v2  ;;  %v21110_v2 = vand.u32 4294901760, %v20290_v36 }
 0x6e9   :  { %18529 = vmatprep.subr.bf16.mxu1 %v21128_v47 }
 0x6ea   :  { %v6889_v22 = vsub.f32 %v20290_v36, %v21110_v2 }
 0x6eb   :  { %17097 = vmatmul.mubr.f32.vlgmr.msra.gmra.mrb[16].mxu1 %v20258_v44 }
 0x6ec   :  { %18531 = vmatpush3.bf16.msra.mxu1 %v18530_v16  ;;  %17107 = vmatprep.mubr.msk.f32.mxu1 %vm19419_vm0, %v21119_v51  ;;  %v6895_v16 = vand.u32 4294901760, %v20292_v41  ;;  %v6890_v19 = vand.u32 4294901760, %v6889_v22 }
 0x6ed   :  { %18532 = vmatprep.subr.bf16.mxu1 %v21128_v47 }
 0x6ee   :  { %v6896_v6 = vsub.f32 %v20292_v41, %v6895_v16 }
 0x6f0   :  { %18534 = vmatpush3.bf16.msra.mxu1 %v18533_v39  ;;  %v20302_v39 = vsub.f32 %v15501_v21, %v6803_v26  ;;  %v6897_v21 = vand.u32 4294901760, %v6896_v6 }
 0x6f1   :  { %18535 = vmatprep.subr.bf16.mxu1 %v21128_v47 }
 0x6f3   :  { %17108 = vmatmul.mubr.f32.vlgmr.msra.gmra.mrb[16].mxu1 %v5800_v13 }
 0x6f4   :  { %18537 = vmatpush3.bf16.msra.mxu1 %v20236_v17  ;;  %17118 = vmatprep.mubr.msk.f32.mxu1 %vm19419_vm0, %v21119_v51 }
 0x6f5   :  { %18538 = vmatprep.subr.bf16.mxu1 %v21128_v47 }
 0x6f8   :  { %18540 = vmatpush3.bf16.msra.mxu1 %v20246_v14 }
 0x6f9   :  { %18541 = vmatprep.subr.bf16.mxu1 %v21128_v47 }
 0x6fb   :  { %17119 = vmatmul.mubr.f32.vlgmr.msra.gmra.mrb[16].mxu1 %v5801_v10 }
 0x6fc   :  { %18543 = vmatpush3.bf16.msra.mxu1 %v18542_v63  ;;  %17129 = vmatprep.mubr.msk.f32.mxu1 %vm19419_vm0, %v21119_v51  ;;  %v20304_v63 = vsub.f32 %v15502_v46, %v6806_v7 }
 0x6fd   :  { %18544 = vmatprep.subr.bf16.mxu1 %v21128_v47 }
 0x6fe   :  { %v6909_v10 = vand.u32 4294901760, %v20304_v63 }
 0x6ff   :  { %v20295_v8 = vpop.f32.mrb[24].mxu0 }
 0x700   :  { %18546 = vmatpush3.bf16.msra.mxu1 %v18545_v38  ;;  %v20297_v40 = vpop.f32.mrb[25].mxu0 }
 0x701   :  { %18547 = vmatprep.subr.bf16.mxu1 %v21128_v47 }
 0x703   :  { %17130 = vmatmul.mubr.f32.vlgmr.msra.gmra.mrb[16].mxu1 %v20258_v44  ;;  %v17190_v28 = vpop.f32.mrb[26].mxu0 }
 0x704   :  { %18549 = vmatpush3.bf16.msra.mxu1 %v20236_v17  ;;  %v6794_v15 = vsel %vm29_vm1, %v17190_v28, 0  ;;  %v6780_v38 = vpop.f32.mrb[27].mxu0  ;;  %17140 = vmatprep.mubr.msk.f32.mxu1 %vm19419_vm0, %v21119_v51  ;;  %v6902_v17 = vand.u32 4294901760, %v20302_v39  ;;  %v6910_v28 = vsub.f32 %v20304_v63, %v6909_v10 }
 0x705   :  { %v20317_v23 = vand.u32 4294901760, %v6794_v15  ;;  %v6791_v13 = vsel %vm29_vm1, %v6780_v38, 0  ;;  %18550 = vmatprep.subr.bf16.mxu1 %v21128_v47 }
 0x706   :  { %v20323_v35 = vand.u32 4294901760, %v6791_v13  ;;  %v6903_v46 = vsub.f32 %v20302_v39, %v6902_v17  ;;  %v6911_v7 = vand.u32 4294901760, %v6910_v28 }
 0x707   :  { %v6876_v30 = vsub.f32 %v6794_v15, %v20317_v23 }
 0x708   :  { %v6866_v20 = vsub.f32 %v6791_v13, %v20323_v35  ;;  %18552 = vmatpush3.bf16.msra.mxu1 %v20246_v14  ;;  %v18561_v14 = vpack.c.bf16 %v6897_v21, %v6890_v19  ;;  %v6904_v26 = vand.u32 4294901760, %v6903_v46  ;;  %v18573_v19 = vpack.c.bf16 %v20304_v63, %v20302_v39  ;;  %v15495_v39 = vld [vmem:[%s21091_s4 + $0x128] sm:$0xff]  ;;  %v15496_v63 = vld [vmem:[%s21091_s4 + $0x130] sm:$0xff] }
 0x709   :  { %v6877_v3 = vand.u32 4294901760, %v6876_v30  ;;  %18554 = vmatprep.subr.bf16.mxu1 %v20311_v1  ;;  %v18589_v21 = vpack.c.bf16 %v6909_v10, %v6902_v17  ;;  %v7334_v46 = vand.u32 4294901760, %v15496_v63 }
 0x70a   :  { %v6867_v38 = vand.u32 4294901760, %v6866_v20  ;;  %v18565_v2 = vpack.c.bf16 %v6911_v7, %v6904_v26 }
 0x70b   :  { %17141 = vmatmul.mubr.f32.vlgmr.msra.gmra.mrb[16].mxu1 %v20258_v44  ;;  %v6878_v13 = vsub.f32 %v6876_v30, %v6877_v3  ;;  %v18569_v44 = vpack.c.bf16 %v20292_v41, %v20290_v36  ;;  %v21129_v41 = vand.u32 4294901760, %v20290_v36  ;;  %v15497_v36 = vld [vmem:[%s21091_s4 + $0x138] sm:$0xff]  ;;  %v7428_v10 = vsub.f32 %v15496_v63, %v7334_v46 }
 0x70c   :  { %18556 = vmatpush3.bf16.msra.mxu1 %v20311_v1  ;;  %v6868_v15 = vsub.f32 %v6866_v20, %v6867_v38 }
 0x70d   :  { %18558 = vmatprep.subr.bf16.mxu1 %v20328_v32  ;;  %v6879_v6 = vand.u32 4294901760, %v6878_v13 }
 0x70e   :  { %v6869_v22 = vand.u32 4294901760, %v6868_v15  ;;  %v7328_v15 = vsel %vm29_vm1, %v20295_v8, 0 }
 0x70f   :  { %v20372_v26 = vand.u32 4294901760, %v7328_v15 }
 0x710   :  { %18560 = vmatpush3.bf16.msra.mxu1 %v20328_v32  ;;  %17199 = vmatprep.mubr.f32.mxu1 %v6869_v22 }
 0x711   :  { %18562 = vmatprep.subr.bf16.mxu1 %v18561_v14 }
 0x713   :  { %17200 = vmatmul.mubr.f32.vlgmr.msra.gmra.mrb[18].mxu1 %v6879_v6 }
 0x714   :  { %18564 = vmatpush3.bf16.msra.mxu1 %v18561_v14  ;;  %17210 = vmatprep.mubr.f32.mxu1 %v20323_v35 }
 0x715   :  { %18566 = vmatprep.subr.bf16.mxu1 %v18565_v2 }
 0x718   :  { %18568 = vmatpush3.bf16.msra.mxu1 %v18565_v2  ;;  %v18585_v2 = vpack.c.bf16 %v6895_v16, %v21129_v41  ;;  %v15498_v16 = vld [vmem:[%s21091_s4 + $0x140] sm:$0xff] }
 0x719   :  { %18570 = vmatprep.subr.bf16.mxu1 %v18569_v44  ;;  %v7340_v17 = vand.u32 4294901760, %v15498_v16 }
 0x71b   :  { %17211 = vmatmul.mubr.f32.vlgmr.msra.gmra.mrb[18].mxu1 %v20317_v23  ;;  %v7442_v22 = vsub.f32 %v15498_v16, %v7340_v17 }
 0x71c   :  { %18572 = vmatpush3.bf16.msra.mxu1 %v18569_v44  ;;  %17221 = vmatprep.mubr.f32.mxu1 %v6866_v20  ;;  %v7325_v20 = vsel %vm29_vm1, %v20297_v40, 0 }
 0x71d   :  { %18574 = vmatprep.subr.bf16.mxu1 %v18573_v19  ;;  %v20357_v28 = vand.u32 4294901760, %v7325_v20 }
 0x71f   :  { %v7400_v13 = vsub.f32 %v7325_v20, %v20357_v28 }
 0x720   :  { %18576 = vmatpush3.bf16.msra.mxu1 %v18573_v19  ;;  %v7410_v19 = vsub.f32 %v7328_v15, %v20372_v26 }
 0x721   :  { %18578 = vmatprep.subr.bf16.mxu1 %v20311_v1  ;;  %v7401_v6 = vand.u32 4294901760, %v7400_v13 }
 0x723   :  { %17222 = vmatmul.mubr.f32.vlgmr.msra.gmra.mrb[18].mxu1 %v6876_v30  ;;  %v7331_v30 = vand.u32 4294901760, %v15495_v39  ;;  %v7402_v63 = vsub.f32 %v7400_v13, %v7401_v6 }
 0x724   :  { %18580 = vmatpush3.bf16.msra.mxu1 %v20311_v1  ;;  %17232 = vmatprep.mubr.f32.mxu1 %v6867_v38  ;;  %v7337_v38 = vand.u32 4294901760, %v15497_v36 }
 0x725   :  { %18582 = vmatprep.subr.bf16.mxu1 %v20328_v32  ;;  %v20366_v40 = vsub.f32 %v15495_v39, %v7331_v30  ;;  %v18601_v8 = vpack.c.bf16 %v7334_v46, %v7331_v30  ;;  %v7443_v39 = vand.u32 4294901760, %v7442_v22  ;;  %v7403_v30 = vand.u32 4294901760, %v7402_v63 }
 0x726   :  { %v7435_v7 = vsub.f32 %v15497_v36, %v7337_v38  ;;  %v18605_v20 = vpack.c.bf16 %v7340_v17, %v7337_v38  ;;  %v7411_v36 = vand.u32 4294901760, %v7410_v19 }
 0x727   :  { %v7422_v14 = vand.u32 4294901760, %v20366_v40  ;;  %v18617_v38 = vpack.c.bf16 %v7428_v10, %v20366_v40 }
 0x728   :  { %18584 = vmatpush3.bf16.msra.mxu1 %v20328_v32  ;;  %v7412_v46 = vsub.f32 %v7410_v19, %v7411_v36 }
 0x729   :  { %18586 = vmatprep.subr.bf16.mxu1 %v18585_v2  ;;  %v7423_v44 = vsub.f32 %v20366_v40, %v7422_v14 }
 0x72a   :  { %v7413_v0 = vand.u32 4294901760, %v7412_v46 }
 0x72b   :  { %17233 = vmatmul.mubr.f32.vlgmr.msra.gmra.mrb[18].mxu1 %v6877_v3  ;;  %v7429_v3 = vand.u32 4294901760, %v7428_v10 }
 0x72c   :  { %18588 = vmatpush3.bf16.msra.mxu1 %v18585_v2  ;;  %17243 = vmatprep.mubr.f32.mxu1 %v20323_v35  ;;  %v7436_v2 = vand.u32 4294901760, %v7435_v7 }
 0x72d   :  { %18590 = vmatprep.subr.bf16.mxu1 %v18589_v21  ;;  %v7430_v41 = vsub.f32 %v7428_v10, %v7429_v3 }
 0x72e   :  { %v7437_v16 = vsub.f32 %v7435_v7, %v7436_v2 }
 0x730   :  { %18592 = vmatpush3.bf16.msra.mxu1 %v18589_v21  ;;  %v7424_v21 = vand.u32 4294901760, %v7423_v44  ;;  %v7438_v48 = vand.u32 4294901760, %v7437_v16 }
 0x731   :  { %18594 = vmatprep.subr.bf16.mxu1 %v20311_v1 }
 0x733   :  { %17244 = vmatmul.mubr.f32.vlgmr.msra.gmra.mrb[18].mxu1 %v20317_v23 }
 0x734   :  { %18596 = vmatpush3.bf16.msra.mxu1 %v20311_v1  ;;  %17254 = vmatprep.mubr.f32.mxu1 %v20323_v35  ;;  %v7431_v1 = vand.u32 4294901760, %v7430_v41  ;;  %v7444_v35 = vsub.f32 %v7442_v22, %v7443_v39  ;;  %v15506_v41 = vld [vmem:[%s21091_s4 + $0x180] sm:$0xff] }
 0x735   :  { %18598 = vmatprep.subr.bf16.mxu1 %v20328_v32 }
 0x736   :  { %v18609_v15 = vpack.c.bf16 %v7431_v1, %v7424_v21  ;;  %v7445_v4 = vand.u32 4294901760, %v7444_v35 }
 0x738   :  { %18600 = vmatpush3.bf16.msra.mxu1 %v20328_v32  ;;  %v18613_v32 = vpack.c.bf16 %v7445_v4, %v7438_v48  ;;  %v15503_v4 = vld [vmem:[%s21091_s4 + $0x168] sm:$0xff]  ;;  %v18637_v48 = vpack.c.bf16 %v7443_v39, %v7436_v2  ;;  %v8374_v39 = vand.u32 4294901760, %v15506_v41 }
 0x739   :  { %18602 = vmatprep.subr.bf16.mxu1 %v18601_v8  ;;  %v7859_v40 = vand.u32 4294901760, %v15503_v4  ;;  %v15507_v2 = vld [vmem:[%s21091_s4 + $0x188] sm:$0xff] }
 0x73a   :  { %v8377_v63 = vand.u32 4294901760, %v15507_v2  ;;  %v8472_v35 = vsub.f32 %v15506_v41, %v8374_v39 }
 0x73b   :  { %17255 = vmatmul.mubr.f32.vlgmr.msra.gmra.mrb[18].mxu1 %v20317_v23  ;;  %v18621_v23 = vpack.c.bf16 %v7442_v22, %v7435_v7  ;;  %v7946_v17 = vsub.f32 %v15503_v4, %v7859_v40  ;;  %v15505_v7 = vld [vmem:[%s21091_s4 + $0x178] sm:$0xff] }
 0x73c   :  { %18604 = vmatpush3.bf16.msra.mxu1 %v18601_v8  ;;  %17265 = vmatprep.mubr.f32.mxu1 %v7403_v30  ;;  %v8479_v30 = vsub.f32 %v15507_v2, %v8377_v63 }
 0x73d   :  { %18606 = vmatprep.subr.bf16.mxu1 %v18605_v20  ;;  %v7947_v10 = vand.u32 4294901760, %v7946_v17 }
 0x740   :  { %18608 = vmatpush3.bf16.msra.mxu1 %v18605_v20 }
 0x741   :  { %18610 = vmatprep.subr.bf16.mxu1 %v18609_v15 }
 0x743   :  { %17266 = vmatmul.mubr.f32.vlgmr.msra.gmra.mrb[18].mxu1 %v7413_v0  ;;  %v18633_v0 = vpack.c.bf16 %v7429_v3, %v7422_v14  ;;  %v15504_v3 = vld [vmem:[%s21091_s4 + $0x170] sm:$0xff] }
 0x744   :  { %18612 = vmatpush3.bf16.msra.mxu1 %v18609_v15  ;;  %17276 = vmatprep.mubr.f32.mxu1 %v20357_v28  ;;  %v8368_v22 = vand.u32 4294901760, %v15504_v3 }
 0x745   :  { %18614 = vmatprep.subr.bf16.mxu1 %v18613_v32 }
 0x746   :  { %v8458_v44 = vsub.f32 %v15504_v3, %v8368_v22  ;;  %v8352_v3 = vrot.slane %v20253_v49, %v19873_v31 }
 0x748   :  { %18616 = vmatpush3.bf16.msra.mxu1 %v18613_v32  ;;  %v8473_v32 = vand.u32 4294901760, %v8472_v35 }
 0x749   :  { %18618 = vmatprep.subr.bf16.mxu1 %v18617_v38 }
 0x74b   :  { %17277 = vmatmul.mubr.f32.vlgmr.msra.gmra.mrb[18].mxu1 %v20372_v26 }
 0x74c   :  { %18620 = vmatpush3.bf16.msra.mxu1 %v18617_v38  ;;  %17287 = vmatprep.mubr.f32.mxu1 %v7400_v13  ;;  %v7948_v13 = vsub.f32 %v7946_v17, %v7947_v10  ;;  %v8480_v38 = vand.u32 4294901760, %v8479_v30 }
 0x74d   :  { %18622 = vmatprep.subr.bf16.mxu1 %v18621_v23 }
 0x74e   :  { %v7949_v14 = vand.u32 4294901760, %v7948_v13  ;;  %v8481_v4 = vsub.f32 %v8479_v30, %v8480_v38  ;;  %v18669_v13 = vpack.c.bf16 %v8479_v30, %v8472_v35 }
 0x750   :  { %18624 = vmatpush3.bf16.msra.mxu1 %v18621_v23 }
 0x751   :  { %18626 = vmatprep.subr.bf16.mxu1 %v18601_v8 }
 0x753   :  { %17288 = vmatmul.mubr.f32.vlgmr.msra.gmra.mrb[18].mxu1 %v7410_v19 }
 0x754   :  { %18628 = vmatpush3.bf16.msra.mxu1 %v18601_v8  ;;  %17298 = vmatprep.mubr.f32.mxu1 %v7401_v6  ;;  %v8371_v6 = vand.u32 4294901760, %v15505_v7 }
 0x755   :  { %18630 = vmatprep.subr.bf16.mxu1 %v18605_v20 }
 0x756   :  { %v8465_v19 = vsub.f32 %v15505_v7, %v8371_v6 }
 0x758   :  { %18632 = vmatpush3.bf16.msra.mxu1 %v18605_v20  ;;  %v8466_v21 = vand.u32 4294901760, %v8465_v19 }
 0x759   :  { %18634 = vmatprep.subr.bf16.mxu1 %v18633_v0 }
 0x75a   :  { %v8467_v16 = vsub.f32 %v8465_v19, %v8466_v21 }
 0x75b   :  { %17299 = vmatmul.mubr.f32.vlgmr.msra.gmra.mrb[18].mxu1 %v7411_v36  ;;  %v20426_v36 = vpack.c.bf16 %v8377_v63, %v8374_v39 }
 0x75c   :  { %18636 = vmatpush3.bf16.msra.mxu1 %v18633_v0  ;;  %17309 = vmatprep.mubr.f32.mxu1 %v20357_v28  ;;  %v8468_v15 = vand.u32 4294901760, %v8467_v16  ;;  %v8474_v0 = vsub.f32 %v8472_v35, %v8473_v32 }
 0x75d   :  { %18638 = vmatprep.subr.bf16.mxu1 %v18637_v48 }
 0x760   :  { %18640 = vmatpush3.bf16.msra.mxu1 %v18637_v48  ;;  %v8475_v48 = vand.u32 4294901760, %v8474_v0 }
 0x761   :  { %18642 = vmatprep.subr.bf16.mxu1 %v18601_v8 }
 0x763   :  { %17310 = vmatmul.mubr.f32.vlgmr.msra.gmra.mrb[18].mxu1 %v20372_v26 }
 0x764   :  { %18644 = vmatpush3.bf16.msra.mxu1 %v18601_v8  ;;  %17320 = vmatprep.mubr.f32.mxu1 %v20357_v28  ;;  %v20416_v8 = vpack.c.bf16 %v8371_v6, %v8368_v22 }
 0x765   :  { %18646 = vmatprep.subr.bf16.mxu1 %v18605_v20 }
 0x766   :  { %18650 = vmatprep.subr.bf16.mxu0 %v20416_v8 }
 0x767   :  { %18652 = vmatpush3.bf16.msra.mxu0 %v20416_v8 }
 0x768   :  { %18648 = vmatpush3.bf16.msra.mxu1 %v18605_v20  ;;  %v8459_v20 = vand.u32 4294901760, %v8458_v44  ;;  %18654 = vmatprep.subr.bf16.mxu0 %v20426_v36 }
 0x769   :  { %17323 = vmatprep.subr.mxu1 %v7859_v40 }
 0x76a   :  { %v8460_v1 = vsub.f32 %v8458_v44, %v8459_v20 }
 0x76b   :  { %17321 = vmatmul.mubr.f32.vlgmr.msra.gmra.mrb[18].mxu1 %v20372_v26  ;;  %18656 = vmatpush3.bf16.msra.mxu0 %v20426_v36 }
 0x76c   :  { %17324 = vmatpush3.msra.mxu1 %v7859_v40  ;;  %17325 = vmatprep.mubr.f32.mxu1 %v19828_v43  ;;  %v8461_v46 = vand.u32 4294901760, %v8460_v1 }
 0x76d   :  { %17328 = vmatprep.subr.mxu1 %v7949_v14 }
 0x76e   :  { %v18657_v23 = vpack.c.bf16 %v8468_v15, %v8461_v46 }
 0x770   :  { %18658 = vmatprep.subr.bf16.mxu0 %v18657_v23 }
 0x773   :  { %17326 = vmatmul.mubr.f32.vlgmr.msra.gmra.mrb[18].mxu1 %v19834_v25 }
 0x774   :  { %17329 = vmatpush3.msra.mxu1 %v7949_v14  ;;  %17330 = vmatprep.mubr.f32.mxu1 %v19799_v24  ;;  %v18681_v14 = vpack.c.bf16 %v8466_v21, %v8459_v20 }
 0x775   :  { %17333 = vmatprep.subr.mxu1 %v7946_v17 }
 0x77b   :  { %17331 = vmatmul.mubr.f32.vlgmr.msra.gmra.mrb[18].mxu1 %v19809_v33 }
 0x77c   :  { %17334 = vmatpush3.msra.mxu1 %v7946_v17  ;;  %17335 = vmatprep.mubr.f32.mxu1 %v19806_v27 }
 0x77d   :  { %17338 = vmatprep.subr.mxu1 %v7859_v40 }
 0x783   :  { %17336 = vmatmul.mubr.f32.vlgmr.msra.gmra.mrb[18].mxu1 %v19817_v37 }
 0x784   :  { %17339 = vmatpush3.msra.mxu1 %v7859_v40  ;;  %17340 = vmatprep.mubr.f32.mxu1 %v19812_v34 }
 0x785   :  { %17343 = vmatprep.subr.mxu1 %v7947_v10 }
 0x78b   :  { %17341 = vmatmul.mubr.f32.vlgmr.msra.gmra.mrb[18].mxu1 %v19825_v42 }
 0x78c   :  { %17344 = vmatpush3.msra.mxu1 %v7947_v10  ;;  %17345 = vmatprep.mubr.f32.mxu1 %v19799_v24  ;;  %v18665_v10 = vpack.c.bf16 %v8465_v19, %v8458_v44 }
 0x78d   :  { %17348 = vmatprep.subr.mxu1 %v7859_v40 }
 0x793   :  { %17346 = vmatmul.mubr.f32.vlgmr.msra.gmra.mrb[18].mxu1 %v19809_v33 }
 0x794   :  { %17349 = vmatpush3.msra.mxu1 %v7859_v40  ;;  %17350 = vmatprep.mubr.f32.mxu1 %v19799_v24  ;;  %v8482_v40 = vand.u32 4294901760, %v8481_v4 }
 0x795   :  { %18727 = vmatprep.subr.bf16.mxu1 %v21128_v47 }
 0x796   :  { %v18661_v17 = vpack.c.bf16 %v8482_v40, %v8475_v48  ;;  %v8360_v40 = vrot.slane %v20253_v49, %v19927_v55 }
 0x79b   :  { %17351 = vmatmul.mubr.f32.vlgmr.msra.gmra.mrb[18].mxu1 %v19809_v33 }
 0x79c   :  { %17491 = vmatprep.mubr.msk.f32.mxu1 %vm19419_vm0, %v21119_v51 }
 0x7de   :  { %v20408_v28 = vpop.f32.mrb[16].mxu1 }
 0x7df   :  { %v17142_v26 = vpop.f32.mrb[17].mxu1 }
 0x7e0   :  { %v18685_v26 = vpack.c.bf16 %v8480_v38, %v8473_v32  ;;  %v15512_v38 = vld [vmem:[%s21091_s4 + $0x1b0] sm:$0xff] }
 0x86e   :  { %v17352_v7 = vpop.f32.mrb[18].mxu1 }
 0x86f   :  { %v8354_v22 = vadd.f32 %v17352_v7, %v8352_v3  ;;  %v8337_v6 = vpop.f32.mrb[19].mxu1 }
 0x870   :  { %v8353_v41 = vadd.f32 %v8352_v3, %v8337_v6 }
 0x871   :  { %v8356_v2 = vmax.f32 %v8354_v22, 0.0 }
 0x872   :  { %v8355_v39 = vmax.f32 %v8353_v41, 0.0 }
 0x873   :  { %v8365_v63 = vsel %vm29_vm1, %v8356_v2, 0 }
 0x874   :  { %v8446_v1 = vand.u32 4294901760, %v8365_v63  ;;  %v8362_v16 = vsel %vm29_vm1, %v8355_v39, 0 }
 0x875   :  { %v8436_v46 = vand.u32 4294901760, %v8362_v16 }
 0x876   :  { %v8447_v15 = vsub.f32 %v8365_v63, %v8446_v1 }
 0x877   :  { %v8437_v44 = vsub.f32 %v8362_v16, %v8436_v46 }
 0x878   :  { %v8448_v19 = vand.u32 4294901760, %v8447_v15 }
 0x879   :  { %v8438_v20 = vand.u32 4294901760, %v8437_v44 }
 0x87a   :  { %v8449_v21 = vsub.f32 %v8447_v15, %v8448_v19 }
 0x87b   :  { %v8439_v35 = vsub.f32 %v8437_v44, %v8438_v20 }
 0x87c   :  { %v8450_v32 = vand.u32 4294901760, %v8449_v21  ;;  %v15515_v21 = vld [vmem:[%s21091_s4 + $0x1c8] sm:$0xff] }
 0x87d   :  { %v8440_v30 = vand.u32 4294901760, %v8439_v35 }
 0x87f   :  { %17361 = vmatprep.mubr.f32.mxu0 %v8440_v30  ;;  %v9367_v30 = vand.u32 4294901760, %v15515_v21 }
 0x880   :  { %17362 = vmatmul.mubr.f32.vlgmr.msra.gmra.mrb[28].mxu0 %v8450_v32 }
 0x881   :  { %18660 = vmatpush3.bf16.msra.mxu0 %v18657_v23  ;;  %17372 = vmatprep.mubr.f32.mxu0 %v8436_v46  ;;  %v15513_v23 = vld [vmem:[%s21091_s4 + $0x1b8] sm:$0xff] }
 0x882   :  { %18662 = vmatprep.subr.bf16.mxu0 %v18661_v17  ;;  %v9361_v0 = vand.u32 4294901760, %v15513_v23 }
 0x884   :  { %v20453_v48 = vsub.f32 %v15513_v23, %v9361_v0 }
 0x885   :  { %18664 = vmatpush3.bf16.msra.mxu0 %v18661_v17 }
 0x886   :  { %18666 = vmatprep.subr.bf16.mxu0 %v18665_v10 }
 0x888   :  { %17373 = vmatmul.mubr.f32.vlgmr.msra.gmra.mrb[28].mxu0 %v8446_v1 }
 0x889   :  { %18668 = vmatpush3.bf16.msra.mxu0 %v18665_v10  ;;  %17383 = vmatprep.mubr.f32.mxu0 %v8437_v44 }
 0x88a   :  { %18670 = vmatprep.subr.bf16.mxu0 %v18669_v13 }
 0x88d   :  { %18672 = vmatpush3.bf16.msra.mxu0 %v18669_v13 }
 0x88e   :  { %18674 = vmatprep.subr.bf16.mxu0 %v20416_v8 }
 0x890   :  { %17384 = vmatmul.mubr.f32.vlgmr.msra.gmra.mrb[28].mxu0 %v8447_v15 }
 0x891   :  { %18676 = vmatpush3.bf16.msra.mxu0 %v20416_v8  ;;  %17394 = vmatprep.mubr.f32.mxu0 %v8438_v20  ;;  %v15514_v20 = vld [vmem:[%s21091_s4 + $0x1c0] sm:$0xff] }
 0x892   :  { %18678 = vmatprep.subr.bf16.mxu0 %v20426_v36  ;;  %v9364_v35 = vand.u32 4294901760, %v15514_v20 }
 0x894   :  { %v9452_v32 = vsub.f32 %v15514_v20, %v9364_v35 }
 0x895   :  { %18680 = vmatpush3.bf16.msra.mxu0 %v20426_v36 }
 0x896   :  { %18682 = vmatprep.subr.bf16.mxu0 %v18681_v14 }
 0x898   :  { %17395 = vmatmul.mubr.f32.vlgmr.msra.gmra.mrb[28].mxu0 %v8448_v19  ;;  %v21130_v19 = vld [vmem:[#allocation8_spill] sm:$0xff] }
 0x899   :  { %18684 = vmatpush3.bf16.msra.mxu0 %v18681_v14  ;;  %17405 = vmatprep.mubr.f32.mxu0 %v8436_v46 }
 0x89a   :  { %18686 = vmatprep.subr.bf16.mxu0 %v18685_v26 }
 0x89d   :  { %18688 = vmatpush3.bf16.msra.mxu0 %v18685_v26 }
 0x89e   :  { %18690 = vmatprep.subr.bf16.mxu0 %v20416_v8 }
 0x8a0   :  { %17406 = vmatmul.mubr.f32.vlgmr.msra.gmra.mrb[28].mxu0 %v8446_v1 }
 0x8a1   :  { %18692 = vmatpush3.bf16.msra.mxu0 %v20416_v8  ;;  %17416 = vmatprep.mubr.f32.mxu0 %v8436_v46  ;;  %v9358_v8 = vand.u32 4294901760, %v15512_v38 }
 0x8a2   :  { %18694 = vmatprep.subr.bf16.mxu0 %v20426_v36 }
 0x8a3   :  { %v20451_v4 = vsub.f32 %v15512_v38, %v9358_v8  ;;  %v9459_v38 = vsub.f32 %v15515_v21, %v9367_v30  ;;  %v15508_v21 = vld [vmem:[%s21091_s4 + $0x190] sm:$0xff] }
 0x8a5   :  { %18696 = vmatpush3.bf16.msra.mxu0 %v20426_v36  ;;  %v18728_v36 = vpack.c.bf16 %v20453_v48, %v20451_v4  ;;  %v18731_v23 = vpack.c.bf16 %v9459_v38, %v9452_v32 }
 0x8a6   :  { %18697 = vmatprep.subr.bf16.mxu0 %v21128_v47 }
 0x8a7   :  { %18729 = vmatpush3.bf16.msra.mxu1 %v18728_v36  ;;  %v20490_v36 = vpack.c.bf16 %v9361_v0, %v9358_v8 }
 0x8a8   :  { %17417 = vmatmul.mubr.f32.vlgmr.msra.gmra.mrb[28].mxu0 %v8446_v1  ;;  %18730 = vmatprep.subr.bf16.mxu1 %v21128_v47 }
 0x8a9   :  { %17423 = vmatprep.mubr.msk.f32.mxu0 %vm19419_vm0, %v21119_v51 }
 0x8ab   :  { %18732 = vmatpush3.bf16.msra.mxu1 %v18731_v23 }
 0x8ac   :  { %18739 = vmatprep.subr.bf16.mxu1 %v21128_v47 }
 0x97b   :  { %v17418_v17 = vpop.f32.mrb[28].mxu0 }
 0x97c   :  { %v19099_v10 = vadd.f32 %v17418_v17, %v8360_v40  ;;  %v8885_v13 = vpop.f32.mrb[29].mxu0  ;;  %v9453_v17 = vand.u32 4294901760, %v9452_v32 }
 0x97d   :  { %v19100_v14 = vadd.f32 %v8885_v13, %v8360_v40  ;;  %v20495_v40 = vpack.c.bf16 %v9367_v30, %v9364_v35  ;;  %v15509_v35 = vld [vmem:[%s21091_s4 + $0x198] sm:$0xff] }
 0x97e   :  { %v8899_v26 = vand.u32 4294901760, %v19099_v10 }
 0x97f   :  { %v8896_v3 = vand.u32 4294901760, %v19100_v14 }
 0x980   :  { %v8981_v7 = vsub.f32 %v19099_v10, %v8899_v26  ;;  %v9460_v10 = vand.u32 4294901760, %v9459_v38 }
 0x981   :  { %v18698_v22 = vpack.c.bf16 %v8899_v26, %v8896_v3  ;;  %v8974_v6 = vsub.f32 %v19100_v14, %v8896_v3  ;;  %v9454_v14 = vsub.f32 %v9452_v32, %v9453_v17  ;;  %v9846_v32 = vand.u32 4294901760, %v15508_v21 }
 0x982   :  { %v8982_v41 = vand.u32 4294901760, %v8981_v7  ;;  %v18743_v13 = vpack.c.bf16 %v9460_v10, %v9453_v17  ;;  %v9461_v26 = vsub.f32 %v9459_v38, %v9460_v10  ;;  %v9849_v38 = vand.u32 4294901760, %v15509_v35  ;;  %v15510_v10 = vld [vmem:[%s21091_s4 + $0x1a0] sm:$0xff] }
 0x983   :  { %v8975_v2 = vand.u32 4294901760, %v8974_v6  ;;  %v18704_v39 = vpack.c.bf16 %v8981_v7, %v8974_v6  ;;  %18699 = vmatpush3.bf16.msra.mxu0 %v18698_v22  ;;  %v9455_v3 = vand.u32 4294901760, %v9454_v14  ;;  %v15511_v14 = vld [vmem:[%s21091_s4 + $0x1a8] sm:$0xff] }
 0x984   :  { %v8983_v63 = vsub.f32 %v8981_v7, %v8982_v41  ;;  %18700 = vmatprep.subr.bf16.mxu0 %v21128_v47  ;;  %v9462_v8 = vand.u32 4294901760, %v9461_v26  ;;  %v21131_v7 = vld [vmem:[#allocation9_spill] sm:$0xff] }
 0x985   :  { %v8976_v1 = vsub.f32 %v8974_v6, %v8975_v2  ;;  %v18710_v16 = vpack.c.bf16 %v8982_v41, %v8975_v2  ;;  %v9439_v41 = vand.u32 4294901760, %v20451_v4  ;;  %v9446_v2 = vand.u32 4294901760, %v20453_v48 }
 0x986   :  { %v8984_v46 = vand.u32 4294901760, %v8983_v63  ;;  %17424 = vmatmul.mubr.f32.vlgmr.msra.gmra.mrb[30].mxu0 %v19939_v18  ;;  %v18725_v0 = vpack.c.bf16 %v9462_v8, %v9455_v3  ;;  %v20536_v8 = vpack.c.bf16 %v9849_v38, %v9846_v32 }
 0x987   :  { %v8977_v15 = vand.u32 4294901760, %v8976_v1  ;;  %17430 = vmatprep.mubr.msk.f32.mxu0 %vm19419_vm0, %v21119_v51  ;;  %v18740_v20 = vpack.c.bf16 %v9446_v2, %v9439_v41 }
 0x989   :  { %v18701_v44 = vpack.c.bf16 %v8984_v46, %v8977_v15  ;;  %v9440_v46 = vsub.f32 %v20451_v4, %v9439_v41  ;;  %v9447_v15 = vsub.f32 %v20453_v48, %v9446_v2  ;;  %v9933_v2 = vsub.f32 %v15509_v35, %v9849_v38 }
 0x98b   :  { %18702 = vmatpush3.bf16.msra.mxu0 %v18701_v44  ;;  %v9441_v30 = vand.u32 4294901760, %v9440_v46  ;;  %v9448_v4 = vand.u32 4294901760, %v9447_v15 }
 0x98c   :  { %18703 = vmatprep.subr.bf16.mxu0 %v21128_v47 }
 0x98d   :  { %v18722_v26 = vpack.c.bf16 %v9448_v4, %v9441_v30 }
 0x98e   :  { %17431 = vmatmul.mubr.f32.vlgmr.msra.gmra.mrb[30].mxu0 %v19924_v54 }
 0x98f   :  { %18705 = vmatpush3.bf16.msra.mxu0 %v18704_v39  ;;  %17437 = vmatprep.mubr.msk.f32.mxu0 %vm19419_vm0, %v21119_v51 }
 0x990   :  { %18706 = vmatprep.subr.bf16.mxu0 %v21128_v47 }
 0x996   :  { %17438 = vmatmul.mubr.f32.vlgmr.msra.gmra.mrb[30].mxu0 %v19930_v60 }
 0x997   :  { %18708 = vmatpush3.bf16.msra.mxu0 %v18698_v22  ;;  %17444 = vmatprep.mubr.msk.f32.mxu0 %vm19419_vm0, %v21119_v51 }
 0x998   :  { %18709 = vmatprep.subr.bf16.mxu0 %v21128_v47 }
 0x99e   :  { %17445 = vmatmul.mubr.f32.vlgmr.msra.gmra.mrb[30].mxu0 %v21130_v19 }
 0x99f   :  { %18711 = vmatpush3.bf16.msra.mxu0 %v18710_v16  ;;  %17451 = vmatprep.mubr.msk.f32.mxu0 %vm19419_vm0, %v21119_v51 }
 0x9a0   :  { %18712 = vmatprep.subr.bf16.mxu0 %v21128_v47 }
 0x9a6   :  { %17452 = vmatmul.mubr.f32.vlgmr.msra.gmra.mrb[30].mxu0 %v19924_v54 }
 0x9a7   :  { %18714 = vmatpush3.bf16.msra.mxu0 %v18698_v22  ;;  %17458 = vmatprep.mubr.msk.f32.mxu0 %vm19419_vm0, %v21119_v51  ;;  %v5726_v22 = vrot.slane %v20253_v49, %v21131_v7 }
 0x9a8   :  { %18715 = vmatprep.subr.bf16.mxu0 %v21128_v47 }
 0x9a9   :  { %v19098_v6 = vadd.f32 %v20408_v28, %v5726_v22  ;;  %v9852_v22 = vand.u32 4294901760, %v15510_v10 }
 0x9ab   :  { %v9843_v63 = vsel %vm29_vm1, %v19098_v6, 0  ;;  %v9855_v6 = vand.u32 4294901760, %v15511_v14 }
 0x9ac   :  { %v20510_v49 = vand.u32 4294901760, %v9843_v63 }
 0x9ae   :  { %17459 = vmatmul.mubr.f32.vlgmr.msra.gmra.mrb[30].mxu0 %v19924_v54  ;;  %v20526_v23 = vsub.f32 %v9843_v63, %v20510_v49 }
 0x9af   :  { %17469 = vmatprep.mubr.msk.f32.mxu0 %vm19419_vm0, %v21119_v51  ;;  %18717 = vmatpush3.bf16.msra.mxu0 %v20490_v36 }
 0x9b0   :  { %18718 = vmatprep.subr.bf16.mxu0 %v21128_v47  ;;  %v9916_v41 = vand.u32 4294901760, %v20526_v23 }
 0x9b2   :  { %v9917_v63 = vsub.f32 %v20526_v23, %v9916_v41 }
 0x9b3   :  { %18720 = vmatpush3.bf16.msra.mxu0 %v20495_v40 }
 0x9b4   :  { %18721 = vmatprep.subr.bf16.mxu0 %v21128_v47  ;;  %v9918_v15 = vand.u32 4294901760, %v9917_v63 }
 0xa81   :  { %v9350_v39 = vpop.f32.mrb[30].mxu0 }
 0xa82   :  { %v9355_v1 = vsel %vm29_vm1, %v9350_v39, 0  ;;  %v17460_v16 = vpop.f32.mrb[31].mxu0  ;;  %v20545_v39 = vpack.c.bf16 %v9855_v6, %v9852_v22 }
 0xa83   :  { %v20508_v44 = vand.u32 4294901760, %v9355_v1  ;;  %v9947_v16 = vsub.f32 %v15511_v14, %v9855_v6 }
 0xa85   :  { %v20513_v28 = vsub.f32 %v9355_v1, %v20508_v44  ;;  %v9940_v1 = vsub.f32 %v15510_v10, %v9852_v22 }
 0xa87   :  { %v9428_v48 = vand.u32 4294901760, %v20513_v28  ;;  %17492 = vmatmul.mubr.f32.vlgmr.msra.gmra.mrb[20].mxu1 %v20513_v28  ;;  %v9941_v4 = vand.u32 4294901760, %v9940_v1 }
 0xa88   :  { %18741 = vmatpush3.bf16.msra.mxu1 %v18740_v20  ;;  %17513 = vmatprep.mubr.msk.f32.mxu1 %vm19419_vm0, %v21119_v51 }
 0xa89   :  { %v9429_v17 = vsub.f32 %v20513_v28, %v9428_v48  ;;  %18742 = vmatprep.subr.bf16.mxu1 %v21128_v47  ;;  %v9934_v28 = vand.u32 4294901760, %v9933_v2  ;;  %v9942_v10 = vsub.f32 %v9940_v1, %v9941_v4 }
 0xa8b   :  { %v9430_v3 = vand.u32 4294901760, %v9429_v17  ;;  %v9935_v35 = vsub.f32 %v9933_v2, %v9934_v28 }
 0xa8c   :  { %18744 = vmatpush3.bf16.msra.mxu1 %v18743_v13  ;;  %v9926_v13 = vsub.f32 %v15508_v21, %v9846_v32  ;;  %v9948_v32 = vand.u32 4294901760, %v9947_v16 }
 0xa8d   :  { %17470 = vmatmul.mubr.f32.vlgmr.msra.gmra.mrb[32].mxu0 %v9430_v3  ;;  %18751 = vmatprep.subr.bf16.mxu1 %v21128_v47  ;;  %v9936_v17 = vand.u32 4294901760, %v9935_v35 }
 0xa8e   :  { %18723 = vmatpush3.bf16.msra.mxu0 %v18722_v26  ;;  %17480 = vmatprep.mubr.msk.f32.mxu0 %vm19419_vm0, %v21119_v51  ;;  %v18764_v46 = vpack.c.bf16 %v9933_v2, %v9926_v13  ;;  %v9927_v20 = vand.u32 4294901760, %v9926_v13  ;;  %v9949_v14 = vsub.f32 %v9947_v16, %v9948_v32  ;;  %v18779_v26 = vpack.c.bf16 %v9948_v32, %v9941_v4  ;;  %v15520_v2 = vld [vmem:[%s21091_s4 + $0x1e8] sm:$0xff] }
 0xa8f   :  { %17514 = vmatmul.mubr.f32.vlgmr.msra.gmra.mrb[22].mxu1 %v20508_v44  ;;  %18724 = vmatprep.subr.bf16.mxu0 %v21128_v47  ;;  %v10384_v63 = vand.u32 4294901760, %v15520_v2 }
 0xa90   :  { %18753 = vmatpush3.bf16.msra.mxu1 %v20536_v8  ;;  %17535 = vmatprep.mubr.msk.f32.mxu1 %vm19419_vm0, %v21119_v51  ;;  %v9928_v21 = vsub.f32 %v9926_v13, %v9927_v20  ;;  %v18776_v30 = vpack.c.bf16 %v9934_v28, %v9927_v20  ;;  %v9950_v3 = vand.u32 4294901760, %v9949_v14 }
 0xa91   :  { %18754 = vmatprep.subr.bf16.mxu1 %v21128_v47 }
 0xa92   :  { %18726 = vmatpush3.bf16.msra.mxu0 %v18725_v0  ;;  %v18767_v0 = vpack.c.bf16 %v9947_v16, %v9940_v1  ;;  %v9929_v38 = vand.u32 4294901760, %v9928_v21 }
 0xa93   :  { %18733 = vmatprep.subr.bf16.mxu0 %v21128_v47 }
 0xa94   :  { %18756 = vmatpush3.bf16.msra.mxu1 %v20545_v39 }
 0xa95   :  { %17481 = vmatmul.mubr.f32.vlgmr.msra.gmra.mrb[34].mxu0 %v20508_v44  ;;  %18763 = vmatprep.subr.bf16.mxu1 %v21128_v47 }
 0xa96   :  { %18735 = vmatpush3.bf16.msra.mxu0 %v20490_v36  ;;  %17502 = vmatprep.mubr.msk.f32.mxu0 %vm19419_vm0, %v21119_v51 }
 0xa97   :  { %17536 = vmatmul.mubr.f32.vlgmr.msra.gmra.mrb[24].mxu1 %v9918_v15  ;;  %18736 = vmatprep.subr.bf16.mxu0 %v21128_v47 }
 0xa98   :  { %18765 = vmatpush3.bf16.msra.mxu1 %v18764_v46  ;;  %17557 = vmatprep.mubr.msk.f32.mxu1 %vm19419_vm0, %v21119_v51 }
 0xa99   :  { %18766 = vmatprep.subr.bf16.mxu1 %v21128_v47 }
 0xa9a   :  { %18738 = vmatpush3.bf16.msra.mxu0 %v20495_v40 }
 0xa9b   :  { %18745 = vmatprep.subr.bf16.mxu0 %v21128_v47 }
 0xa9c   :  { %18768 = vmatpush3.bf16.msra.mxu1 %v18767_v0  ;;  %v20630_v0 = vsub.f32 %v15520_v2, %v10384_v63 }
 0xa9d   :  { %17503 = vmatmul.mubr.f32.vlgmr.msra.gmra.mrb[36].mxu0 %v9428_v48  ;;  %18775 = vmatprep.subr.bf16.mxu1 %v21128_v47  ;;  %v9943_v48 = vand.u32 4294901760, %v9942_v10 }
 0xa9e   :  { %18747 = vmatpush3.bf16.msra.mxu0 %v20490_v36  ;;  %17524 = vmatprep.mubr.msk.f32.mxu0 %vm19419_vm0, %v21119_v51  ;;  %v18758_v36 = vpack.c.bf16 %v9936_v17, %v9929_v38  ;;  %v10477_v4 = vand.u32 4294901760, %v20630_v0 }
 0xa9f   :  { %17558 = vmatmul.mubr.f32.vlgmr.msra.gmra.mrb[26].mxu1 %v20526_v23  ;;  %18748 = vmatprep.subr.bf16.mxu0 %v21128_v47  ;;  %v18761_v22 = vpack.c.bf16 %v9950_v3, %v9943_v48 }
 0xaa0   :  { %18777 = vmatpush3.bf16.msra.mxu1 %v18776_v30  ;;  %17579 = vmatprep.mubr.msk.f32.mxu1 %vm19419_vm0, %v21119_v51  ;;  %v10478_v17 = vsub.f32 %v20630_v0, %v10477_v4 }
 0xaa1   :  { %18778 = vmatprep.subr.bf16.mxu1 %v21128_v47 }
 0xaa2   :  { %18750 = vmatpush3.bf16.msra.mxu0 %v20495_v40  ;;  %v15517_v40 = vld [vmem:[%s21091_s4 + $0x1d0] sm:$0xff]  ;;  %v10479_v14 = vand.u32 4294901760, %v10478_v17 }
 0xaa3   :  { %18757 = vmatprep.subr.bf16.mxu0 %v21128_v47  ;;  %v10375_v23 = vand.u32 4294901760, %v15517_v40 }
 0xaa4   :  { %18780 = vmatpush3.bf16.msra.mxu1 %v18779_v26 }
 0xaa5   :  { %17525 = vmatmul.mubr.f32.vlgmr.msra.gmra.mrb[38].mxu0 %v20508_v44  ;;  %18787 = vmatprep.subr.bf16.mxu1 %v21128_v47  ;;  %v15518_v44 = vld [vmem:[%s21091_s4 + $0x1d8] sm:$0xff] }
 0xaa6   :  { %18759 = vmatpush3.bf16.msra.mxu0 %v18758_v36  ;;  %17546 = vmatprep.mubr.msk.f32.mxu0 %vm19419_vm0, %v21119_v51 }
 0xaa7   :  { %17580 = vmatmul.mubr.f32.vlgmr.msra.gmra.mrb[28].mxu1 %v20510_v49  ;;  %18760 = vmatprep.subr.bf16.mxu0 %v21128_v47 }
 0xaa8   :  { %17601 = vmatprep.mubr.msk.f32.mxu1 %vm19419_vm0, %v21119_v51 }
 0xaaa   :  { %18762 = vmatpush3.bf16.msra.mxu0 %v18761_v22 }
 0xaab   :  { %18769 = vmatprep.subr.bf16.mxu0 %v21128_v47 }
 0xaad   :  { %17547 = vmatmul.mubr.f32.vlgmr.msra.gmra.mrb[40].mxu0 %v20510_v49 }
 0xaae   :  { %18771 = vmatpush3.bf16.msra.mxu0 %v20536_v8  ;;  %17568 = vmatprep.mubr.msk.f32.mxu0 %vm19419_vm0, %v21119_v51 }
 0xaaf   :  { %18772 = vmatprep.subr.bf16.mxu0 %v21128_v47 }
 0xab2   :  { %18774 = vmatpush3.bf16.msra.mxu0 %v20545_v39 }
 0xab3   :  { %18781 = vmatprep.subr.bf16.mxu0 %v21128_v47 }
 0xab5   :  { %17569 = vmatmul.mubr.f32.vlgmr.msra.gmra.mrb[42].mxu0 %v9916_v41  ;;  %v20612_v41 = vsub.f32 %v15517_v40, %v10375_v23 }
 0xab6   :  { %18783 = vmatpush3.bf16.msra.mxu0 %v20536_v8  ;;  %17590 = vmatprep.mubr.msk.f32.mxu0 %vm19419_vm0, %v21119_v51  ;;  %v10378_v8 = vand.u32 4294901760, %v15518_v44 }
 0xab7   :  { %18784 = vmatprep.subr.bf16.mxu0 %v21128_v47  ;;  %v10456_v1 = vand.u32 4294901760, %v20612_v41 }
 0xab8   :  { %v20610_v6 = vpack.c.bf16 %v10378_v8, %v10375_v23  ;;  %v20614_v13 = vsub.f32 %v15518_v44, %v10378_v8 }
 0xab9   :  { %v10457_v20 = vsub.f32 %v20612_v41, %v10456_v1 }
 0xaba   :  { %18786 = vmatpush3.bf16.msra.mxu0 %v20545_v39  ;;  %18789 = vmatpush3.bf16.msra.mxu1 %v20610_v6  ;;  %v10463_v16 = vand.u32 4294901760, %v20614_v13  ;;  %v18800_v36 = vpack.c.bf16 %v20614_v13, %v20612_v41 }
 0xabb   :  { %18823 = vmatprep.subr.bf16.mxu0 %v21128_v47  ;;  %18790 = vmatprep.subr.bf16.mxu1 %v21128_v47  ;;  %v10458_v21 = vand.u32 4294901760, %v10457_v20 }
 0xabc   :  { %v10464_v28 = vsub.f32 %v20614_v13, %v10463_v16  ;;  %v20644_v3 = vpack.c.bf16 %v10463_v16, %v10456_v1 }
 0xabd   :  { %17591 = vmatmul.mubr.f32.vlgmr.msra.gmra.mrb[44].mxu0 %v20510_v49  ;;  %v15519_v49 = vld [vmem:[%s21091_s4 + $0x1e0] sm:$0xff] }
 0xabe   :  { %17667 = vmatprep.mubr.msk.f32.mxu0 %vm19419_vm0, %v21119_v51  ;;  %v10381_v39 = vand.u32 4294901760, %v15519_v49  ;;  %v10465_v35 = vand.u32 4294901760, %v10464_v28 }
 0xac0   :  { %v20626_v46 = vpack.c.bf16 %v10384_v63, %v10381_v39  ;;  %v20628_v15 = vsub.f32 %v15519_v49, %v10381_v39  ;;  %v18794_v32 = vpack.c.bf16 %v10465_v35, %v10458_v21 }
 0xac2   :  { %18792 = vmatpush3.bf16.msra.mxu1 %v20626_v46  ;;  %v10470_v30 = vand.u32 4294901760, %v20628_v15  ;;  %v18803_v48 = vpack.c.bf16 %v20630_v0, %v20628_v15 }
 0xac3   :  { %18793 = vmatprep.subr.bf16.mxu1 %v21128_v47 }
 0xac4   :  { %v10471_v38 = vsub.f32 %v20628_v15, %v10470_v30  ;;  %v20646_v22 = vpack.c.bf16 %v10477_v4, %v10470_v30 }
 0xac6   :  { %v10472_v10 = vand.u32 4294901760, %v10471_v38 }
 0xac8   :  { %v18797_v26 = vpack.c.bf16 %v10479_v14, %v10472_v10 }
 0xb5a   :  { %v9603_v40 = vpop.f32.mrb[20].mxu1 }
 0xb5b   :  { %v17493_v44 = vpop.f32.mrb[21].mxu1 }
 0xb60   :  { %v9432_v23 = vpop.f32.mrb[32].mxu0 }
 0xb61   :  { %v17471_v8 = vpop.f32.mrb[33].mxu0 }
 0xb62   :  { %v9763_v49 = vpop.f32.mrb[22].mxu1 }
 0xb63   :  { %v17515_v2 = vpop.f32.mrb[23].mxu1 }
 0xb68   :  { %v9523_v39 = vpop.f32.mrb[34].mxu0 }
 0xb69   :  { %v9524_v63 = vadd.f32 %v9523_v39, %v9432_v23  ;;  %v17482_v20 = vpop.f32.mrb[35].mxu0 }
 0xb6a   :  { %v9920_v28 = vpop.f32.mrb[24].mxu1 }
 0xb6b   :  { %v17537_v21 = vpop.f32.mrb[25].mxu1  ;;  %v9604_v35 = vadd.f32 %v9603_v40, %v9524_v63  ;;  %v19392_v63 = vld [vmem:[%s21092_s5 + $0x8] sm:$0xff] }
 0xb70   :  { %v9680_v41 = vpop.f32.mrb[36].mxu0 }
 0xb71   :  { %v9681_v13 = vadd.f32 %v9680_v41, %v9604_v35  ;;  %v17504_v38 = vpop.f32.mrb[37].mxu0 }
 0xb72   :  { %v10091_v15 = vpop.f32.mrb[26].mxu1 }
 0xb73   :  { %v17559_v1 = vpop.f32.mrb[27].mxu1  ;;  %v9764_v16 = vadd.f32 %v9763_v49, %v9681_v13  ;;  %v10333_v49 = vrot.slane %v19392_v63, %v20174_v29 }
 0xb78   :  { %v9838_v0 = vpop.f32.mrb[38].mxu0 }
 0xb79   :  { %v9839_v30 = vadd.f32 %v9838_v0, %v9764_v16  ;;  %v17526_v4 = vpop.f32.mrb[39].mxu0 }
 0xb7a   :  { %v10251_v17 = vpop.f32.mrb[28].mxu1 }
 0xb7b   :  { %v17581_v10 = vpop.f32.mrb[29].mxu1  ;;  %v9921_v14 = vadd.f32 %v9920_v28, %v9839_v30 }
 0xb80   :  { %v10011_v44 = vpop.f32.mrb[40].mxu0 }
 0xb81   :  { %v10012_v8 = vadd.f32 %v10011_v44, %v9921_v14  ;;  %v17548_v2 = vpop.f32.mrb[41].mxu0 }
 0xb83   :  { %v10092_v23 = vadd.f32 %v10091_v15, %v10012_v8 }
 0xb88   :  { %v10168_v39 = vpop.f32.mrb[42].mxu0 }
 0xb89   :  { %v10169_v20 = vadd.f32 %v10168_v39, %v10092_v23  ;;  %v17570_v21 = vpop.f32.mrb[43].mxu0 }
 0xb8b   :  { %v10252_v40 = vadd.f32 %v10251_v17, %v10169_v20 }
 0xb90   :  { %v10326_v35 = vpop.f32.mrb[44].mxu0 }
 0xb91   :  { %v10327_v41 = vadd.f32 %v10326_v35, %v10252_v40  ;;  %v17592_v13 = vpop.f32.mrb[45].mxu0 }
 0xb93   :  { %v10334_v38 = vadd.f32 %v10333_v49, %v10327_v41 }
 0xb95   :  { %v10372_v28 = vsel %vm29_vm1, %v10334_v38, 0 }
 0xb96   :  { %v10443_v1 = vand.u32 4294901760, %v10372_v28 }
 0xb98   :  { %v10444_v16 = vsub.f32 %v10372_v28, %v10443_v1  ;;  %v21134_v28 = vld [vmem:[#allocation7_spill] sm:$0xff] }
 0xb9a   :  { %v10445_v0 = vand.u32 4294901760, %v10444_v16 }
 0xb9c   :  { %v10446_v15 = vsub.f32 %v10444_v16, %v10445_v0 }
 0xb9e   :  { %v10447_v30 = vand.u32 4294901760, %v10446_v15 }
 0xba0   :  { %17602 = vmatmul.mubr.f32.vlgmr.msra.gmra.mrb[30].mxu1 %v10447_v30 }
 0xba1   :  { %18795 = vmatpush3.bf16.msra.mxu1 %v18794_v32  ;;  %17612 = vmatprep.mubr.msk.f32.mxu1 %vm19419_vm0, %v21119_v51  ;;  %v11353_v32 = vand.u32 4294901760, %v10334_v38 }
 0xba2   :  { %18796 = vmatprep.subr.bf16.mxu1 %v21128_v47 }
 0xba5   :  { %18798 = vmatpush3.bf16.msra.mxu1 %v18797_v26  ;;  %v11460_v26 = vsub.f32 %v10334_v38, %v11353_v32  ;;  %v20725_v38 = vld [vmem:[%s21092_s5 + $0x10] sm:$0xff] }
 0xba6   :  { %18799 = vmatprep.subr.bf16.mxu1 %v21128_v47 }
 0xba8   :  { %17613 = vmatmul.mubr.f32.vlgmr.msra.gmra.mrb[30].mxu1 %v10443_v1 }
 0xba9   :  { %18801 = vmatpush3.bf16.msra.mxu1 %v18800_v36  ;;  %17623 = vmatprep.mubr.msk.f32.mxu1 %vm19419_vm0, %v21119_v51  ;;  %v11461_v36 = vand.u32 4294901760, %v11460_v26 }
 0xbaa   :  { %18802 = vmatprep.subr.bf16.mxu1 %v21128_v47 }
 0xbad   :  { %18804 = vmatpush3.bf16.msra.mxu1 %v18803_v48  ;;  %v11462_v48 = vsub.f32 %v11460_v26, %v11461_v36 }
 0xbae   :  { %18805 = vmatprep.subr.bf16.mxu1 %v21128_v47 }
 0xbb0   :  { %17624 = vmatmul.mubr.f32.vlgmr.msra.gmra.mrb[30].mxu1 %v10444_v16 }
 0xbb1   :  { %18807 = vmatpush3.bf16.msra.mxu1 %v20610_v6  ;;  %17634 = vmatprep.mubr.msk.f32.mxu1 %vm19419_vm0, %v21119_v51 }
 0xbb2   :  { %18808 = vmatprep.subr.bf16.mxu1 %v21128_v47 }
 0xbb5   :  { %18810 = vmatpush3.bf16.msra.mxu1 %v20626_v46 }
 0xbb6   :  { %18811 = vmatprep.subr.bf16.mxu1 %v21128_v47 }
 0xbb8   :  { %17635 = vmatmul.mubr.f32.vlgmr.msra.gmra.mrb[30].mxu1 %v10445_v0 }
 0xbb9   :  { %18813 = vmatpush3.bf16.msra.mxu1 %v20644_v3  ;;  %17645 = vmatprep.mubr.msk.f32.mxu1 %vm19419_vm0, %v21119_v51  ;;  %v11463_v3 = vand.u32 4294901760, %v11462_v48 }
 0xbba   :  { %18814 = vmatprep.subr.bf16.mxu1 %v21128_v47 }
 0xbbd   :  { %18816 = vmatpush3.bf16.msra.mxu1 %v20646_v22 }
 0xbbe   :  { %18817 = vmatprep.subr.bf16.mxu1 %v21128_v47 }
 0xbc0   :  { %17646 = vmatmul.mubr.f32.vlgmr.msra.gmra.mrb[30].mxu1 %v10443_v1 }
 0xbc1   :  { %18819 = vmatpush3.bf16.msra.mxu1 %v20610_v6  ;;  %17656 = vmatprep.mubr.msk.f32.mxu1 %vm19419_vm0, %v21119_v51 }
 0xbc2   :  { %18820 = vmatprep.subr.bf16.mxu1 %v21128_v47 }
 0xbc5   :  { %18822 = vmatpush3.bf16.msra.mxu1 %v20626_v46 }
 0xbc6   :  { %17725 = vmatprep.subr.mxu1 %v11353_v32 }
 0xbc8   :  { %17657 = vmatmul.mubr.f32.vlgmr.msra.gmra.mrb[30].mxu1 %v10443_v1  ;;  %v10370_v1 = vrot.slane %v20725_v38, %v21134_v28 }
 0xbc9   :  { %17726 = vmatpush3.msra.mxu1 %v11353_v32  ;;  %17727 = vmatprep.mubr.f32.mxu1 %v19571_v5  ;;  %v21132_v5 = vld [vmem:[#allocation5_spill] sm:$0xff] }
 0xbca   :  { %17733 = vmatprep.subr.mxu1 %v11463_v3 }
 0xbcc   :  { %17728 = vmatmul.mubr.f32.vlgmr.msra.gmra.mrb[32].mxu1 %v19577_v9  ;;  %v21133_v9 = vld [vmem:[#allocation6_spill] sm:$0xff] }
 0xbcd   :  { %17734 = vmatpush3.msra.mxu1 %v11463_v3  ;;  %17730 = vmatprep.mubr.f32.mxu1 %v19583_v11 }
 0xbce   :  { %17741 = vmatprep.subr.mxu1 %v11460_v26 }
 0xbd0   :  { %17731 = vmatmul.mubr.f32.gmra.mrb[34].mxu1 %v19586_v12 }
 0xbd1   :  { %17735 = vmatprep.mubr.f32.mxu1 %v19515_v45 }
 0xbd4   :  { %17736 = vmatmul.mubr.f32.vlgmr.msra.gmra.mrb[32].mxu1 %v19525_v50 }
 0xbd5   :  { %17742 = vmatpush3.msra.mxu1 %v11460_v26  ;;  %17738 = vmatprep.mubr.f32.mxu1 %v19532_v53 }
 0xbd6   :  { %17749 = vmatprep.subr.mxu1 %v11353_v32 }
 0xbd8   :  { %17739 = vmatmul.mubr.f32.gmra.mrb[34].mxu1 %v19540_v57 }
 0xbd9   :  { %17743 = vmatprep.mubr.f32.mxu1 %v19530_v52  ;;  %v15521_v52 = vld [vmem:[%s21091_s4 + $0x1f0] sm:$0xff] }
 0xbdc   :  { %17744 = vmatmul.mubr.f32.vlgmr.msra.gmra.mrb[32].mxu1 %v19538_v56  ;;  %v15522_v56 = vld [vmem:[%s21091_s4 + $0x1f8] sm:$0xff] }
 0xbdd   :  { %17750 = vmatpush3.msra.mxu1 %v11353_v32  ;;  %17746 = vmatprep.mubr.f32.mxu1 %v19546_v59  ;;  %v10871_v59 = vand.u32 4294901760, %v15522_v56 }
 0xbde   :  { %17757 = vmatprep.subr.mxu1 %v11461_v36 }
 0xbe0   :  { %17747 = vmatmul.mubr.f32.gmra.mrb[34].mxu1 %v19554_v62 }
 0xbe1   :  { %17751 = vmatprep.mubr.f32.mxu1 %v19543_v58  ;;  %v10868_v58 = vand.u32 4294901760, %v15521_v52 }
 0xbe3   :  { %v10948_v62 = vsub.f32 %v15521_v52, %v10868_v58  ;;  %v15530_v52 = vld [vmem:[%s21091_s4 + $0x238] sm:$0xff] }
 0xbe4   :  { %17752 = vmatmul.mubr.f32.vlgmr.msra.gmra.mrb[32].mxu1 %v19551_v61  ;;  %v20708_v61 = vpack.c.bf16 %v10871_v59, %v10868_v58  ;;  %v11937_v58 = vand.u32 4294901760, %v15530_v52 }
 0xbe5   :  { %17758 = vmatpush3.msra.mxu1 %v11461_v36  ;;  %17754 = vmatprep.mubr.f32.mxu1 %v21132_v5  ;;  %v10949_v12 = vand.u32 4294901760, %v10948_v62 }
 0xbe6   :  { %17765 = vmatprep.subr.mxu1 %v11353_v32  ;;  %18825 = vmatpush3.bf16.msra.mxu0 %v20708_v61 }
 0xbe7   :  { %18826 = vmatprep.subr.bf16.mxu0 %v21128_v47  ;;  %v10950_v17 = vsub.f32 %v10948_v62, %v10949_v12 }
 0xbe8   :  { %17755 = vmatmul.mubr.f32.gmra.mrb[34].mxu1 %v21133_v9  ;;  %v15529_v9 = vld [vmem:[%s21091_s4 + $0x230] sm:$0xff] }
 0xbe9   :  { %17759 = vmatprep.mubr.f32.mxu1 %v19515_v45  ;;  %v10951_v14 = vand.u32 4294901760, %v10950_v17 }
 0xbec   :  { %17760 = vmatmul.mubr.f32.vlgmr.msra.gmra.mrb[32].mxu1 %v19525_v50 }
 0xbed   :  { %17766 = vmatpush3.msra.mxu1 %v11353_v32  ;;  %17762 = vmatprep.mubr.f32.mxu1 %v19532_v53 }
 0xbf0   :  { %17763 = vmatmul.mubr.f32.gmra.mrb[34].mxu1 %v19540_v57 }
 0xbf1   :  { %17767 = vmatprep.mubr.f32.mxu1 %v19515_v45  ;;  %v10955_v45 = vsub.f32 %v15522_v56, %v10871_v59  ;;  %v11934_v56 = vand.u32 4294901760, %v15529_v9  ;;  %v15531_v59 = vld [vmem:[%s21091_s4 + $0x240] sm:$0xff] }
 0xbf3   :  { %v10956_v6 = vand.u32 4294901760, %v10955_v45  ;;  %v18836_v49 = vpack.c.bf16 %v10955_v45, %v10948_v62  ;;  %v15532_v62 = vld [vmem:[%s21091_s4 + $0x248] sm:$0xff] }
 0xbf4   :  { %17768 = vmatmul.mubr.f32.vlgmr.msra.gmra.mrb[32].mxu1 %v19525_v50  ;;  %v15523_v50 = vld [vmem:[%s21091_s4 + $0x200] sm:$0xff] }
 0xbf5   :  { %17770 = vmatprep.mubr.f32.mxu1 %v19532_v53  ;;  %v15524_v53 = vld [vmem:[%s21091_s4 + $0x208] sm:$0xff]  ;;  %v10957_v10 = vsub.f32 %v10955_v45, %v10956_v6  ;;  %v18848_v41 = vpack.c.bf16 %v10956_v6, %v10949_v12  ;;  %v20762_v45 = vsub.f32 %v15529_v9, %v11934_v56 }
 0xbf6   :  { %v10877_v11 = vand.u32 4294901760, %v15524_v53 }
 0xbf7   :  { %v10958_v2 = vand.u32 4294901760, %v10957_v10  ;;  %v12025_v6 = vand.u32 4294901760, %v20762_v45 }
 0xbf8   :  { %17771 = vmatmul.mubr.f32.gmra.mrb[34].mxu1 %v19540_v57  ;;  %v10874_v57 = vand.u32 4294901760, %v15523_v50  ;;  %v10969_v4 = vsub.f32 %v15524_v53, %v10877_v11  ;;  %v11940_v53 = vand.u32 4294901760, %v15531_v59 }
 0xbf9   :  { %v18830_v20 = vpack.c.bf16 %v10958_v2, %v10951_v14  ;;  %v12026_v2 = vsub.f32 %v20762_v45, %v12025_v6 }
 0xbfa   :  { %v20718_v46 = vpack.c.bf16 %v10877_v11, %v10874_v57  ;;  %v10962_v22 = vsub.f32 %v15523_v50, %v10874_v57  ;;  %v10970_v8 = vand.u32 4294901760, %v10969_v4  ;;  %v20764_v50 = vsub.f32 %v15530_v52, %v11937_v58 }
 0xbfb   :  { %v11943_v57 = vand.u32 4294901760, %v15532_v62 }
 0xbfc   :  { %18828 = vmatpush3.bf16.msra.mxu0 %v20718_v46  ;;  %v10963_v44 = vand.u32 4294901760, %v10962_v22  ;;  %v10971_v39 = vsub.f32 %v10969_v4, %v10970_v8  ;;  %v18839_v35 = vpack.c.bf16 %v10969_v4, %v10962_v22  ;;  %v20774_v4 = vsub.f32 %v15531_v59, %v11940_v53 }
 0xbfd   :  { %18829 = vmatprep.subr.bf16.mxu0 %v21128_v47  ;;  %v20776_v17 = vsub.f32 %v15532_v62, %v11943_v57 }
 0xbfe   :  { %v10964_v23 = vsub.f32 %v10962_v22, %v10963_v44  ;;  %v10972_v40 = vand.u32 4294901760, %v10971_v39  ;;  %v18851_v13 = vpack.c.bf16 %v10970_v8, %v10963_v44  ;;  %v12032_v22 = vand.u32 4294901760, %v20764_v50 }
 0xbff   :  { %v20783_v8 = vpack.c.bf16 %v11937_v58, %v11934_v56  ;;  %v18879_v9 = vpack.c.bf16 %v20776_v17, %v20774_v4  ;;  %v15525_v56 = vld [vmem:[%s21091_s4 + $0x210] sm:$0xff]  ;;  %v15526_v58 = vld [vmem:[%s21091_s4 + $0x218] sm:$0xff] }
 0xc00   :  { %v10965_v21 = vand.u32 4294901760, %v10964_v23  ;;  %v12033_v23 = vsub.f32 %v20764_v50, %v12032_v22  ;;  %v18891_v52 = vpack.c.bf16 %v12032_v22, %v12025_v6  ;;  %v12468_v62 = vand.u32 4294901760, %v15525_v56  ;;  %v15528_v6 = vld [vmem:[%s21091_s4 + $0x228] sm:$0xff] }
 0xc02   :  { %v18833_v63 = vpack.c.bf16 %v10972_v40, %v10965_v21  ;;  %v12046_v21 = vand.u32 4294901760, %v20776_v17  ;;  %v12034_v28 = vand.u32 4294901760, %v12033_v23 }
 0xc9b   :  { %v10855_v16 = vpop.f32.mrb[30].mxu1 }
 0xc9c   :  { %v19101_v0 = vadd.f32 %v10855_v16, %v10370_v1  ;;  %v17658_v15 = vpop.f32.mrb[31].mxu1  ;;  %v12047_v16 = vsub.f32 %v20776_v17, %v12046_v21 }
 0xc9e   :  { %v10859_v30 = vmax.f32 %v19101_v0, 0.0 }
 0xca0   :  { %v10865_v32 = vsel %vm29_vm1, %v10859_v30, 0 }
 0xca1   :  { %v20730_v26 = vand.u32 4294901760, %v10865_v32 }
 0xca3   :  { %v10937_v36 = vsub.f32 %v10865_v32, %v20730_v26 }
 0xca5   :  { %v10938_v48 = vand.u32 4294901760, %v10937_v36 }
 0xca7   :  { %v10939_v3 = vsub.f32 %v10937_v36, %v10938_v48 }
 0xca9   :  { %v10940_v5 = vand.u32 4294901760, %v10939_v3 }
 0xcab   :  { %17668 = vmatmul.mubr.f32.vlgmr.msra.gmra.mrb[46].mxu0 %v10940_v5 }
 0xcac   :  { %18831 = vmatpush3.bf16.msra.mxu0 %v18830_v20  ;;  %17678 = vmatprep.mubr.msk.f32.mxu0 %vm19419_vm0, %v21119_v51 }
 0xcad   :  { %18832 = vmatprep.subr.bf16.mxu0 %v21128_v47 }
 0xcb0   :  { %18834 = vmatpush3.bf16.msra.mxu0 %v18833_v63 }
 0xcb1   :  { %18835 = vmatprep.subr.bf16.mxu0 %v21128_v47 }
 0xcb3   :  { %17679 = vmatmul.mubr.f32.vlgmr.msra.gmra.mrb[46].mxu0 %v20730_v26 }
 0xcb4   :  { %18837 = vmatpush3.bf16.msra.mxu0 %v18836_v49  ;;  %17689 = vmatprep.mubr.msk.f32.mxu0 %vm19419_vm0, %v21119_v51 }
 0xcb5   :  { %18838 = vmatprep.subr.bf16.mxu0 %v21128_v47 }
 0xcb8   :  { %18840 = vmatpush3.bf16.msra.mxu0 %v18839_v35  ;;  %v20800_v35 = vpack.c.bf16 %v11943_v57, %v11940_v53  ;;  %v12471_v53 = vand.u32 4294901760, %v15526_v58 }
 0xcb9   :  { %18841 = vmatprep.subr.bf16.mxu0 %v21128_v47 }
 0xcba   :  { %v12565_v17 = vsub.f32 %v15526_v58, %v12471_v53 }
 0xcbb   :  { %17690 = vmatmul.mubr.f32.vlgmr.msra.gmra.mrb[46].mxu0 %v10937_v36  ;;  %v12048_v36 = vand.u32 4294901760, %v12047_v16 }
 0xcbc   :  { %18843 = vmatpush3.bf16.msra.mxu0 %v20708_v61  ;;  %17700 = vmatprep.mubr.msk.f32.mxu0 %vm19419_vm0, %v21119_v51  ;;  %v12566_v23 = vand.u32 4294901760, %v12565_v17 }
 0xcbd   :  { %18844 = vmatprep.subr.bf16.mxu0 %v21128_v47 }
 0xcc0   :  { %18846 = vmatpush3.bf16.msra.mxu0 %v20718_v46 }
 0xcc1   :  { %18847 = vmatprep.subr.bf16.mxu0 %v21128_v47 }
 0xcc3   :  { %17701 = vmatmul.mubr.f32.vlgmr.msra.gmra.mrb[46].mxu0 %v10938_v48 }
 0xcc4   :  { %18849 = vmatpush3.bf16.msra.mxu0 %v18848_v41  ;;  %17711 = vmatprep.mubr.msk.f32.mxu0 %vm19419_vm0, %v21119_v51  ;;  %v12027_v41 = vand.u32 4294901760, %v12026_v2 }
 0xcc5   :  { %18850 = vmatprep.subr.bf16.mxu0 %v21128_v47 }
 0xcc7   :  { %v20767_v11 = vpop.f32.mrb[32].mxu1 }
 0xcc8   :  { %18852 = vmatpush3.bf16.msra.mxu0 %v18851_v13  ;;  %v20769_v12 = vpop.f32.mrb[33].mxu1 }
 0xcc9   :  { %18853 = vmatprep.subr.bf16.mxu0 %v21128_v47  ;;  %v12462_v59 = vsel %vm29_vm1, %v20769_v12, 0  ;;  %v20838_v12 = vsub.f32 %v15525_v56, %v12468_v62 }
 0xcca   :  { %v20829_v57 = vand.u32 4294901760, %v12462_v59 }
 0xccb   :  { %17712 = vmatmul.mubr.f32.vlgmr.msra.gmra.mrb[46].mxu0 %v20730_v26  ;;  %v17772_v10 = vpop.f32.mrb[34].mxu1 }
 0xccc   :  { %18855 = vmatpush3.bf16.msra.mxu0 %v20708_v61  ;;  %v11931_v14 = vsel %vm29_vm1, %v17772_v10, 0  ;;  %v11917_v44 = vpop.f32.mrb[35].mxu1  ;;  %17722 = vmatprep.mubr.msk.f32.mxu0 %vm19419_vm0, %v21119_v51  ;;  %v12039_v61 = vand.u32 4294901760, %v20774_v4  ;;  %v12465_v10 = vsel %vm29_vm1, %v20767_v11, 0  ;;  %v18907_v11 = vpack.c.bf16 %v12471_v53, %v12468_v62 }
 0xccd   :  { %v20789_v39 = vand.u32 4294901760, %v11931_v14  ;;  %v11928_v20 = vsel %vm29_vm1, %v11917_v44, 0  ;;  %18856 = vmatprep.subr.bf16.mxu0 %v21128_v47  ;;  %v12559_v44 = vand.u32 4294901760, %v20838_v12  ;;  %v20844_v2 = vand.u32 4294901760, %v12465_v10 }
 0xcce   :  { %v20795_v40 = vand.u32 4294901760, %v11928_v20  ;;  %v12040_v1 = vsub.f32 %v20774_v4, %v12039_v61  ;;  %v12477_v4 = vand.u32 4294901760, %v15528_v6 }
 0xccf   :  { %v12013_v63 = vsub.f32 %v11931_v14, %v20789_v39  ;;  %v12537_v14 = vsub.f32 %v12462_v59, %v20829_v57 }
 0xcd0   :  { %v12003_v49 = vsub.f32 %v11928_v20, %v20795_v40  ;;  %18858 = vmatpush3.bf16.msra.mxu0 %v20718_v46  ;;  %v18867_v46 = vpack.c.bf16 %v12034_v28, %v12027_v41  ;;  %v12041_v32 = vand.u32 4294901760, %v12040_v1  ;;  %v12567_v41 = vsub.f32 %v12565_v17, %v12566_v23 }
 0xcd1   :  { %v12014_v13 = vand.u32 4294901760, %v12013_v63  ;;  %18860 = vmatprep.subr.bf16.mxu0 %v20783_v8 }
 0xcd2   :  { %v12004_v0 = vand.u32 4294901760, %v12003_v49  ;;  %v18871_v5 = vpack.c.bf16 %v12048_v36, %v12041_v32 }
 0xcd3   :  { %17723 = vmatmul.mubr.f32.vlgmr.msra.gmra.mrb[46].mxu0 %v20730_v26  ;;  %v12015_v30 = vsub.f32 %v12013_v63, %v12014_v13  ;;  %v18875_v26 = vpack.c.bf16 %v20764_v50, %v20762_v45  ;;  %v18895_v50 = vpack.c.bf16 %v12046_v21, %v12039_v61  ;;  %v15527_v45 = vld [vmem:[%s21091_s4 + $0x220] sm:$0xff]  ;;  %v12579_v61 = vsub.f32 %v15528_v6, %v12477_v4  ;;  %v15537_v6 = vld [vmem:[%s21091_s4 + $0x270] sm:$0xff] }
 0xcd4   :  { %18862 = vmatpush3.bf16.msra.mxu0 %v20783_v8  ;;  %v12005_v15 = vsub.f32 %v12003_v49, %v12004_v0  ;;  %v12474_v22 = vand.u32 4294901760, %v15527_v45  ;;  %v12538_v21 = vand.u32 4294901760, %v12537_v14 }
 0xcd5   :  { %18864 = vmatprep.subr.bf16.mxu0 %v20800_v35  ;;  %v12016_v3 = vand.u32 4294901760, %v12015_v30  ;;  %v12580_v28 = vand.u32 4294901760, %v12579_v61 }
 0xcd6   :  { %v12006_v48 = vand.u32 4294901760, %v12005_v15  ;;  %v12572_v20 = vsub.f32 %v15527_v45, %v12474_v22  ;;  %v12539_v1 = vsub.f32 %v12537_v14, %v12538_v21  ;;  %v18911_v16 = vpack.c.bf16 %v12477_v4, %v12474_v22  ;;  %v15536_v45 = vld [vmem:[%s21091_s4 + $0x268] sm:$0xff] }
 0xcd7   :  { %v13514_v22 = vand.u32 4294901760, %v15537_v6 }
 0xcd8   :  { %18866 = vmatpush3.bf16.msra.mxu0 %v20800_v35  ;;  %17781 = vmatprep.mubr.f32.mxu0 %v12006_v48 }
 0xcd9   :  { %18868 = vmatprep.subr.bf16.mxu0 %v18867_v46 }
 0xcdb   :  { %17782 = vmatmul.mubr.f32.vlgmr.msra.gmra.mrb[48].mxu0 %v12016_v3 }
 0xcdc   :  { %18870 = vmatpush3.bf16.msra.mxu0 %v18867_v46  ;;  %17792 = vmatprep.mubr.f32.mxu0 %v20795_v40  ;;  %v12540_v46 = vand.u32 4294901760, %v12539_v1 }
 0xcdd   :  { %18872 = vmatprep.subr.bf16.mxu0 %v18871_v5 }
 0xce0   :  { %18874 = vmatpush3.bf16.msra.mxu0 %v18871_v5 }
 0xce1   :  { %18876 = vmatprep.subr.bf16.mxu0 %v18875_v26 }
 0xce3   :  { %17793 = vmatmul.mubr.f32.vlgmr.msra.gmra.mrb[48].mxu0 %v20789_v39 }
 0xce4   :  { %18878 = vmatpush3.bf16.msra.mxu0 %v18875_v26  ;;  %17803 = vmatprep.mubr.f32.mxu0 %v12003_v49  ;;  %v12547_v49 = vsub.f32 %v12465_v10, %v20844_v2  ;;  %v18923_v26 = vpack.c.bf16 %v12565_v17, %v20838_v12 }
 0xce5   :  { %18880 = vmatprep.subr.bf16.mxu0 %v18879_v9 }
 0xce6   :  { %v12548_v15 = vand.u32 4294901760, %v12547_v49 }
 0xce8   :  { %18882 = vmatpush3.bf16.msra.mxu0 %v18879_v9  ;;  %v12549_v32 = vsub.f32 %v12547_v49, %v12548_v15  ;;  %v18939_v9 = vpack.c.bf16 %v12566_v23, %v12559_v44  ;;  %v13616_v23 = vsub.f32 %v15537_v6, %v13514_v22 }
 0xce9   :  { %18884 = vmatprep.subr.bf16.mxu0 %v20783_v8 }
 0xcea   :  { %v12550_v5 = vand.u32 4294901760, %v12549_v32 }
 0xceb   :  { %17804 = vmatmul.mubr.f32.vlgmr.msra.gmra.mrb[48].mxu0 %v12013_v63  ;;  %v12560_v63 = vsub.f32 %v20838_v12, %v12559_v44  ;;  %v13511_v12 = vand.u32 4294901760, %v15536_v45 }
 0xcec   :  { %18886 = vmatpush3.bf16.msra.mxu0 %v20783_v8  ;;  %17814 = vmatprep.mubr.f32.mxu0 %v12004_v0 }
 0xced   :  { %18888 = vmatprep.subr.bf16.mxu0 %v20800_v35  ;;  %v12561_v0 = vand.u32 4294901760, %v12560_v63  ;;  %v20898_v10 = vpack.c.bf16 %v13514_v22, %v13511_v12 }
 0xcf0   :  { %18890 = vmatpush3.bf16.msra.mxu0 %v20800_v35 }
 0xcf1   :  { %18892 = vmatprep.subr.bf16.mxu0 %v18891_v52 }
 0xcf3   :  { %17815 = vmatmul.mubr.f32.vlgmr.msra.gmra.mrb[48].mxu0 %v12014_v13  ;;  %v12573_v13 = vand.u32 4294901760, %v12572_v20 }
 0xcf4   :  { %18894 = vmatpush3.bf16.msra.mxu0 %v18891_v52  ;;  %17825 = vmatprep.mubr.f32.mxu0 %v20795_v40  ;;  %v15533_v52 = vld [vmem:[%s21091_s4 + $0x250] sm:$0xff] }
 0xcf5   :  { %18896 = vmatprep.subr.bf16.mxu0 %v18895_v50  ;;  %v12574_v30 = vsub.f32 %v12572_v20, %v12573_v13  ;;  %v18943_v56 = vpack.c.bf16 %v12580_v28, %v12573_v13  ;;  %v12996_v58 = vand.u32 4294901760, %v15533_v52 }
 0xcf7   :  { %v12575_v48 = vand.u32 4294901760, %v12574_v30  ;;  %v13083_v59 = vsub.f32 %v15533_v52, %v12996_v58  ;;  %v13489_v30 = vrot.slane %v20725_v38, %v19873_v31 }
 0xcf8   :  { %18898 = vmatpush3.bf16.msra.mxu0 %v18895_v50 }
 0xcf9   :  { %18900 = vmatprep.subr.bf16.mxu0 %v20783_v8  ;;  %v13084_v62 = vand.u32 4294901760, %v13083_v59 }
 0xcfb   :  { %17826 = vmatmul.mubr.f32.vlgmr.msra.gmra.mrb[48].mxu0 %v20789_v39  ;;  %v13085_v50 = vsub.f32 %v13083_v59, %v13084_v62 }
 0xcfc   :  { %18902 = vmatpush3.bf16.msra.mxu0 %v20783_v8  ;;  %17836 = vmatprep.mubr.f32.mxu0 %v20795_v40  ;;  %v12568_v8 = vand.u32 4294901760, %v12567_v41  ;;  %v12581_v40 = vsub.f32 %v12579_v61, %v12580_v28 }
 0xcfd   :  { %18904 = vmatprep.subr.bf16.mxu0 %v20800_v35  ;;  %v13086_v53 = vand.u32 4294901760, %v13085_v50 }
 0xcfe   :  { %v18915_v36 = vpack.c.bf16 %v12568_v8, %v12561_v0  ;;  %v12582_v3 = vand.u32 4294901760, %v12581_v40 }
 0xd00   :  { %18906 = vmatpush3.bf16.msra.mxu0 %v20800_v35  ;;  %v18919_v35 = vpack.c.bf16 %v12582_v3, %v12575_v48 }
 0xd01   :  { %18908 = vmatprep.subr.bf16.mxu0 %v18907_v11 }
 0xd03   :  { %17837 = vmatmul.mubr.f32.vlgmr.msra.gmra.mrb[48].mxu0 %v20789_v39  ;;  %v18927_v39 = vpack.c.bf16 %v12579_v61, %v12572_v20 }
 0xd04   :  { %18910 = vmatpush3.bf16.msra.mxu0 %v18907_v11  ;;  %17847 = vmatprep.mubr.f32.mxu0 %v12540_v46 }
 0xd05   :  { %18912 = vmatprep.subr.bf16.mxu0 %v18911_v16 }
 0xd08   :  { %18914 = vmatpush3.bf16.msra.mxu0 %v18911_v16 }
 0xd09   :  { %18916 = vmatprep.subr.bf16.mxu0 %v18915_v36 }
 0xd0b   :  { %17848 = vmatmul.mubr.f32.vlgmr.msra.gmra.mrb[48].mxu0 %v12550_v5 }
 0xd0c   :  { %18918 = vmatpush3.bf16.msra.mxu0 %v18915_v36  ;;  %17858 = vmatprep.mubr.f32.mxu0 %v20829_v57 }
 0xd0d   :  { %18920 = vmatprep.subr.bf16.mxu0 %v18919_v35 }
 0xd10   :  { %18922 = vmatpush3.bf16.msra.mxu0 %v18919_v35 }
 0xd11   :  { %18924 = vmatprep.subr.bf16.mxu0 %v18923_v26 }
 0xd13   :  { %17859 = vmatmul.mubr.f32.vlgmr.msra.gmra.mrb[48].mxu0 %v20844_v2 }
 0xd14   :  { %18926 = vmatpush3.bf16.msra.mxu0 %v18923_v26  ;;  %17869 = vmatprep.mubr.f32.mxu0 %v12537_v14 }
 0xd15   :  { %18928 = vmatprep.subr.bf16.mxu0 %v18927_v39 }
 0xd18   :  { %18930 = vmatpush3.bf16.msra.mxu0 %v18927_v39 }
 0xd19   :  { %18932 = vmatprep.subr.bf16.mxu0 %v18907_v11 }
 0xd1b   :  { %17870 = vmatmul.mubr.f32.vlgmr.msra.gmra.mrb[48].mxu0 %v12547_v49 }
 0xd1c   :  { %18934 = vmatpush3.bf16.msra.mxu0 %v18907_v11  ;;  %17880 = vmatprep.mubr.f32.mxu0 %v12538_v21 }
 0xd1d   :  { %18936 = vmatprep.subr.bf16.mxu0 %v18911_v16 }
 0xd20   :  { %18938 = vmatpush3.bf16.msra.mxu0 %v18911_v16 }
 0xd21   :  { %18940 = vmatprep.subr.bf16.mxu0 %v18939_v9 }
 0xd23   :  { %17881 = vmatmul.mubr.f32.vlgmr.msra.gmra.mrb[48].mxu0 %v12548_v15 }
 0xd24   :  { %18942 = vmatpush3.bf16.msra.mxu0 %v18939_v9  ;;  %17891 = vmatprep.mubr.f32.mxu0 %v20829_v57 }
 0xd25   :  { %18944 = vmatprep.subr.bf16.mxu0 %v18943_v56 }
 0xd28   :  { %18946 = vmatpush3.bf16.msra.mxu0 %v18943_v56 }
 0xd29   :  { %18948 = vmatprep.subr.bf16.mxu0 %v18907_v11 }
 0xd2b   :  { %17892 = vmatmul.mubr.f32.vlgmr.msra.gmra.mrb[48].mxu0 %v20844_v2 }
 0xd2c   :  { %18950 = vmatpush3.bf16.msra.mxu0 %v18907_v11  ;;  %17902 = vmatprep.mubr.f32.mxu0 %v20829_v57  ;;  %v13617_v11 = vand.u32 4294901760, %v13616_v23 }
 0xd2d   :  { %18952 = vmatprep.subr.bf16.mxu0 %v18911_v16 }
 0xd2e   :  { %v13618_v41 = vsub.f32 %v13616_v23, %v13617_v11 }
 0xd30   :  { %18954 = vmatpush3.bf16.msra.mxu0 %v18911_v16  ;;  %v13619_v28 = vand.u32 4294901760, %v13618_v41 }
 0xd31   :  { %17905 = vmatprep.subr.mxu0 %v12996_v58 }
 0xd33   :  { %17903 = vmatmul.mubr.f32.vlgmr.msra.gmra.mrb[48].mxu0 %v20844_v2  ;;  %v13609_v2 = vsub.f32 %v15536_v45, %v13511_v12 }
 0xd34   :  { %17906 = vmatpush3.msra.mxu0 %v12996_v58  ;;  %17907 = vmatprep.mubr.f32.mxu0 %v19828_v43 }
 0xd35   :  { %17910 = vmatprep.subr.mxu0 %v13086_v53  ;;  %v13610_v21 = vand.u32 4294901760, %v13609_v2  ;;  %v18975_v0 = vpack.c.bf16 %v13616_v23, %v13609_v2 }
 0xd37   :  { %v13611_v49 = vsub.f32 %v13609_v2, %v13610_v21  ;;  %v18991_v8 = vpack.c.bf16 %v13617_v11, %v13610_v21 }
 0xd39   :  { %v13612_v13 = vand.u32 4294901760, %v13611_v49 }
 0xd3b   :  { %17908 = vmatmul.mubr.f32.vlgmr.msra.gmra.mrb[48].mxu0 %v19834_v25  ;;  %v18967_v1 = vpack.c.bf16 %v13619_v28, %v13612_v13 }
 0xd3c   :  { %17911 = vmatpush3.msra.mxu0 %v13086_v53  ;;  %17912 = vmatprep.mubr.f32.mxu0 %v19799_v24  ;;  %v15542_v53 = vld [vmem:[%s21091_s4 + $0x298] sm:$0xff] }
 0xd3d   :  { %17915 = vmatprep.subr.mxu0 %v13083_v59 }
 0xd43   :  { %17913 = vmatmul.mubr.f32.vlgmr.msra.gmra.mrb[48].mxu0 %v19809_v33 }
 0xd44   :  { %17916 = vmatpush3.msra.mxu0 %v13083_v59  ;;  %17917 = vmatprep.mubr.f32.mxu0 %v19806_v27 }
 0xd45   :  { %17920 = vmatprep.subr.mxu0 %v12996_v58 }
 0xd4b   :  { %17918 = vmatmul.mubr.f32.vlgmr.msra.gmra.mrb[48].mxu0 %v19817_v37  ;;  %v15534_v37 = vld [vmem:[%s21091_s4 + $0x258] sm:$0xff] }
 0xd4c   :  { %17921 = vmatpush3.msra.mxu0 %v12996_v58  ;;  %17922 = vmatprep.mubr.f32.mxu0 %v19812_v34  ;;  %v13505_v43 = vand.u32 4294901760, %v15534_v37 }
 0xd4d   :  { %17925 = vmatprep.subr.mxu0 %v13084_v62 }
 0xd4e   :  { %v13595_v57 = vsub.f32 %v15534_v37, %v13505_v43  ;;  %v14495_v37 = vand.u32 4294901760, %v15542_v53 }
 0xd50   :  { %v13596_v4 = vand.u32 4294901760, %v13595_v57 }
 0xd52   :  { %v13597_v14 = vsub.f32 %v13595_v57, %v13596_v4 }
 0xd53   :  { %17923 = vmatmul.mubr.f32.vlgmr.msra.gmra.mrb[48].mxu0 %v19825_v42  ;;  %v15535_v42 = vld [vmem:[%s21091_s4 + $0x260] sm:$0xff] }
 0xd54   :  { %17926 = vmatpush3.msra.mxu0 %v13084_v62  ;;  %17927 = vmatprep.mubr.f32.mxu0 %v19799_v24  ;;  %v13598_v20 = vand.u32 4294901760, %v13597_v14 }
 0xd55   :  { %17930 = vmatprep.subr.mxu0 %v12996_v58 }
 0xd5b   :  { %17928 = vmatmul.mubr.f32.vlgmr.msra.gmra.mrb[48].mxu0 %v19809_v33 }
 0xd5c   :  { %17931 = vmatpush3.msra.mxu0 %v12996_v58  ;;  %17932 = vmatprep.mubr.f32.mxu0 %v19799_v24  ;;  %v13508_v24 = vand.u32 4294901760, %v15535_v42 }
 0xd5d   :  { %19033 = vmatprep.subr.bf16.mxu0 %v21128_v47 }
 0xd5e   :  { %v20888_v25 = vpack.c.bf16 %v13508_v24, %v13505_v43  ;;  %v20923_v43 = vsub.f32 %v15542_v53, %v14495_v37 }
 0xd60   :  { %18956 = vmatprep.subr.bf16.mxu1 %v20888_v25 }
 0xd61   :  { %18958 = vmatpush3.bf16.msra.mxu1 %v20888_v25 }
 0xd62   :  { %18960 = vmatprep.subr.bf16.mxu1 %v20898_v10 }
 0xd63   :  { %17933 = vmatmul.mubr.f32.vlgmr.msra.gmra.mrb[48].mxu0 %v19809_v33  ;;  %v13602_v33 = vsub.f32 %v15535_v42, %v13508_v24 }
 0xd64   :  { %18073 = vmatprep.mubr.msk.f32.mxu0 %vm19419_vm0, %v21119_v51 }
 0xd65   :  { %v13603_v17 = vand.u32 4294901760, %v13602_v33  ;;  %18962 = vmatpush3.bf16.msra.mxu1 %v20898_v10  ;;  %v18971_v16 = vpack.c.bf16 %v13602_v33, %v13595_v57  ;;  %v13497_v57 = vrot.slane %v20725_v38, %v19927_v55 }
 0xd67   :  { %v13604_v44 = vsub.f32 %v13602_v33, %v13603_v17  ;;  %v18987_v15 = vpack.c.bf16 %v13603_v17, %v13596_v4 }
 0xd69   :  { %v13605_v61 = vand.u32 4294901760, %v13604_v44 }
 0xd6b   :  { %v18963_v63 = vpack.c.bf16 %v13605_v61, %v13598_v20 }
 0xd6d   :  { %18964 = vmatprep.subr.bf16.mxu1 %v18963_v63 }
 0xda6   :  { %v20880_v27 = vpop.f32.mrb[46].mxu0 }
 0xda7   :  { %v17724_v34 = vpop.f32.mrb[47].mxu0 }
 0xda8   :  { %v15543_v34 = vld [vmem:[%s21091_s4 + $0x2a0] sm:$0xff] }
 0xda9   :  { %v14498_v42 = vand.u32 4294901760, %v15543_v34 }
 0xdab   :  { %v20925_v24 = vsub.f32 %v15543_v34, %v14498_v42 }
 0xe36   :  { %v17934_v40 = vpop.f32.mrb[48].mxu0 }
 0xe37   :  { %v13491_v46 = vadd.f32 %v17934_v40, %v13489_v30  ;;  %v13474_v32 = vpop.f32.mrb[49].mxu0 }
 0xe38   :  { %v13490_v36 = vadd.f32 %v13489_v30, %v13474_v32 }
 0xe39   :  { %v13493_v48 = vmax.f32 %v13491_v46, 0.0 }
 0xe3a   :  { %v13492_v3 = vmax.f32 %v13490_v36, 0.0  ;;  %v10863_v36 = vrot.slane %v20725_v38, %v21131_v7 }
 0xe3b   :  { %v13502_v5 = vsel %vm29_vm1, %v13493_v48, 0 }
 0xe3c   :  { %v13583_v35 = vand.u32 4294901760, %v13502_v5  ;;  %v13499_v26 = vsel %vm29_vm1, %v13492_v3, 0  ;;  %v19102_v48 = vadd.f32 %v20880_v27, %v10863_v36  ;;  %v14576_v3 = vand.u32 4294901760, %v20923_v43  ;;  %v15538_v27 = vld [vmem:[%s21091_s4 + $0x278] sm:$0xff] }
 0xe3d   :  { %v13573_v39 = vand.u32 4294901760, %v13499_v26  ;;  %v14983_v34 = vand.u32 4294901760, %v15538_v27 }
 0xe3e   :  { %v13584_v9 = vsub.f32 %v13502_v5, %v13583_v35  ;;  %v14583_v5 = vand.u32 4294901760, %v20925_v24 }
 0xe3f   :  { %v13574_v52 = vsub.f32 %v13499_v26, %v13573_v39  ;;  %v14980_v26 = vsel %vm29_vm1, %v19102_v48, 0 }
 0xe40   :  { %v13585_v56 = vand.u32 4294901760, %v13584_v9  ;;  %v20982_v7 = vand.u32 4294901760, %v14980_v26 }
 0xe41   :  { %v13575_v58 = vand.u32 4294901760, %v13574_v52 }
 0xe42   :  { %v13586_v59 = vsub.f32 %v13584_v9, %v13585_v56 }
 0xe43   :  { %v13576_v62 = vsub.f32 %v13574_v52, %v13575_v58 }
 0xe44   :  { %v13587_v31 = vand.u32 4294901760, %v13586_v59  ;;  %v19046_v59 = vpack.c.bf16 %v14583_v5, %v14576_v3 }
 0xe45   :  { %v13577_v50 = vand.u32 4294901760, %v13576_v62  ;;  %v15539_v62 = vld [vmem:[%s21091_s4 + $0x280] sm:$0xff] }
 0xe47   :  { %17943 = vmatprep.mubr.f32.mxu1 %v13577_v50 }
 0xe48   :  { %17944 = vmatmul.mubr.f32.vlgmr.msra.gmra.mrb[36].mxu1 %v13587_v31 }
 0xe49   :  { %18966 = vmatpush3.bf16.msra.mxu1 %v18963_v63  ;;  %17954 = vmatprep.mubr.f32.mxu1 %v13573_v39 }
 0xe4a   :  { %18968 = vmatprep.subr.bf16.mxu1 %v18967_v1 }
 0xe4d   :  { %18970 = vmatpush3.bf16.msra.mxu1 %v18967_v1  ;;  %v20962_v1 = vpack.c.bf16 %v14498_v42, %v14495_v37  ;;  %v14986_v37 = vand.u32 4294901760, %v15539_v62  ;;  %v20998_v42 = vsub.f32 %v14980_v26, %v20982_v7 }
 0xe4e   :  { %18972 = vmatprep.subr.bf16.mxu1 %v18971_v16 }
 0xe50   :  { %17955 = vmatmul.mubr.f32.vlgmr.msra.gmra.mrb[36].mxu1 %v13583_v35 }
 0xe51   :  { %18974 = vmatpush3.bf16.msra.mxu1 %v18971_v16  ;;  %17965 = vmatprep.mubr.f32.mxu1 %v13574_v52  ;;  %v14577_v52 = vsub.f32 %v20923_v43, %v14576_v3 }
 0xe52   :  { %18976 = vmatprep.subr.bf16.mxu1 %v18975_v0 }
 0xe53   :  { %v14578_v50 = vand.u32 4294901760, %v14577_v52 }
 0xe55   :  { %18978 = vmatpush3.bf16.msra.mxu1 %v18975_v0 }
 0xe56   :  { %18980 = vmatprep.subr.bf16.mxu1 %v20888_v25 }
 0xe58   :  { %17966 = vmatmul.mubr.f32.vlgmr.msra.gmra.mrb[36].mxu1 %v13584_v9 }
 0xe59   :  { %18982 = vmatpush3.bf16.msra.mxu1 %v20888_v25  ;;  %17976 = vmatprep.mubr.f32.mxu1 %v13575_v58 }
 0xe5a   :  { %18984 = vmatprep.subr.bf16.mxu1 %v20898_v10 }
 0xe5d   :  { %18986 = vmatpush3.bf16.msra.mxu1 %v20898_v10 }
 0xe5e   :  { %18988 = vmatprep.subr.bf16.mxu1 %v18987_v15 }
 0xe60   :  { %17977 = vmatmul.mubr.f32.vlgmr.msra.gmra.mrb[36].mxu1 %v13585_v56  ;;  %v14584_v56 = vsub.f32 %v20925_v24, %v14583_v5 }
 0xe61   :  { %18990 = vmatpush3.bf16.msra.mxu1 %v18987_v15  ;;  %17987 = vmatprep.mubr.f32.mxu1 %v13573_v39 }
 0xe62   :  { %18992 = vmatprep.subr.bf16.mxu1 %v18991_v8  ;;  %v14585_v31 = vand.u32 4294901760, %v14584_v56 }
 0xe65   :  { %18994 = vmatpush3.bf16.msra.mxu1 %v18991_v8 }
 0xe66   :  { %18996 = vmatprep.subr.bf16.mxu1 %v20888_v25 }
 0xe68   :  { %17988 = vmatmul.mubr.f32.vlgmr.msra.gmra.mrb[36].mxu1 %v13583_v35 }
 0xe69   :  { %18998 = vmatpush3.bf16.msra.mxu1 %v20888_v25  ;;  %17998 = vmatprep.mubr.f32.mxu1 %v13573_v39  ;;  %v19034_v25 = vpack.c.bf16 %v20925_v24, %v20923_v43  ;;  %v15540_v24 = vld [vmem:[%s21091_s4 + $0x288] sm:$0xff] }
 0xe6a   :  { %19000 = vmatprep.subr.bf16.mxu1 %v20898_v10 }
 0xe6b   :  { %19035 = vmatpush3.bf16.msra.mxu0 %v19034_v25  ;;  %v15541_v25 = vld [vmem:[%s21091_s4 + $0x290] sm:$0xff] }
 0xe6c   :  { %19036 = vmatprep.subr.bf16.mxu0 %v21128_v47 }
 0xe6d   :  { %19002 = vmatpush3.bf16.msra.mxu1 %v20898_v10 }
 0xe6e   :  { %19003 = vmatprep.subr.bf16.mxu1 %v21128_v47 }
 0xe70   :  { %17999 = vmatmul.mubr.f32.vlgmr.msra.gmra.mrb[36].mxu1 %v13583_v35 }
 0xe71   :  { %18005 = vmatprep.mubr.msk.f32.mxu1 %vm19419_vm0, %v21119_v51 }
 0xf43   :  { %v18000_v33 = vpop.f32.mrb[36].mxu1 }
 0xf44   :  { %v19103_v45 = vadd.f32 %v18000_v33, %v13497_v57  ;;  %v14022_v6 = vpop.f32.mrb[37].mxu1 }
 0xf45   :  { %v19104_v12 = vadd.f32 %v14022_v6, %v13497_v57  ;;  %v19028_v57 = vpack.c.bf16 %v14585_v31, %v14578_v50  ;;  %v14989_v6 = vand.u32 4294901760, %v15540_v24 }
 0xf46   :  { %v14036_v22 = vand.u32 4294901760, %v19103_v45 }
 0xf47   :  { %v14033_v4 = vand.u32 4294901760, %v19104_v12 }
 0xf48   :  { %v14118_v17 = vsub.f32 %v19103_v45, %v14036_v22  ;;  %v21008_v45 = vpack.c.bf16 %v14986_v37, %v14983_v34 }
 0xf49   :  { %v19004_v10 = vpack.c.bf16 %v14036_v22, %v14033_v4  ;;  %v14111_v14 = vsub.f32 %v19104_v12, %v14033_v4  ;;  %v14992_v12 = vand.u32 4294901760, %v15541_v25  ;;  %v15053_v22 = vand.u32 4294901760, %v20998_v42 }
 0xf4a   :  { %v14119_v44 = vand.u32 4294901760, %v14118_v17  ;;  %v15063_v4 = vsub.f32 %v15538_v27, %v14983_v34 }
 0xf4b   :  { %v14112_v2 = vand.u32 4294901760, %v14111_v14  ;;  %v19010_v23 = vpack.c.bf16 %v14118_v17, %v14111_v14  ;;  %19005 = vmatpush3.bf16.msra.mxu1 %v19004_v10 }
 0xf4c   :  { %v14120_v20 = vsub.f32 %v14118_v17, %v14119_v44  ;;  %19006 = vmatprep.subr.bf16.mxu1 %v21128_v47  ;;  %v15070_v17 = vsub.f32 %v15539_v62, %v14986_v37 }
 0xf4d   :  { %v14113_v61 = vsub.f32 %v14111_v14, %v14112_v2  ;;  %v19016_v21 = vpack.c.bf16 %v14119_v44, %v14112_v2  ;;  %v15054_v14 = vsub.f32 %v20998_v42, %v15053_v22  ;;  %v15077_v44 = vsub.f32 %v15540_v24, %v14989_v6 }
 0xf4e   :  { %v14121_v11 = vand.u32 4294901760, %v14120_v20  ;;  %18006 = vmatmul.mubr.f32.vlgmr.msra.gmra.mrb[38].mxu1 %v19939_v18  ;;  %v15545_v18 = vld [vmem:[%s21091_s4 + $0x2b0] sm:$0xff]  ;;  %v15084_v2 = vsub.f32 %v15541_v25, %v14992_v12 }
 0xf4f   :  { %v14114_v55 = vand.u32 4294901760, %v14113_v61  ;;  %18012 = vmatprep.mubr.msk.f32.mxu1 %vm19419_vm0, %v21119_v51  ;;  %v14504_v49 = vand.u32 4294901760, %v15545_v18  ;;  %v15055_v20 = vand.u32 4294901760, %v15054_v14 }
 0xf50   :  { %v19073_v61 = vpack.c.bf16 %v15084_v2, %v15077_v44 }
 0xf51   :  { %v19007_v63 = vpack.c.bf16 %v14121_v11, %v14114_v55  ;;  %v14596_v13 = vsub.f32 %v15545_v18, %v14504_v49  ;;  %v15071_v11 = vand.u32 4294901760, %v15070_v17  ;;  %v15078_v18 = vand.u32 4294901760, %v15077_v44 }
 0xf53   :  { %19008 = vmatpush3.bf16.msra.mxu1 %v19007_v63  ;;  %v14597_v0 = vand.u32 4294901760, %v14596_v13  ;;  %v15072_v63 = vsub.f32 %v15070_v17, %v15071_v11 }
 0xf54   :  { %19009 = vmatprep.subr.bf16.mxu1 %v21128_v47 }
 0xf55   :  { %v14598_v30 = vsub.f32 %v14596_v13, %v14597_v0 }
 0xf56   :  { %18013 = vmatmul.mubr.f32.vlgmr.msra.gmra.mrb[38].mxu1 %v19924_v54 }
 0xf57   :  { %19011 = vmatpush3.bf16.msra.mxu1 %v19010_v23  ;;  %18019 = vmatprep.mubr.msk.f32.mxu1 %vm19419_vm0, %v21119_v51  ;;  %v14599_v46 = vand.u32 4294901760, %v14598_v30  ;;  %v19070_v23 = vpack.c.bf16 %v15070_v17, %v15063_v4 }
 0xf58   :  { %19012 = vmatprep.subr.bf16.mxu1 %v21128_v47 }
 0xf5e   :  { %18020 = vmatmul.mubr.f32.vlgmr.msra.gmra.mrb[38].mxu1 %v19930_v60  ;;  %v15544_v60 = vld [vmem:[%s21091_s4 + $0x2a8] sm:$0xff] }
 0xf5f   :  { %19014 = vmatpush3.bf16.msra.mxu1 %v19004_v10  ;;  %18026 = vmatprep.mubr.msk.f32.mxu1 %vm19419_vm0, %v21119_v51 }
 0xf60   :  { %19015 = vmatprep.subr.bf16.mxu1 %v21128_v47 }
 0xf66   :  { %18027 = vmatmul.mubr.f32.vlgmr.msra.gmra.mrb[38].mxu1 %v21130_v19  ;;  %v14501_v19 = vand.u32 4294901760, %v15544_v60 }
 0xf67   :  { %19017 = vmatpush3.bf16.msra.mxu1 %v19016_v21  ;;  %18033 = vmatprep.mubr.msk.f32.mxu1 %vm19419_vm0, %v21119_v51  ;;  %v15064_v21 = vand.u32 4294901760, %v15063_v4 }
 0xf68   :  { %19018 = vmatprep.subr.bf16.mxu1 %v21128_v47  ;;  %v14589_v41 = vsub.f32 %v15544_v60, %v14501_v19 }
 0xf69   :  { %v15065_v55 = vsub.f32 %v15063_v4, %v15064_v21  ;;  %v19082_v60 = vpack.c.bf16 %v15071_v11, %v15064_v21 }
 0xf6a   :  { %v19037_v28 = vpack.c.bf16 %v14596_v13, %v14589_v41  ;;  %v14590_v16 = vand.u32 4294901760, %v14589_v41  ;;  %v15079_v13 = vsub.f32 %v15077_v44, %v15078_v18 }
 0xf6c   :  { %19038 = vmatpush3.bf16.msra.mxu0 %v19037_v28  ;;  %v19049_v15 = vpack.c.bf16 %v14597_v0, %v14590_v16  ;;  %v14591_v8 = vsub.f32 %v14589_v41, %v14590_v16  ;;  %v15073_v41 = vand.u32 4294901760, %v15072_v63  ;;  %v15080_v0 = vand.u32 4294901760, %v15079_v13 }
 0xf6d   :  { %19045 = vmatprep.subr.bf16.mxu0 %v21128_v47 }
 0xf6e   :  { %18034 = vmatmul.mubr.f32.vlgmr.msra.gmra.mrb[38].mxu1 %v19924_v54  ;;  %v14592_v40 = vand.u32 4294901760, %v14591_v8 }
 0xf6f   :  { %19020 = vmatpush3.bf16.msra.mxu1 %v19004_v10  ;;  %18040 = vmatprep.mubr.msk.f32.mxu1 %vm19419_vm0, %v21119_v51  ;;  %v21017_v10 = vpack.c.bf16 %v14992_v12, %v14989_v6 }
 0xf70   :  { %19021 = vmatprep.subr.bf16.mxu1 %v21128_v47  ;;  %v19031_v32 = vpack.c.bf16 %v14599_v46, %v14592_v40 }
 0xf76   :  { %18041 = vmatmul.mubr.f32.vlgmr.msra.gmra.mrb[38].mxu1 %v19924_v54  ;;  %v20967_v54 = vpack.c.bf16 %v14504_v49, %v14501_v19  ;;  %v15085_v19 = vand.u32 4294901760, %v15084_v2  ;;  %v15066_v49 = vand.u32 4294901760, %v15065_v55 }
 0xf77   :  { %18051 = vmatprep.mubr.msk.f32.mxu1 %vm19419_vm0, %v21119_v51  ;;  %19023 = vmatpush3.bf16.msra.mxu1 %v20962_v1 }
 0xf78   :  { %19024 = vmatprep.subr.bf16.mxu1 %v21128_v47  ;;  %v15086_v28 = vsub.f32 %v15084_v2, %v15085_v19  ;;  %v19085_v16 = vpack.c.bf16 %v15085_v19, %v15078_v18 }
 0xf7b   :  { %19026 = vmatpush3.bf16.msra.mxu1 %v20967_v54 }
 0xf7c   :  { %19027 = vmatprep.subr.bf16.mxu1 %v21128_v47 }
0x1049   :  { %v14487_v35 = vpop.f32.mrb[38].mxu1 }
0x104a   :  { %v14492_v39 = vsel %vm29_vm1, %v14487_v35, 0  ;;  %v18042_v9 = vpop.f32.mrb[39].mxu1 }
0x104b   :  { %v20980_v58 = vand.u32 4294901760, %v14492_v39 }
0x104d   :  { %v20985_v38 = vsub.f32 %v14492_v39, %v20980_v58 }
0x104f   :  { %v14565_v53 = vand.u32 4294901760, %v20985_v38  ;;  %18074 = vmatmul.mubr.f32.vlgmr.msra.gmra.mrb[50].mxu0 %v20985_v38 }
0x1050   :  { %19047 = vmatpush3.bf16.msra.mxu0 %v19046_v59  ;;  %18095 = vmatprep.mubr.msk.f32.mxu0 %vm19419_vm0, %v21119_v51 }
0x1051   :  { %v14566_v43 = vsub.f32 %v20985_v38, %v14565_v53  ;;  %19048 = vmatprep.subr.bf16.mxu0 %v21128_v47 }
0x1053   :  { %v14567_v33 = vand.u32 4294901760, %v14566_v43 }
0x1054   :  { %19050 = vmatpush3.bf16.msra.mxu0 %v19049_v15  ;;  %v15087_v15 = vand.u32 4294901760, %v15086_v28 }
0x1055   :  { %18052 = vmatmul.mubr.f32.vlgmr.msra.gmra.mrb[40].mxu1 %v14567_v33  ;;  %19057 = vmatprep.subr.bf16.mxu0 %v21128_v47 }
0x1056   :  { %19029 = vmatpush3.bf16.msra.mxu1 %v19028_v57  ;;  %18062 = vmatprep.mubr.msk.f32.mxu1 %vm19419_vm0, %v21119_v51  ;;  %v19067_v8 = vpack.c.bf16 %v15087_v15, %v15080_v0  ;;  %v19393_v57 = vld [vmem:[%s21092_s5 + $0x10] sm:$0xff] }
0x1057   :  { %18096 = vmatmul.mubr.f32.vlgmr.msra.gmra.mrb[52].mxu0 %v20980_v58  ;;  %19030 = vmatprep.subr.bf16.mxu1 %v21128_v47  ;;  %v15470_v33 = vrot.slane %v19393_v57, %v20174_v29 }
0x1058   :  { %19059 = vmatpush3.bf16.msra.mxu0 %v21008_v45  ;;  %18117 = vmatprep.mubr.msk.f32.mxu0 %vm19419_vm0, %v21119_v51 }
0x1059   :  { %19060 = vmatprep.subr.bf16.mxu0 %v21128_v47 }
0x105a   :  { %19032 = vmatpush3.bf16.msra.mxu1 %v19031_v32 }
0x105b   :  { %19039 = vmatprep.subr.bf16.mxu1 %v21128_v47 }
0x105c   :  { %19062 = vmatpush3.bf16.msra.mxu0 %v21017_v10 }
0x105d   :  { %18063 = vmatmul.mubr.f32.vlgmr.msra.gmra.mrb[42].mxu1 %v20980_v58  ;;  %19069 = vmatprep.subr.bf16.mxu0 %v21128_v47 }
0x105e   :  { %19041 = vmatpush3.bf16.msra.mxu1 %v20962_v1  ;;  %18084 = vmatprep.mubr.msk.f32.mxu1 %vm19419_vm0, %v21119_v51 }
0x105f   :  { %18118 = vmatmul.mubr.f32.vlgmr.msra.gmra.mrb[54].mxu0 %v15055_v20  ;;  %19042 = vmatprep.subr.bf16.mxu1 %v21128_v47 }
0x1060   :  { %19071 = vmatpush3.bf16.msra.mxu0 %v19070_v23  ;;  %18139 = vmatprep.mubr.msk.f32.mxu0 %vm19419_vm0, %v21119_v51 }
0x1061   :  { %19072 = vmatprep.subr.bf16.mxu0 %v21128_v47 }
0x1062   :  { %19044 = vmatpush3.bf16.msra.mxu1 %v20967_v54 }
0x1063   :  { %19051 = vmatprep.subr.bf16.mxu1 %v21128_v47 }
0x1064   :  { %19074 = vmatpush3.bf16.msra.mxu0 %v19073_v61 }
0x1065   :  { %18085 = vmatmul.mubr.f32.vlgmr.msra.gmra.mrb[44].mxu1 %v14565_v53  ;;  %19081 = vmatprep.subr.bf16.mxu0 %v21128_v47 }
0x1066   :  { %19053 = vmatpush3.bf16.msra.mxu1 %v20962_v1  ;;  %18106 = vmatprep.mubr.msk.f32.mxu1 %vm19419_vm0, %v21119_v51  ;;  %v19064_v1 = vpack.c.bf16 %v15073_v41, %v15066_v49 }
0x1067   :  { %18140 = vmatmul.mubr.f32.vlgmr.msra.gmra.mrb[56].mxu0 %v20998_v42  ;;  %19054 = vmatprep.subr.bf16.mxu1 %v21128_v47 }
0x1068   :  { %19083 = vmatpush3.bf16.msra.mxu0 %v19082_v60  ;;  %18161 = vmatprep.mubr.msk.f32.mxu0 %vm19419_vm0, %v21119_v51 }
0x1069   :  { %19084 = vmatprep.subr.bf16.mxu0 %v21128_v47 }
0x106a   :  { %19056 = vmatpush3.bf16.msra.mxu1 %v20967_v54 }
0x106b   :  { %19063 = vmatprep.subr.bf16.mxu1 %v21128_v47 }
0x106c   :  { %19086 = vmatpush3.bf16.msra.mxu0 %v19085_v16 }
0x106d   :  { %18107 = vmatmul.mubr.f32.vlgmr.msra.gmra.mrb[46].mxu1 %v20980_v58 }
0x106e   :  { %19065 = vmatpush3.bf16.msra.mxu1 %v19064_v1  ;;  %18128 = vmatprep.mubr.msk.f32.mxu1 %vm19419_vm0, %v21119_v51 }
0x106f   :  { %18162 = vmatmul.mubr.f32.vlgmr.msra.gmra.mrb[58].mxu0 %v20982_v7  ;;  %19066 = vmatprep.subr.bf16.mxu1 %v21128_v47 }
0x1072   :  { %19068 = vmatpush3.bf16.msra.mxu1 %v19067_v8 }
0x1073   :  { %19075 = vmatprep.subr.bf16.mxu1 %v21128_v47 }
0x1075   :  { %18129 = vmatmul.mubr.f32.vlgmr.msra.gmra.mrb[48].mxu1 %v20982_v7 }
0x1076   :  { %19077 = vmatpush3.bf16.msra.mxu1 %v21008_v45  ;;  %18150 = vmatprep.mubr.msk.f32.mxu1 %vm19419_vm0, %v21119_v51 }
0x1077   :  { %19078 = vmatprep.subr.bf16.mxu1 %v21128_v47 }
0x107a   :  { %19080 = vmatpush3.bf16.msra.mxu1 %v21017_v10 }
0x107b   :  { %19087 = vmatprep.subr.bf16.mxu1 %v21128_v47 }
0x107d   :  { %18151 = vmatmul.mubr.f32.vlgmr.msra.gmra.mrb[50].mxu1 %v15053_v22 }
0x107e   :  { %19089 = vmatpush3.bf16.msra.mxu1 %v21008_v45  ;;  %18172 = vmatprep.mubr.msk.f32.mxu1 %vm19419_vm0, %v21119_v51 }
0x107f   :  { %19090 = vmatprep.subr.bf16.mxu1 %v21128_v47 }
0x1082   :  { %19092 = vmatpush3.bf16.msra.mxu1 %v21017_v10 }
0x1085   :  { %18173 = vmatmul.mubr.f32.vlgmr.msra.gmra.mrb[52].mxu1 %v20982_v7 }
0x1122   :  { %v14740_v54 = vpop.f32.mrb[50].mxu0 }
0x1123   :  { %v18075_v30 = vpop.f32.mrb[51].mxu0 }
0x1128   :  { %v14569_v40 = vpop.f32.mrb[40].mxu1 }
0x1129   :  { %v18053_v46 = vpop.f32.mrb[41].mxu1 }
0x112a   :  { %v14900_v32 = vpop.f32.mrb[52].mxu0 }
0x112b   :  { %v18097_v36 = vpop.f32.mrb[53].mxu0 }
0x1130   :  { %v14660_v48 = vpop.f32.mrb[42].mxu1 }
0x1131   :  { %v14661_v3 = vadd.f32 %v14660_v48, %v14569_v40  ;;  %v18064_v5 = vpop.f32.mrb[43].mxu1 }
0x1132   :  { %v15057_v35 = vpop.f32.mrb[54].mxu0 }
0x1133   :  { %v18119_v26 = vpop.f32.mrb[55].mxu0  ;;  %v14741_v39 = vadd.f32 %v14740_v54, %v14661_v3 }
0x1138   :  { %v14817_v9 = vpop.f32.mrb[44].mxu1 }
0x1139   :  { %v14818_v51 = vadd.f32 %v14817_v9, %v14741_v39  ;;  %v18086_v52 = vpop.f32.mrb[45].mxu1 }
0x113a   :  { %v15228_v47 = vpop.f32.mrb[56].mxu0 }
0x113b   :  { %v18141_v56 = vpop.f32.mrb[57].mxu0  ;;  %v14901_v58 = vadd.f32 %v14900_v32, %v14818_v51 }
0x1140   :  { %v14975_v59 = vpop.f32.mrb[46].mxu1 }
0x1141   :  { %v14976_v7 = vadd.f32 %v14975_v59, %v14901_v58  ;;  %v18108_v38 = vpop.f32.mrb[47].mxu1 }
0x1142   :  { %v15388_v27 = vpop.f32.mrb[58].mxu0 }
0x1143   :  { %v18163_v62 = vpop.f32.mrb[59].mxu0  ;;  %v15058_v50 = vadd.f32 %v15057_v35, %v14976_v7 }
0x1148   :  { %v15148_v31 = vpop.f32.mrb[48].mxu1 }
0x1149   :  { %v15149_v53 = vadd.f32 %v15148_v31, %v15058_v50  ;;  %v18130_v34 = vpop.f32.mrb[49].mxu1 }
0x114b   :  { %v15229_v37 = vadd.f32 %v15228_v47, %v15149_v53 }
0x1150   :  { %v15305_v42 = vpop.f32.mrb[50].mxu1 }
0x1151   :  { %v15306_v43 = vadd.f32 %v15305_v42, %v15229_v37  ;;  %v18152_v24 = vpop.f32.mrb[51].mxu1 }
0x1153   :  { %v15389_v25 = vadd.f32 %v15388_v27, %v15306_v43 }
0x1158   :  { %v15463_v45 = vpop.f32.mrb[52].mxu1 }
0x1159   :  { %v15464_v6 = vadd.f32 %v15463_v45, %v15389_v25  ;;  %v18174_v12 = vpop.f32.mrb[53].mxu1 }
0x115b   :  { %v15471_v22 = vadd.f32 %v15470_v33, %v15464_v6 }
0x115d   :  { %15472 = vst.msk [vmem:[#allocation2] sm:$0xff] %vm29_vm1, %v15471_v22 }
0x115e   :  { %19405 = shalt.err (!%p19402_p4)
}
0x115f   :  { %s19406_s7 = scalar_lea.hbm %s21093_s6, 128 }
0x1160   :  { %p19407_p5 = scmp.ne.s32.totalorder %s21093_s6, %s19406_s7  ;;  %p19410_p6 = scmp.lt.u32.totalorder %s19406_s7, %s21093_s6 }
0x1162   :  { %p19412_p7 = pnand %p19410_p6, %p19407_p5 }
0x1164   :  { %19415 = shalt.err (!%p19412_p7)
}
0x1165   :  { %15482 = dma.vmem_to_hbm [thread:$0]  %s15480_s30, 128, %s21093_s6, [#allocation3]  }
0x1166   :  { %19416 = dma.done.wait [#allocation3], 128  }
0x1167   :  { %19417 = vsyncadd [#allocation3], 4294967168 }
0x1168   :  { %15486 = vsyncpa [#allocation3], 1 }

</bundles_post_ra>
